<compile_context>
chip_gen: v5e
topology: v5e:2x2
jax: 0.10.0
libtpu: 0.0.40
codegen_flags: <defaults>
</compile_context>

<pallas_src>
import functools

import jax
import jax.numpy as jnp
from jax.experimental import pallas as pl
from jax.experimental.pallas import tpu as pltpu


# ----------------------------------------------------------------------------
# Kernel
# ----------------------------------------------------------------------------
def _vae_kernel(state_ref, action_ref, eps_ref,
                w_e1_s, w_e1_a, b_e1,
                w_e2, b_e2,
                w_ml, b_ml,
                w_d1_s, w_d1_z, b_d1,
                w_d2, b_d2,
                w_d3, b_d3,
                u_ref, mean_ref, std_ref,
                *, latent_dim, max_action, clip):
    f32 = jnp.float32
    bf16 = jnp.bfloat16

    s = state_ref[...]
    a = action_ref[...]
    s_b = s.astype(bf16)
    a_b = a.astype(bf16)

    def mm(x_bf16, w_ref):
        return jnp.dot(x_bf16, w_ref[...], preferred_element_type=f32)

    # ---------------- encoder (concat-free: split first-layer weights) ------
    h = mm(s_b, w_e1_s) + mm(a_b, w_e1_a) + b_e1[...]
    h = jnp.maximum(h, 0.0)                                    # relu(e1)
    h = mm(h.astype(bf16), w_e2) + b_e2[...]
    h = jnp.maximum(h, 0.0)                                    # relu(e2)

    # fused mean / log_std head: one (512, 2*latent) dot, then lane-slice
    ml = mm(h.astype(bf16), w_ml) + b_ml[...]
    mean = ml[:, :latent_dim]
    log_std = ml[:, latent_dim:]
    std = jnp.exp(log_std)

    # reparameterization: z = mean + std * eps  (eps ~ N(0,1), fed from host)
    z = mean + std * eps_ref[...]

    # ---------------- decoder (concat-free) ----------------------------------
    z = jnp.clip(z, -clip, clip)                               # z.clamp(-1, 1)
    d = mm(s_b, w_d1_s) + mm(z.astype(bf16), w_d1_z) + b_d1[...]
    d = jnp.maximum(d, 0.0)                                    # relu(d1)
    d = mm(d.astype(bf16), w_d2) + b_d2[...]
    d = jnp.maximum(d, 0.0)                                    # relu(d2)
    d = mm(d.astype(bf16), w_d3) + b_d3[...]

    u_ref[...] = max_action * jnp.tanh(d)
    mean_ref[...] = mean
    std_ref[...] = std


# ----------------------------------------------------------------------------
# Wrapper
# ----------------------------------------------------------------------------
def vae_forward(state, action, eps, prep, *, latent_dim, max_action=1.0,
                clip=1.0):
    """Full VAE forward (encode + reparam + decode) in one pallas_call.
    All operands fit in VMEM (~2.1 MiB of bf16 weights), so every array is a
    single full-extent VMEM block and there is no grid."""
    B = state.shape[0]
    action_dim = action.shape[1]

    ordered = [
        state, action, eps,
        prep["w_e1_s"], prep["w_e1_a"], prep["b_e1"],
        prep["w_e2"], prep["b_e2"],
        prep["w_ml"], prep["b_ml"],
        prep["w_d1_s"], prep["w_d1_z"], prep["b_d1"],
        prep["w_d2"], prep["b_d2"],
        prep["w_d3"], prep["b_d3"],
    ]

    out_shapes = (
        jax.ShapeDtypeStruct((B, action_dim), jnp.float32),   # u
        jax.ShapeDtypeStruct((B, latent_dim), jnp.float32),   # mean
        jax.ShapeDtypeStruct((B, latent_dim), jnp.float32),   # std
    )

    # advisory cost estimate so XLA can overlap the weight HBM reads
    weight_elems = sum(int(prep[k].size) for k in
                       ("w_e1_s", "w_e1_a", "w_e2", "w_ml",
                        "w_d1_s", "w_d1_z", "w_d2", "w_d3"))
    flops = 2 * B * weight_elems
    transcendentals = B * (latent_dim + action_dim)            # exp + tanh
    bytes_accessed = (sum(int(x.size) * x.dtype.itemsize for x in ordered)
                      + sum(int(o.size) * o.dtype.itemsize for o in out_shapes))

    vmem_spec = pl.BlockSpec(memory_space=pltpu.MemorySpace.VMEM)
    kernel = functools.partial(_vae_kernel, latent_dim=latent_dim,
                               max_action=max_action, clip=clip)

    u, mean, std = pl.pallas_call(
        kernel,
        out_shape=out_shapes,
        in_specs=[vmem_spec] * len(ordered),
        out_specs=(vmem_spec, vmem_spec, vmem_spec),
        compiler_params=pltpu.CompilerParams(vmem_limit_bytes=32 << 20),
        cost_estimate=pl.CostEstimate(flops=flops,
                                      transcendentals=transcendentals,
                                      bytes_accessed=bytes_accessed),
    )(*ordered)
    return u, mean, std


# ----------------------------------------------------------------------------
# Parameter init / prep
# ----------------------------------------------------------------------------
def init_params(key, state_dim, action_dim, latent_dim):
    """Deterministic synthetic init matching the torch module's layer shapes.
    Weights are stored as (in_features, out_features), all f32."""
    dims = {
        "e1": (state_dim + action_dim, 1000),
        "e2": (1000, 500),
        "mu": (500, latent_dim),
        "ls": (500, latent_dim),
        "d1": (state_dim + latent_dim, 500),
        "d2": (500, 1000),
        "d3": (1000, action_dim),
    }
    params = {}
    for name, (fin, fout) in dims.items():
        key, kw, kb = jax.random.split(key, 3)
        bound = 1.0 / jnp.sqrt(fin)  # torch.nn.Linear default init range
        params[f"w_{name}"] = jax.random.uniform(
            kw, (fin, fout), jnp.float32, -bound, bound)
        params[f"b_{name}"] = jax.random.uniform(
            kb, (1, fout), jnp.float32, -bound, bound)
    return params


def prepare_params(params, state_dim, action_dim, latent_dim,
                   h1=1000, h2=500, h1p=1024, h2p=512):
    """Wrapper-side weight prep (done once):
      * zero-pad hidden dims (1000->1024, 500->512) -- exact through
        matmul + ReLU since padded rows/cols and padded biases are all zero,
      * split the concat layers (e1, d1) into per-input weight blocks,
      * fuse mean / log_std heads into one weight,
      * cast weight matrices to bf16 (biases stay f32)."""
    bf16 = jnp.bfloat16

    def pad2(x, rows, cols):
        return jnp.pad(x, ((0, rows - x.shape[0]), (0, cols - x.shape[1])))

    w_e1 = pad2(params["w_e1"], state_dim + action_dim, h1p)
    w_d1 = pad2(params["w_d1"], state_dim + latent_dim, h2p)

    prep = {
        # encoder layer 1 (split: state block + action block)
        "w_e1_s": w_e1[:state_dim, :].astype(bf16),
        "w_e1_a": w_e1[state_dim:, :].astype(bf16),
        "b_e1": pad2(params["b_e1"], 1, h1p),
        # encoder layer 2
        "w_e2": pad2(params["w_e2"], h1p, h2p).astype(bf16),
        "b_e2": pad2(params["b_e2"], 1, h2p),
        # fused mean / log_std head
        "w_ml": jnp.concatenate(
            [pad2(params["w_mu"], h2p, latent_dim),
             pad2(params["w_ls"], h2p, latent_dim)], axis=1).astype(bf16),
        "b_ml": jnp.concatenate([params["b_mu"], params["b_ls"]], axis=1),
        # decoder layer 1 (split: state block + latent block)
        "w_d1_s": w_d1[:state_dim, :].astype(bf16),
        "w_d1_z": w_d1[state_dim:, :].astype(bf16),
        "b_d1": pad2(params["b_d1"], 1, h2p),
        # decoder layer 2
        "w_d2": pad2(params["w_d2"], h2p, h1p).astype(bf16),
        "b_d2": pad2(params["b_d2"], 1, h1p),
        # decoder layer 3
        "w_d3": pad2(params["w_d3"], h1p, action_dim).astype(bf16),
        "b_d3": params["b_d3"],
    }
    return prep


# ----------------------------------------------------------------------------
# References (pure JAX) for correctness checking
# ----------------------------------------------------------------------------
def reference_forward_bf16(state, action, eps, prep, *, latent_dim,
                           max_action=1.0, clip=1.0):
    """Emulates the kernel's exact math (bf16 operands, f32 accumulation)."""
    bf16, f32 = jnp.bfloat16, jnp.float32

    def mm(x, w):
        return jnp.dot(x.astype(bf16), w, preferred_element_type=f32)

    h = jax.nn.relu(mm(state, prep["w_e1_s"]) + mm(action, prep["w_e1_a"])
                    + prep["b_e1"])
    h = jax.nn.relu(mm(h, prep["w_e2"]) + prep["b_e2"])
    ml = mm(h, prep["w_ml"]) + prep["b_ml"]
    mean = ml[:, :latent_dim]
    std = jnp.exp(ml[:, latent_dim:])
    z = jnp.clip(mean + std * eps, -clip, clip)
    d = jax.nn.relu(mm(state, prep["w_d1_s"]) + mm(z, prep["w_d1_z"])
                    + prep["b_d1"])
    d = jax.nn.relu(mm(d, prep["w_d2"]) + prep["b_d2"])
    d = mm(d, prep["w_d3"]) + prep["b_d3"]
    return max_action * jnp.tanh(d), mean, std


def reference_forward_f32(state, action, eps, params, *, max_action=1.0,
                          clip=1.0):
    """Full-precision reference on the ORIGINAL (unpadded, f32) params --
    guards against wrapper-side padding / splitting mistakes."""
    x = jnp.concatenate([state, action], axis=1)
    h = jax.nn.relu(x @ params["w_e1"] + params["b_e1"])
    h = jax.nn.relu(h @ params["w_e2"] + params["b_e2"])
    mean = h @ params["w_mu"] + params["b_mu"]
    std = jnp.exp(h @ params["w_ls"] + params["b_ls"])
    z = jnp.clip(mean + std * eps, -clip, clip)
    d = jax.nn.relu(jnp.concatenate([state, z], axis=1) @ params["w_d1"]
                    + params["b_d1"])
    d = jax.nn.relu(d @ params["w_d2"] + params["b_d2"])
    d = d @ params["w_d3"] + params["b_d3"]
    return max_action * jnp.tanh(d), mean, std


# ----------------------------------------------------------------------------
if __name__ == "__main__":
    B = 8
    state_dim = 4
    action_dim = 4
    latent_dim = 1
    max_action = 1.0
    clip = 1.0

    key = jax.random.PRNGKey(0)
    key, ks, ka, ke, kp = jax.random.split(key, 5)

    # mirrors the script-level preprocessing: state/10, action/10
    state = jax.random.uniform(ks, (B, state_dim), jnp.float32) / 10.0
    action = jax.random.uniform(ka, (B, action_dim), jnp.float32) / 10.0
    # randn_like(std): N(0,1) noise generated on host, passed into the kernel
    # TODO(synk): could draw noise in-kernel with pltpu.prng_* instead; kept
    # host-side so the pure-JAX reference sees identical randomness.
    eps = jax.random.normal(ke, (B, latent_dim), jnp.float32)

    params = init_params(kp, state_dim, action_dim, latent_dim)
    prep = prepare_params(params, state_dim, action_dim, latent_dim)

    u, mean, std = vae_forward(state, action, eps, prep,
                               latent_dim=latent_dim,
                               max_action=max_action, clip=clip)
    jax.block_until_ready((u, mean, std))

    # exact-math reference (same bf16 weights / f32 accumulation)
    u_r, m_r, s_r = reference_forward_bf16(state, action, eps, prep,
                                           latent_dim=latent_dim,
                                           max_action=max_action, clip=clip)
    assert jnp.allclose(u, u_r, atol=5e-3, rtol=5e-3), "u mismatch (bf16 ref)"
    assert jnp.allclose(mean, m_r, atol=5e-3, rtol=5e-3), "mean mismatch (bf16 ref)"
    assert jnp.allclose(std, s_r, atol=5e-3, rtol=5e-3), "std mismatch (bf16 ref)"

    # loose check vs. the original f32 module semantics (guards padding/splits)
    u_f, m_f, s_f = reference_forward_f32(state, action, eps, params,
                                          max_action=max_action, clip=clip)
    assert jnp.allclose(u, u_f, atol=5e-2, rtol=5e-2), "u mismatch (f32 ref)"
    assert jnp.allclose(mean, m_f, atol=5e-2, rtol=5e-2), "mean mismatch (f32 ref)"
    assert jnp.allclose(std, s_f, atol=5e-2, rtol=5e-2), "std mismatch (f32 ref)"

    print("KERNEL_OK")
</pallas_src>

<mosaic_0001>
module attributes {stable_mosaic.version = 11 : i64} {
  func.func @_vae_kernel(%arg0: memref<8x4xf32, #tpu.memory_space<vmem>>, %arg1: memref<8x4xf32, #tpu.memory_space<vmem>>, %arg2: memref<8x1xf32, #tpu.memory_space<vmem>>, %arg3: memref<4x1024xbf16, #tpu.memory_space<vmem>>, %arg4: memref<4x1024xbf16, #tpu.memory_space<vmem>>, %arg5: memref<1x1024xf32, #tpu.memory_space<vmem>>, %arg6: memref<1024x512xbf16, #tpu.memory_space<vmem>>, %arg7: memref<1x512xf32, #tpu.memory_space<vmem>>, %arg8: memref<512x2xbf16, #tpu.memory_space<vmem>>, %arg9: memref<1x2xf32, #tpu.memory_space<vmem>>, %arg10: memref<4x512xbf16, #tpu.memory_space<vmem>>, %arg11: memref<1x512xbf16, #tpu.memory_space<vmem>>, %arg12: memref<1x512xf32, #tpu.memory_space<vmem>>, %arg13: memref<512x1024xbf16, #tpu.memory_space<vmem>>, %arg14: memref<1x1024xf32, #tpu.memory_space<vmem>>, %arg15: memref<1024x4xbf16, #tpu.memory_space<vmem>>, %arg16: memref<1x4xf32, #tpu.memory_space<vmem>>, %arg17: memref<8x4xf32, #tpu.memory_space<vmem>>, %arg18: memref<8x1xf32, #tpu.memory_space<vmem>>, %arg19: memref<8x1xf32, #tpu.memory_space<vmem>>) attributes {dimension_semantics = [], scalar_prefetch = 0 : i64, scratch_operands = 0 : i64, tpu.core_type = #tpu.core_type<tc>} {
    %c0 = arith.constant 0 : index
    %c0_0 = arith.constant 0 : index
    %0 = vector.load %arg0[%c0, %c0_0] : memref<8x4xf32, #tpu.memory_space<vmem>>, vector<8x4xf32>
    %c0_1 = arith.constant 0 : index
    %c0_2 = arith.constant 0 : index
    %1 = vector.load %arg1[%c0_1, %c0_2] : memref<8x4xf32, #tpu.memory_space<vmem>>, vector<8x4xf32>
    %2 = arith.truncf %0 : vector<8x4xf32> to vector<8x4xbf16>
    %3 = arith.truncf %1 : vector<8x4xf32> to vector<8x4xbf16>
    %c0_3 = arith.constant 0 : index
    %c0_4 = arith.constant 0 : index
    %4 = vector.load %arg3[%c0_3, %c0_4] : memref<4x1024xbf16, #tpu.memory_space<vmem>>, vector<4x1024xbf16>
    %cst = arith.constant dense<0.000000e+00> : vector<8x1024xf32>
    %5 = tpu.matmul %2, %4, %cst {dimension_numbers = #tpu.dot_dimension_numbers<[1], [0], [0], [1], [0, 0, 1, 1], [], []>} : vector<8x4xbf16>, vector<4x1024xbf16>, vector<8x1024xf32> -> vector<8x1024xf32>
    %c0_5 = arith.constant 0 : index
    %c0_6 = arith.constant 0 : index
    %6 = vector.load %arg4[%c0_5, %c0_6] : memref<4x1024xbf16, #tpu.memory_space<vmem>>, vector<4x1024xbf16>
    %cst_7 = arith.constant dense<0.000000e+00> : vector<8x1024xf32>
    %7 = tpu.matmul %3, %6, %cst_7 {dimension_numbers = #tpu.dot_dimension_numbers<[1], [0], [0], [1], [0, 0, 1, 1], [], []>} : vector<8x4xbf16>, vector<4x1024xbf16>, vector<8x1024xf32> -> vector<8x1024xf32>
    %8 = arith.addf %5, %7 : vector<8x1024xf32>
    %c0_8 = arith.constant 0 : index
    %c0_9 = arith.constant 0 : index
    %9 = vector.load %arg5[%c0_8, %c0_9] : memref<1x1024xf32, #tpu.memory_space<vmem>>, vector<1x1024xf32>
    %10 = vector.broadcast %9 : vector<1x1024xf32> to vector<8x1024xf32>
    %11 = arith.addf %8, %10 : vector<8x1024xf32>
    %cst_10 = arith.constant 0.000000e+00 : f32
    %12 = vector.broadcast %cst_10 : f32 to vector<8x1024xf32>
    %13 = arith.maximumf %11, %12 : vector<8x1024xf32>
    %14 = arith.truncf %13 : vector<8x1024xf32> to vector<8x1024xbf16>
    %c0_11 = arith.constant 0 : index
    %c0_12 = arith.constant 0 : index
    %15 = vector.load %arg6[%c0_11, %c0_12] : memref<1024x512xbf16, #tpu.memory_space<vmem>>, vector<1024x512xbf16>
    %cst_13 = arith.constant dense<0.000000e+00> : vector<8x512xf32>
    %16 = tpu.matmul %14, %15, %cst_13 {dimension_numbers = #tpu.dot_dimension_numbers<[1], [0], [0], [1], [0, 0, 1, 1], [], []>} : vector<8x1024xbf16>, vector<1024x512xbf16>, vector<8x512xf32> -> vector<8x512xf32>
    %c0_14 = arith.constant 0 : index
    %c0_15 = arith.constant 0 : index
    %17 = vector.load %arg7[%c0_14, %c0_15] : memref<1x512xf32, #tpu.memory_space<vmem>>, vector<1x512xf32>
    %18 = vector.broadcast %17 : vector<1x512xf32> to vector<8x512xf32>
    %19 = arith.addf %16, %18 : vector<8x512xf32>
    %cst_16 = arith.constant 0.000000e+00 : f32
    %20 = vector.broadcast %cst_16 : f32 to vector<8x512xf32>
    %21 = arith.maximumf %19, %20 : vector<8x512xf32>
    %22 = arith.truncf %21 : vector<8x512xf32> to vector<8x512xbf16>
    %c0_17 = arith.constant 0 : index
    %c0_18 = arith.constant 0 : index
    %23 = vector.load %arg8[%c0_17, %c0_18] : memref<512x2xbf16, #tpu.memory_space<vmem>>, vector<512x2xbf16>
    %cst_19 = arith.constant dense<0.000000e+00> : vector<8x2xf32>
    %24 = tpu.matmul %22, %23, %cst_19 {dimension_numbers = #tpu.dot_dimension_numbers<[1], [0], [0], [1], [0, 0, 1, 1], [], []>} : vector<8x512xbf16>, vector<512x2xbf16>, vector<8x2xf32> -> vector<8x2xf32>
    %c0_20 = arith.constant 0 : index
    %c0_21 = arith.constant 0 : index
    %25 = vector.load %arg9[%c0_20, %c0_21] : memref<1x2xf32, #tpu.memory_space<vmem>>, vector<1x2xf32>
    %26 = vector.broadcast %25 : vector<1x2xf32> to vector<8x2xf32>
    %27 = arith.addf %24, %26 : vector<8x2xf32>
    %28 = vector.extract_strided_slice %27 {offsets = [0, 0], sizes = [8, 1], strides = [1, 1]} : vector<8x2xf32> to vector<8x1xf32>
    %29 = vector.extract_strided_slice %27 {offsets = [0, 1], sizes = [8, 1], strides = [1, 1]} : vector<8x2xf32> to vector<8x1xf32>
    %30 = math.exp %29 : vector<8x1xf32>
    %c0_22 = arith.constant 0 : index
    %c0_23 = arith.constant 0 : index
    %31 = vector.load %arg2[%c0_22, %c0_23] : memref<8x1xf32, #tpu.memory_space<vmem>>, vector<8x1xf32>
    %32 = arith.mulf %30, %31 : vector<8x1xf32>
    %33 = arith.addf %28, %32 : vector<8x1xf32>
    %cst_24 = arith.constant -1.000000e+00 : f32
    %cst_25 = arith.constant 1.000000e+00 : f32
    %34 = vector.broadcast %cst_24 : f32 to vector<8x1xf32>
    %35 = arith.maximumf %34, %33 : vector<8x1xf32>
    %36 = vector.broadcast %cst_25 : f32 to vector<8x1xf32>
    %37 = arith.minimumf %36, %35 : vector<8x1xf32>
    %c0_26 = arith.constant 0 : index
    %c0_27 = arith.constant 0 : index
    %38 = vector.load %arg10[%c0_26, %c0_27] : memref<4x512xbf16, #tpu.memory_space<vmem>>, vector<4x512xbf16>
    %cst_28 = arith.constant dense<0.000000e+00> : vector<8x512xf32>
    %39 = tpu.matmul %2, %38, %cst_28 {dimension_numbers = #tpu.dot_dimension_numbers<[1], [0], [0], [1], [0, 0, 1, 1], [], []>} : vector<8x4xbf16>, vector<4x512xbf16>, vector<8x512xf32> -> vector<8x512xf32>
    %40 = arith.truncf %37 : vector<8x1xf32> to vector<8x1xbf16>
    %c0_29 = arith.constant 0 : index
    %c0_30 = arith.constant 0 : index
    %41 = vector.load %arg11[%c0_29, %c0_30] : memref<1x512xbf16, #tpu.memory_space<vmem>>, vector<1x512xbf16>
    %cst_31 = arith.constant dense<0.000000e+00> : vector<8x512xf32>
    %42 = tpu.matmul %40, %41, %cst_31 {dimension_numbers = #tpu.dot_dimension_numbers<[1], [0], [0], [1], [0, 0, 1, 1], [], []>} : vector<8x1xbf16>, vector<1x512xbf16>, vector<8x512xf32> -> vector<8x512xf32>
    %43 = arith.addf %39, %42 : vector<8x512xf32>
    %c0_32 = arith.constant 0 : index
    %c0_33 = arith.constant 0 : index
    %44 = vector.load %arg12[%c0_32, %c0_33] : memref<1x512xf32, #tpu.memory_space<vmem>>, vector<1x512xf32>
    %45 = vector.broadcast %44 : vector<1x512xf32> to vector<8x512xf32>
    %46 = arith.addf %43, %45 : vector<8x512xf32>
    %cst_34 = arith.constant 0.000000e+00 : f32
    %47 = vector.broadcast %cst_34 : f32 to vector<8x512xf32>
    %48 = arith.maximumf %46, %47 : vector<8x512xf32>
    %49 = arith.truncf %48 : vector<8x512xf32> to vector<8x512xbf16>
    %c0_35 = arith.constant 0 : index
    %c0_36 = arith.constant 0 : index
    %50 = vector.load %arg13[%c0_35, %c0_36] : memref<512x1024xbf16, #tpu.memory_space<vmem>>, vector<512x1024xbf16>
    %cst_37 = arith.constant dense<0.000000e+00> : vector<8x1024xf32>
    %51 = tpu.matmul %49, %50, %cst_37 {dimension_numbers = #tpu.dot_dimension_numbers<[1], [0], [0], [1], [0, 0, 1, 1], [], []>} : vector<8x512xbf16>, vector<512x1024xbf16>, vector<8x1024xf32> -> vector<8x1024xf32>
    %c0_38 = arith.constant 0 : index
    %c0_39 = arith.constant 0 : index
    %52 = vector.load %arg14[%c0_38, %c0_39] : memref<1x1024xf32, #tpu.memory_space<vmem>>, vector<1x1024xf32>
    %53 = vector.broadcast %52 : vector<1x1024xf32> to vector<8x1024xf32>
    %54 = arith.addf %51, %53 : vector<8x1024xf32>
    %cst_40 = arith.constant 0.000000e+00 : f32
    %55 = vector.broadcast %cst_40 : f32 to vector<8x1024xf32>
    %56 = arith.maximumf %54, %55 : vector<8x1024xf32>
    %57 = arith.truncf %56 : vector<8x1024xf32> to vector<8x1024xbf16>
    %c0_41 = arith.constant 0 : index
    %c0_42 = arith.constant 0 : index
    %58 = vector.load %arg15[%c0_41, %c0_42] : memref<1024x4xbf16, #tpu.memory_space<vmem>>, vector<1024x4xbf16>
    %cst_43 = arith.constant dense<0.000000e+00> : vector<8x4xf32>
    %59 = tpu.matmul %57, %58, %cst_43 {dimension_numbers = #tpu.dot_dimension_numbers<[1], [0], [0], [1], [0, 0, 1, 1], [], []>} : vector<8x1024xbf16>, vector<1024x4xbf16>, vector<8x4xf32> -> vector<8x4xf32>
    %c0_44 = arith.constant 0 : index
    %c0_45 = arith.constant 0 : index
    %60 = vector.load %arg16[%c0_44, %c0_45] : memref<1x4xf32, #tpu.memory_space<vmem>>, vector<1x4xf32>
    %61 = vector.broadcast %60 : vector<1x4xf32> to vector<8x4xf32>
    %62 = arith.addf %59, %61 : vector<8x4xf32>
    %63 = math.tanh %62 : vector<8x4xf32>
    %cst_46 = arith.constant 1.000000e+00 : f32
    %64 = vector.broadcast %cst_46 : f32 to vector<8x4xf32>
    %65 = arith.mulf %64, %63 : vector<8x4xf32>
    %c0_47 = arith.constant 0 : index
    %c0_48 = arith.constant 0 : index
    %66 = vector.load %arg17[%c0_47, %c0_48] : memref<8x4xf32, #tpu.memory_space<vmem>>, vector<8x4xf32>
    tpu.vector_store %arg17[%c0_47, %c0_48], %65 {strides = array<i32>} : memref<8x4xf32, #tpu.memory_space<vmem>>, vector<8x4xf32>,
    %c0_49 = arith.constant 0 : index
    %c0_50 = arith.constant 0 : index
    %67 = vector.load %arg18[%c0_49, %c0_50] : memref<8x1xf32, #tpu.memory_space<vmem>>, vector<8x1xf32>
    tpu.vector_store %arg18[%c0_49, %c0_50], %28 {strides = array<i32>} : memref<8x1xf32, #tpu.memory_space<vmem>>, vector<8x1xf32>,
    %c0_51 = arith.constant 0 : index
    %c0_52 = arith.constant 0 : index
    %68 = vector.load %arg19[%c0_51, %c0_52] : memref<8x1xf32, #tpu.memory_space<vmem>>, vector<8x1xf32>
    tpu.vector_store %arg19[%c0_51, %c0_52], %30 {strides = array<i32>} : memref<8x1xf32, #tpu.memory_space<vmem>>, vector<8x1xf32>,
    return
  }
}

</mosaic_0001>

<bundles_post_ra>
// kernel: tpu_custom_call.1
= control target key start
LH: loop header
LB: loop body
LE: loop exit
PB: predicated region body
PF: predicated region fallthrough
CT: control target
= control target key end

     0   :  { %s9350_s0 = inlined_call_operand.vmem [shape: f32[8,4], index: 0, kind: input, shape index: {}]   ;;  %s9351_s1 = inlined_call_operand.vmem [shape: f32[8,4], index: 1, kind: input, shape index: {}]   ;;  %s9352_s2 = inlined_call_operand.vmem [shape: f32[8,1], index: 2, kind: input, shape index: {}]   ;;  %s9353_s3 = inlined_call_operand.vmem [shape: bf16[4,1024], index: 3, kind: input, shape index: {}]   ;;  %s9354_s4 = inlined_call_operand.vmem [shape: bf16[4,1024], index: 4, kind: input, shape index: {}]   ;;  %s9355_s5 = inlined_call_operand.vmem [shape: f32[1,1024], index: 5, kind: input, shape index: {}]   ;;  %s9356_s6 = inlined_call_operand.hbm [shape: bf16[1024,512], index: 6, kind: input, shape index: {}]   ;;  %s9357_s7 = inlined_call_operand.vmem [shape: f32[1,512], index: 7, kind: input, shape index: {}]   ;;  %s9358_s8 = inlined_call_operand.vmem [shape: bf16[512,2], index: 8, kind: input, shape index: {}]   ;;  %s9359_s9 = inlined_call_operand.vmem [shape: f32[1,2], index: 9, kind: input, shape index: {}]   ;;  %s9360_s10 = inlined_call_operand.vmem [shape: bf16[4,512], index: 10, kind: input, shape index: {}]   ;;  %s9361_s11 = inlined_call_operand.vmem [shape: bf16[1,512], index: 11, kind: input, shape index: {}]   ;;  %s9362_s12 = inlined_call_operand.vmem [shape: f32[1,512], index: 12, kind: input, shape index: {}]   ;;  %s9363_s13 = inlined_call_operand.hbm [shape: bf16[512,1024], index: 13, kind: input, shape index: {}]   ;;  %s9364_s14 = inlined_call_operand.vmem [shape: f32[1,1024], index: 14, kind: input, shape index: {}]   ;;  %s9365_s15 = inlined_call_operand.vmem [shape: bf16[1024,4], index: 15, kind: input, shape index: {}]   ;;  %s9366_s16 = inlined_call_operand.vmem [shape: f32[1,4], index: 16, kind: input, shape index: {}]   ;;  %s9367_s17 = inlined_call_operand.vmem [shape: f32[8,4], index: 17, kind: output, shape index: {0}]   ;;  %s9368_s18 = inlined_call_operand.vmem [shape: f32[8,1], index: 18, kind: output, shape index: {1}]   ;;  %s9369_s19 = inlined_call_operand.vmem [shape: f32[8,1], index: 19, kind: output, shape index: {2}]  }
   0x1   :  { %9371 = sst [smem:[#allocation8_spill]] %s9350_s0 }
   0x2   :  { %9372 = sst [smem:[#allocation9_spill]] %s9351_s1 }
   0x3   :  { %9373 = sst [smem:[#allocation10_spill]] %s9352_s2 }
   0x4   :  { %9374 = sst [smem:[#allocation11_spill]] %s9353_s3 }
   0x5   :  { %25 = vsyncpa [#allocation3], 0  ;;  %s43_s20 = sshll.u32 %s9356_s6, 4  ;;  %s44_s20 = int_to_ptr.hbm [resolvable:$true] %s43_s20 }
   0x6   :  { %26 = vsyncpa [#allocation5], 0  ;;  %s8637_s21 = smov [#allocation2]   ;;  %s68_s23 = sshll.u32 %s9363_s13, 4  ;;  %s69_s23 = int_to_ptr.hbm [resolvable:$true] %s68_s23 }
   0x7   :  { %s45_s1 = sshll.u32 %s8637_s21, 4  ;;  %s8638_s24 = smov 256   ;;  %s46_s1 = int_to_ptr.vmem [resolvable:$true] %s45_s1 }
   0x8   :  { %s8639_s25 = smov 16   ;;  %s8640_s3 = smov [#allocation4]  }
   0x9   :  { %51 = dma.hbm_to_vmem [thread:$0]  %s44_s20, 32768, %s46_s1, [#allocation3], %s8638_s24, %s8638_s24, %s8639_s25  }
   0xa   :  { %s70_s26 = sshll.u32 %s8640_s3, 4  ;;  %s8641_s27 = smov 512   ;;  %s71_s26 = int_to_ptr.vmem [resolvable:$true] %s70_s26 }
   0xb   :  { %s8642_s28 = smov 32  }
   0xc   :  { %76 = dma.hbm_to_vmem [thread:$0]  %s69_s23, 32768, %s71_s26, [#allocation5], %s8641_s27, %s8641_s27, %s8642_s28  }
   0xd   :  { %8633 = dma.done.wait [#allocation3], 32768  }
   0xe   :  { %8634 = vsyncadd [#allocation3], 4294934528 }
   0xf   :  { %8635 = dma.done.wait [#allocation5], 32768  }
  0x10   :  { %8636 = vsyncadd [#allocation5], 4294934528  ;;  %v98_v0 = vld [vmem:[%s9354_s4] sm:$0xff]  ;;  %v99_v1 = vld [vmem:[%s9354_s4 + $0x8] sm:$0xff]  ;;  %vm117_vm0 = vcmask 1041408   ;;  %s9375_s21 = sld [smem:[#allocation9_spill]] }
  0x11   :  { %101 = vst [vmem:[#allocation1] ss:$4 sm:$0xff] %v98_v0  ;;  %s9376_s2 = sld [smem:[#allocation11_spill]]  ;;  %vm113_vm1 = vcmask 31744   ;;  %v5635_v39 = vld [vmem:[#allocation2 + $0xe0] sm:$0xf] }
  0x12   :  { %104 = vst [vmem:[#allocation1 + $0x20] ss:$4 sm:$0xff] %v99_v1  ;;  %s9377_s3 = sld [smem:[#allocation8_spill]]  ;;  %v7992_v40 = vld [vmem:[#allocation2 + $0xec] sm:$0xf0]  ;;  %vm2722_vm2 = vcmask 7168  }
  0x13   :  { %v5763_v41 = vld [vmem:[#allocation2 + $0x1e0] sm:$0xf]  ;;  %v8024_v42 = vld [vmem:[#allocation2 + $0x1ec] sm:$0xf0]  ;;  %v5636_v48 = vor.u32 %v7992_v40, %v5635_v39  ;;  %s9378_s20 = sld [smem:[#allocation10_spill]]  ;;  %vm2726_vm3 = vcmask 1040384  }
  0x14   :  { %v5891_v43 = vld [vmem:[#allocation2 + $0x2e0] sm:$0xf]  ;;  %v8056_v45 = vld [vmem:[#allocation2 + $0x2ec] sm:$0xf0]  ;;  %v5764_v49 = vor.u32 %v8024_v42, %v5763_v41 }
  0x15   :  { %v6019_v46 = vld [vmem:[#allocation2 + $0x3e0] sm:$0xf]  ;;  %v8088_v47 = vld [vmem:[#allocation2 + $0x3ec] sm:$0xf0]  ;;  %v5892_v54 = vor.u32 %v8056_v45, %v5891_v43 }
  0x16   :  { %v93_v2 = vld [vmem:[%s9375_s21] sm:$0xff]  ;;  %v5619_v50 = vld [vmem:[#allocation2 + $0xc0] sm:$0xf]  ;;  %v7988_v51 = vld [vmem:[#allocation2 + $0xcc] sm:$0xf0]  ;;  %v6020_v55 = vor.u32 %v8088_v47, %v6019_v46  ;;  %s8643_s21 = smov 1  }
  0x17   :  { %v96_v3 = vld [vmem:[%s9376_s2] sm:$0xff]  ;;  %v95_v9 = vpack.c.bf16 %v93_v2, %v93_v2  ;;  %v97_v16 = vld [vmem:[%s9376_s2 + $0x8] sm:$0xff]  ;;  %v8020_v53 = vld [vmem:[#allocation2 + $0x1cc] sm:$0xf0]  ;;  %v5620_v60 = vor.u32 %v7988_v51, %v5619_v50 }
  0x18   :  { %v105_v4 = vld.sshfl [vmem:[#allocation1] sm:$0xff pattern:$0x73625140]  ;;  %v106_v5 = vld.sshfl [vmem:[#allocation1 + $0x8] sm:$0xff pattern:$0x73625140] }
  0x19   :  { %v118_v6 = vsel %vm117_vm0, %v105_v4, 0  ;;  %v120_v7 = vsel %vm117_vm0, %v106_v5, 0  ;;  %v107_v8 = vld.sshfl [vmem:[#allocation1 + $0x10] sm:$0xff pattern:$0x73625140]  ;;  %v92_v38 = vld [vmem:[%s9377_s3] sm:$0xff] }
  0x1a   :  { %141 = vmatpush.bf16.msra.mxu0 %v118_v6  ;;  %154 = vmatpush.bf16.msra.mxu1 %v120_v7  ;;  %v122_v10 = vsel %vm117_vm0, %v107_v8, 0  ;;  %v108_v11 = vld.sshfl [vmem:[#allocation1 + $0x18] sm:$0xff pattern:$0x73625140]  ;;  %v8794_v44 = vpack.c.bf16 %v92_v38, %v92_v38  ;;  %v5747_v52 = vld [vmem:[#allocation2 + $0x1c0] sm:$0xf] }
  0x1b   :  { %167 = vmatpush.bf16.msra.mxu2 %v122_v10  ;;  %v124_v12 = vsel %vm117_vm0, %v108_v11, 0  ;;  %239 = vst [vmem:[#allocation1] ss:$4 sm:$0xff] %v96_v3  ;;  %v109_v13 = vld.sshfl [vmem:[#allocation1 + $0x20] sm:$0xff pattern:$0x73625140]  ;;  %v5748_v61 = vor.u32 %v8020_v53, %v5747_v52 }
  0x1c   :  { %180 = vmatpush.bf16.msra.mxu3 %v124_v12  ;;  %v126_v14 = vsel %vm117_vm0, %v109_v13, 0  ;;  %v110_v15 = vld.sshfl [vmem:[#allocation1 + $0x28] sm:$0xff pattern:$0x73625140]  ;;  %v8052_v57 = vld [vmem:[#allocation2 + $0x2cc] sm:$0xf0] }
  0x1d   :  { %5505 = vmatmul.msk.bf16.vlgmr.msra.gmra.mxu0 %vm113_vm1, %v95_v9  ;;  %5506 = vmatmul.msk.bf16.vlgmr.msra.gmra.mxu1 %vm113_vm1, %v95_v9  ;;  %v128_v17 = vsel %vm117_vm0, %v110_v15, 0  ;;  %v111_v18 = vld.sshfl [vmem:[#allocation1 + $0x30] sm:$0xff pattern:$0x73625140]  ;;  %v5875_v56 = vld [vmem:[#allocation2 + $0x2c0] sm:$0xf] }
  0x1e   :  { %5507 = vmatmul.msk.bf16.vlgmr.msra.gmra.mxu2 %vm113_vm1, %v95_v9  ;;  %193 = vmatpush.bf16.msrb.mxu0 %v126_v14  ;;  %v130_v19 = vsel %vm117_vm0, %v111_v18, 0  ;;  %v112_v20 = vld.sshfl [vmem:[#allocation1 + $0x38] sm:$0xff pattern:$0x73625140]  ;;  %v6003_v58 = vld [vmem:[#allocation2 + $0x3c0] sm:$0xf]  ;;  %v5876_v2 = vor.u32 %v8052_v57, %v5875_v56 }
  0x1f   :  { %5508 = vmatmul.msk.bf16.vlgmr.msra.gmra.mxu3 %vm113_vm1, %v95_v9  ;;  %206 = vmatpush.bf16.msrb.mxu1 %v128_v17  ;;  %v132_v21 = vsel %vm117_vm0, %v112_v20, 0  ;;  %242 = vst [vmem:[#allocation1 + $0x20] ss:$4 sm:$0xff] %v97_v16  ;;  %v8084_v59 = vld [vmem:[#allocation2 + $0x3cc] sm:$0xf0] }
  0x20   :  { %219 = vmatpush.bf16.msrb.mxu2 %v130_v19  ;;  %232 = vmatpush.bf16.msrb.mxu3 %v132_v21  ;;  %v5603_v62 = vld [vmem:[#allocation2 + $0xa0] sm:$0xf]  ;;  %v7984_v63 = vld [vmem:[#allocation2 + $0xac] sm:$0xf0]  ;;  %v6004_v3 = vor.u32 %v8084_v59, %v6003_v58 }
  0x21   :  { %v5731_v0 = vld [vmem:[#allocation2 + $0x1a0] sm:$0xf]  ;;  %v8016_v1 = vld [vmem:[#allocation2 + $0x1ac] sm:$0xf0]  ;;  %v5604_v8 = vor.u32 %v7984_v63, %v5603_v62 }
  0x22   :  { %v243_v22 = vld.sshfl [vmem:[#allocation1] sm:$0xff pattern:$0x73625140]  ;;  %v244_v23 = vld.sshfl [vmem:[#allocation1 + $0x8] sm:$0xff pattern:$0x73625140] }
  0x23   :  { %v254_v24 = vsel %vm117_vm0, %v243_v22, 0  ;;  %v256_v25 = vsel %vm117_vm0, %v244_v23, 0  ;;  %v245_v26 = vld.sshfl [vmem:[#allocation1 + $0x10] sm:$0xff pattern:$0x73625140] }
  0x24   :  { %277 = vmatpush.bf16.msra.mxu0 %v254_v24  ;;  %290 = vmatpush.bf16.msra.mxu1 %v256_v25  ;;  %v258_v27 = vsel %vm117_vm0, %v245_v26, 0  ;;  %v246_v28 = vld.sshfl [vmem:[#allocation1 + $0x18] sm:$0xff pattern:$0x73625140]  ;;  %v5859_v4 = vld [vmem:[#allocation2 + $0x2a0] sm:$0xf] }
  0x25   :  { %303 = vmatpush.bf16.msra.mxu2 %v258_v27  ;;  %v260_v29 = vsel %vm117_vm0, %v246_v28, 0  ;;  %v8048_v5 = vld [vmem:[#allocation2 + $0x2ac] sm:$0xf0]  ;;  %v5987_v6 = vld [vmem:[#allocation2 + $0x3a0] sm:$0xf] }
  0x26   :  { %316 = vmatpush.bf16.msra.mxu3 %v260_v29  ;;  %v247_v30 = vld.sshfl [vmem:[#allocation1 + $0x20] sm:$0xff pattern:$0x73625140]  ;;  %v248_v31 = vld.sshfl [vmem:[#allocation1 + $0x28] sm:$0xff pattern:$0x73625140]  ;;  %v5860_v14 = vor.u32 %v8048_v5, %v5859_v4 }
  0x27   :  { %v249_v32 = vld.sshfl [vmem:[#allocation1 + $0x30] sm:$0xff pattern:$0x73625140]  ;;  %v250_v33 = vld.sshfl [vmem:[#allocation1 + $0x38] sm:$0xff pattern:$0x73625140] }
  0x28   :  { %v262_v34 = vsel %vm117_vm0, %v247_v30, 0  ;;  %v264_v35 = vsel %vm117_vm0, %v248_v31, 0  ;;  %v266_v36 = vsel %vm117_vm0, %v249_v32, 0  ;;  %v268_v37 = vsel %vm117_vm0, %v250_v33, 0  ;;  %v8080_v7 = vld [vmem:[#allocation2 + $0x3ac] sm:$0xf0] }
  0x29   :  { %v5587_v10 = vld [vmem:[#allocation2 + $0x80] sm:$0xf]  ;;  %v7980_v11 = vld [vmem:[#allocation2 + $0x8c] sm:$0xf0]  ;;  %v5988_v15 = vor.u32 %v8080_v7, %v5987_v6 }
  0x2a   :  { %v5715_v12 = vld [vmem:[#allocation2 + $0x180] sm:$0xf]  ;;  %v8012_v13 = vld [vmem:[#allocation2 + $0x18c] sm:$0xf0]  ;;  %v5588_v16 = vor.u32 %v7980_v11, %v5587_v10 }
  0x2b   :  { %v5716_v17 = vor.u32 %v8012_v13, %v5715_v12  ;;  %v5571_v18 = vld [vmem:[#allocation2 + $0x60] sm:$0xf]  ;;  %v7976_v19 = vld [vmem:[#allocation2 + $0x6c] sm:$0xf0] }
  0x2c   :  { %v5699_v20 = vld [vmem:[#allocation2 + $0x160] sm:$0xf]  ;;  %v8008_v21 = vld [vmem:[#allocation2 + $0x16c] sm:$0xf0]  ;;  %v5572_v22 = vor.u32 %v7976_v19, %v5571_v18 }
  0x2d   :  { %5509 = vmatmul.msk.bf16.vlgmr.msrb.gmra.mxu0 %vm113_vm1, %v95_v9  ;;  %5510 = vmatmul.msk.bf16.vlgmr.msrb.gmra.mxu1 %vm113_vm1, %v95_v9  ;;  %v5700_v23 = vor.u32 %v8008_v21, %v5699_v20  ;;  %v5843_v24 = vld [vmem:[#allocation2 + $0x280] sm:$0xf]  ;;  %v8044_v25 = vld [vmem:[#allocation2 + $0x28c] sm:$0xf0] }
  0x2e   :  { %5511 = vmatmul.msk.bf16.vlgmr.msrb.gmra.mxu2 %vm113_vm1, %v95_v9  ;;  %329 = vmatpush.bf16.msrb.mxu0 %v262_v34  ;;  %v5971_v26 = vld [vmem:[#allocation2 + $0x380] sm:$0xf]  ;;  %v5844_v27 = vor.u32 %v8044_v25, %v5843_v24  ;;  %v8076_v28 = vld [vmem:[#allocation2 + $0x38c] sm:$0xf0] }
  0x2f   :  { %5512 = vmatmul.msk.bf16.vlgmr.msrb.gmra.mxu3 %vm113_vm1, %v95_v9  ;;  %342 = vmatpush.bf16.msrb.mxu1 %v264_v35  ;;  %v5732_v9 = vor.u32 %v8016_v1, %v5731_v0  ;;  %v5555_v29 = vld [vmem:[#allocation2 + $0x40] sm:$0xf]  ;;  %v7972_v30 = vld [vmem:[#allocation2 + $0x4c] sm:$0xf0]  ;;  %v5972_v31 = vor.u32 %v8076_v28, %v5971_v26 }
  0x30   :  { %355 = vmatpush.bf16.msrb.mxu2 %v266_v36  ;;  %368 = vmatpush.bf16.msrb.mxu3 %v268_v37  ;;  %v5556_v32 = vor.u32 %v7972_v30, %v5555_v29  ;;  %v5683_v33 = vld [vmem:[#allocation2 + $0x140] sm:$0xf]  ;;  %v8004_v34 = vld [vmem:[#allocation2 + $0x14c] sm:$0xf0] }
  0x31   :  { %v5827_v35 = vld [vmem:[#allocation2 + $0x260] sm:$0xf]  ;;  %v5684_v36 = vor.u32 %v8004_v34, %v5683_v33  ;;  %v8040_v37 = vld [vmem:[#allocation2 + $0x26c] sm:$0xf0] }
  0x32   :  { %v5955_v38 = vld [vmem:[#allocation2 + $0x360] sm:$0xf]  ;;  %v8072_v39 = vld [vmem:[#allocation2 + $0x36c] sm:$0xf0]  ;;  %v5828_v40 = vor.u32 %v8040_v37, %v5827_v35 }
  0x33   :  { %v5956_v41 = vor.u32 %v8072_v39, %v5955_v38  ;;  %v5539_v42 = vld [vmem:[#allocation2 + $0x20] sm:$0xf]  ;;  %v7968_v43 = vld [vmem:[#allocation2 + $0x2c] sm:$0xf0] }
  0x34   :  { %v5667_v45 = vld [vmem:[#allocation2 + $0x120] sm:$0xf]  ;;  %v5540_v46 = vor.u32 %v7968_v43, %v5539_v42  ;;  %v8000_v47 = vld [vmem:[#allocation2 + $0x12c] sm:$0xf0] }
  0x35   :  { %v8036_v50 = vld [vmem:[#allocation2 + $0x24c] sm:$0xf0]  ;;  %v5939_v51 = vld [vmem:[#allocation2 + $0x340] sm:$0xf] }
  0x36   :  { %v8068_v53 = vld [vmem:[#allocation2 + $0x34c] sm:$0xf0]  ;;  %v5651_v58 = vld [vmem:[#allocation2 + $0x100] sm:$0xf] }
  0x37   :  { %v5940_v56 = vor.u32 %v8068_v53, %v5939_v51  ;;  %v7996_v59 = vld [vmem:[#allocation2 + $0x10c] sm:$0xf0]  ;;  %v6275_v63 = vld [vmem:[#allocation2 + $0x5e0] sm:$0xf] }
  0x38   :  { %v8120_v62 = vld [vmem:[#allocation2 + $0x4ec] sm:$0xf0]  ;;  %v5923_v5 = vld [vmem:[#allocation2 + $0x320] sm:$0xf] }
  0x39   :  { %v8152_v0 = vld [vmem:[#allocation2 + $0x5ec] sm:$0xf0]  ;;  %v6259_v11 = vld [vmem:[#allocation2 + $0x5c0] sm:$0xf] }
  0x3a   :  { %v8032_v4 = vld [vmem:[#allocation2 + $0x22c] sm:$0xf0]  ;;  %v5907_v18 = vld [vmem:[#allocation2 + $0x300] sm:$0xf] }
  0x3b   :  { %v8064_v7 = vld [vmem:[#allocation2 + $0x32c] sm:$0xf0]  ;;  %v6403_v20 = vld [vmem:[#allocation2 + $0x6e0] sm:$0xf] }
  0x3c   :  { %v8116_v10 = vld [vmem:[#allocation2 + $0x4cc] sm:$0xf0]  ;;  %v6243_v29 = vld [vmem:[#allocation2 + $0x5a0] sm:$0xf] }
  0x3d   :  { %5513 = vmatmul.msk.bf16.vlgmr.msra.gmra.mxu0 %vm113_vm1, %v8794_v44  ;;  %5514 = vmatmul.msk.bf16.vlgmr.msra.gmra.mxu1 %vm113_vm1, %v8794_v44  ;;  %v8148_v13 = vld [vmem:[#allocation2 + $0x5cc] sm:$0xf0]  ;;  %v6387_v33 = vld [vmem:[#allocation2 + $0x6c0] sm:$0xf] }
  0x3e   :  { %5515 = vmatmul.msk.bf16.vlgmr.msra.gmra.mxu2 %vm113_vm1, %v8794_v44  ;;  %1962 = vmatpush.bf16.msra.mxu0 %v5636_v48  ;;  %v5668_v48 = vor.u32 %v8000_v47, %v5667_v45  ;;  %v8060_v19 = vld [vmem:[#allocation2 + $0x30c] sm:$0xf0]  ;;  %v6515_v35 = vld [vmem:[#allocation2 + $0x7c0] sm:$0xf] }
  0x3f   :  { %5516 = vmatmul.msk.bf16.vlgmr.msra.gmra.mxu3 %vm113_vm1, %v8794_v44  ;;  %1975 = vmatpush.bf16.msra.mxu1 %v5764_v49  ;;  %v5811_v49 = vld [vmem:[#allocation2 + $0x240] sm:$0xf]  ;;  %v5908_v21 = vor.u32 %v8060_v19, %v5907_v18  ;;  %v8216_v24 = vld [vmem:[#allocation2 + $0x7ec] sm:$0xf0] }
  0x40   :  { %1988 = vmatpush.bf16.msra.mxu2 %v5892_v54  ;;  %2001 = vmatpush.bf16.msra.mxu3 %v6020_v55  ;;  %v5812_v52 = vor.u32 %v8036_v50, %v5811_v49  ;;  %v5523_v54 = vld [vmem:[#allocation2] sm:$0xf]  ;;  %v7964_v55 = vld [vmem:[#allocation2 + $0xc] sm:$0xf0] }
  0x41   :  { %v5524_v57 = vor.u32 %v7964_v55, %v5523_v54  ;;  %v8112_v28 = vld [vmem:[#allocation2 + $0x4ac] sm:$0xf0]  ;;  %v6099_v39 = vld [vmem:[#allocation2 + $0x480] sm:$0xf] }
  0x42   :  { %1963 = vmatpush.bf16.msra.mxu0 %v5620_v60  ;;  %v6147_v60 = vld [vmem:[#allocation2 + $0x4e0] sm:$0xf]  ;;  %v8180_v34 = vld [vmem:[#allocation2 + $0x6cc] sm:$0xf0] }
  0x43   :  { %1976 = vmatpush.bf16.msra.mxu1 %v5748_v61  ;;  %v5652_v61 = vor.u32 %v7996_v59, %v5651_v58  ;;  %v6148_v1 = vor.u32 %v8120_v62, %v6147_v60  ;;  %v8212_v37 = vld [vmem:[#allocation2 + $0x7cc] sm:$0xf0]  ;;  %v6083_v51 = vld [vmem:[#allocation2 + $0x460] sm:$0xf] }
  0x44   :  { %1989 = vmatpush.bf16.msra.mxu2 %v5876_v2  ;;  %2002 = vmatpush.bf16.msra.mxu3 %v6004_v3  ;;  %v6276_v2 = vor.u32 %v8152_v0, %v6275_v63  ;;  %v5795_v3 = vld [vmem:[#allocation2 + $0x220] sm:$0xf]  ;;  %v6516_v38 = vor.u32 %v8212_v37, %v6515_v35  ;;  %v8140_v43 = vld [vmem:[#allocation2 + $0x58c] sm:$0xf0] }
  0x45   :  { %v5796_v6 = vor.u32 %v8032_v4, %v5795_v3  ;;  %v8176_v47 = vld [vmem:[#allocation2 + $0x6ac] sm:$0xf0]  ;;  %v6211_v55 = vld [vmem:[#allocation2 + $0x560] sm:$0xf] }
  0x46   :  { %1964 = vmatpush.bf16.msra.mxu0 %v5604_v8  ;;  %v5924_v8 = vor.u32 %v8064_v7, %v5923_v5  ;;  %v8208_v50 = vld [vmem:[#allocation2 + $0x7ac] sm:$0xf0]  ;;  %v6355_v58 = vld [vmem:[#allocation2 + $0x680] sm:$0xf] }
  0x47   :  { %1977 = vmatpush.bf16.msra.mxu1 %v5732_v9  ;;  %v6131_v9 = vld [vmem:[#allocation2 + $0x4c0] sm:$0xf]  ;;  %v8172_v59 = vld [vmem:[#allocation2 + $0x68c] sm:$0xf0] }
  0x48   :  { %1990 = vmatpush.bf16.msra.mxu2 %v5860_v14  ;;  %2003 = vmatpush.bf16.msra.mxu3 %v5988_v15  ;;  %v6132_v12 = vor.u32 %v8116_v10, %v6131_v9  ;;  %v5779_v14 = vld [vmem:[#allocation2 + $0x200] sm:$0xf]  ;;  %v8028_v15 = vld [vmem:[#allocation2 + $0x20c] sm:$0xf0] }
  0x49   :  { %v6483_v60 = vld [vmem:[#allocation2 + $0x780] sm:$0xf]  ;;  %v8204_v62 = vld [vmem:[#allocation2 + $0x78c] sm:$0xf0] }
  0x4a   :  { %1965 = vmatpush.bf16.msra.mxu0 %v5588_v16  ;;  %v6260_v16 = vor.u32 %v8148_v13, %v6259_v11  ;;  %v6484_v63 = vor.u32 %v8204_v62, %v6483_v60  ;;  %v6067_v0 = vld [vmem:[#allocation2 + $0x440] sm:$0xf]  ;;  %v8168_v9 = vld [vmem:[#allocation2 + $0x66c] sm:$0xf0] }
  0x4b   :  { %1978 = vmatpush.bf16.msra.mxu1 %v5716_v17  ;;  %v5780_v17 = vor.u32 %v8028_v15, %v5779_v14  ;;  %v6467_v11 = vld [vmem:[#allocation2 + $0x760] sm:$0xf]  ;;  %v8096_v15 = vld [vmem:[#allocation2 + $0x42c] sm:$0xf0] }
  0x4c   :  { %1991 = vmatpush.bf16.msra.mxu2 %v5844_v27  ;;  %2004 = vmatpush.bf16.msra.mxu3 %v5972_v31  ;;  %v6115_v27 = vld [vmem:[#allocation2 + $0x4a0] sm:$0xf]  ;;  %v8144_v31 = vld [vmem:[#allocation2 + $0x5ac] sm:$0xf0] }
  0x4d   :  { %5517 = vmatmul.msk.bf16.vlgmr.msrb.gmra.mxu0 %vm113_vm1, %v8794_v44  ;;  %5518 = vmatmul.msk.bf16.vlgmr.msrb.gmra.mxu1 %vm113_vm1, %v8794_v44  ;;  %v6116_v30 = vor.u32 %v8112_v28, %v6115_v27  ;;  %v6051_v14 = vld [vmem:[#allocation2 + $0x420] sm:$0xf]  ;;  %v8128_v18 = vld [vmem:[#allocation2 + $0x52c] sm:$0xf0] }
  0x4e   :  { %5519 = vmatmul.msk.bf16.vlgmr.msrb.gmra.mxu2 %vm113_vm1, %v8794_v44  ;;  %1966 = vmatpush.bf16.msra.mxu0 %v5572_v22  ;;  %v8184_v22 = vld [vmem:[#allocation2 + $0x6ec] sm:$0xf0]  ;;  %v6035_v27 = vld [vmem:[#allocation2 + $0x400] sm:$0xf] }
  0x4f   :  { %5520 = vmatmul.msk.bf16.vlgmr.msrb.gmra.mxu3 %vm113_vm1, %v8794_v44  ;;  %1979 = vmatpush.bf16.msra.mxu1 %v5700_v23  ;;  %v6531_v23 = vld [vmem:[#allocation2 + $0x7e0] sm:$0xf]  ;;  %v6404_v25 = vor.u32 %v8184_v22, %v6403_v20  ;;  %v8092_v28 = vld [vmem:[#allocation2 + $0x40c] sm:$0xf0] }
  0x50   :  { %1992 = vmatpush.bf16.msra.mxu2 %v5828_v40  ;;  %2005 = vmatpush.bf16.msra.mxu3 %v5956_v41  ;;  %v6532_v26 = vor.u32 %v8216_v24, %v6531_v23  ;;  %v8108_v40 = vld [vmem:[#allocation2 + $0x48c] sm:$0xf0]  ;;  %v6227_v41 = vld [vmem:[#allocation2 + $0x580] sm:$0xf] }
  0x51   :  { %v6100_v42 = vor.u32 %v8108_v40, %v6099_v39  ;;  %v6228_v45 = vor.u32 %v8140_v43, %v6227_v41  ;;  %v6323_v20 = vld [vmem:[#allocation2 + $0x640] sm:$0xf]  ;;  %v8196_v24 = vld [vmem:[#allocation2 + $0x74c] sm:$0xf0] }
  0x52   :  { %1967 = vmatpush.bf16.msra.mxu0 %v5556_v32  ;;  %v6244_v32 = vor.u32 %v8144_v31, %v6243_v29  ;;  %v6451_v22 = vld [vmem:[#allocation2 + $0x740] sm:$0xf]  ;;  %v8160_v37 = vld [vmem:[#allocation2 + $0x62c] sm:$0xf0] }
  0x53   :  { %1980 = vmatpush.bf16.msra.mxu1 %v5684_v36  ;;  %v6388_v36 = vor.u32 %v8180_v34, %v6387_v33  ;;  %v6163_v29 = vld [vmem:[#allocation2 + $0x500] sm:$0xf]  ;;  %v8124_v33 = vld [vmem:[#allocation2 + $0x50c] sm:$0xf0] }
  0x54   :  { %1993 = vmatpush.bf16.msra.mxu2 %v5812_v52  ;;  %2006 = vmatpush.bf16.msra.mxu3 %v5940_v56  ;;  %v8104_v52 = vld [vmem:[#allocation2 + $0x46c] sm:$0xf0]  ;;  %v6164_v35 = vor.u32 %v8124_v33, %v6163_v29  ;;  %v6435_v39 = vld [vmem:[#allocation2 + $0x720] sm:$0xf]  ;;  %v8054_v29 = vld [vmem:[#allocation2 + $0x2e4] sm:$0xf] }
  0x55   :  { %v6084_v54 = vor.u32 %v8104_v52, %v6083_v51  ;;  %v8136_v56 = vld [vmem:[#allocation2 + $0x56c] sm:$0xf0] }
  0x56   :  { %1968 = vmatpush.bf16.msra.mxu0 %v5540_v46  ;;  %v6371_v46 = vld [vmem:[#allocation2 + $0x6a0] sm:$0xf]  ;;  %v8192_v40 = vld [vmem:[#allocation2 + $0x72c] sm:$0xf0] }
  0x57   :  { %1981 = vmatpush.bf16.msra.mxu1 %v5668_v48  ;;  %v6499_v48 = vld [vmem:[#allocation2 + $0x7a0] sm:$0xf]  ;;  %v6372_v49 = vor.u32 %v8176_v47, %v6371_v46  ;;  %v6436_v41 = vor.u32 %v8192_v40, %v6435_v39  ;;  %v8156_v43 = vld [vmem:[#allocation2 + $0x60c] sm:$0xf0] }
  0x58   :  { %1994 = vmatpush.bf16.msra.mxu2 %v5796_v6  ;;  %2007 = vmatpush.bf16.msra.mxu3 %v5924_v8  ;;  %v6500_v53 = vor.u32 %v8208_v50, %v6499_v48  ;;  %v8132_v6 = vld [vmem:[#allocation2 + $0x54c] sm:$0xf0]  ;;  %v6339_v8 = vld [vmem:[#allocation2 + $0x660] sm:$0xf] }
  0x59   :  { %v6340_v10 = vor.u32 %v8168_v9, %v6339_v8  ;;  %v6419_v46 = vld [vmem:[#allocation2 + $0x700] sm:$0xf]  ;;  %v8188_v47 = vld [vmem:[#allocation2 + $0x70c] sm:$0xf0]  ;;  %v8022_v8 = vld [vmem:[#allocation2 + $0x1e4] sm:$0xf] }
  0x5a   :  { %1969 = vmatpush.bf16.msra.mxu0 %v5524_v57  ;;  %v6212_v57 = vor.u32 %v8136_v56, %v6211_v55  ;;  %v5765_v9 = vld [vmem:[#allocation2 + $0x1f0] sm:$0xf0] }
  0x5b   :  { %1982 = vmatpush.bf16.msra.mxu1 %v5652_v61  ;;  %v6356_v61 = vor.u32 %v8172_v59, %v6355_v58 }
  0x5c   :  { %1995 = vmatpush.bf16.msra.mxu2 %v5780_v17  ;;  %2008 = vmatpush.bf16.msra.mxu3 %v5908_v21  ;;  %v6179_v17 = vld [vmem:[#allocation2 + $0x520] sm:$0xf]  ;;  %v8164_v21 = vld [vmem:[#allocation2 + $0x64c] sm:$0xf0] }
  0x5d   :  { %v6180_v19 = vor.u32 %v8128_v18, %v6179_v17  ;;  %v6324_v23 = vor.u32 %v8164_v21, %v6323_v20  ;;  %v7986_v17 = vld [vmem:[#allocation2 + $0xc4] sm:$0xf]  ;;  %v5621_v18 = vld [vmem:[#allocation2 + $0xd0] sm:$0xf0] }
  0x5e   :  { %2014 = vmatpush.bf16.msrb.mxu0 %v6148_v1  ;;  %v8100_v1 = vld [vmem:[#allocation2 + $0x44c] sm:$0xf0] }
  0x5f   :  { %2027 = vmatpush.bf16.msrb.mxu1 %v6276_v2  ;;  %v6195_v2 = vld [vmem:[#allocation2 + $0x540] sm:$0xf]  ;;  %v6068_v5 = vor.u32 %v8100_v1, %v6067_v0 }
  0x60   :  { %2040 = vmatpush.bf16.msrb.mxu2 %v6404_v25  ;;  %2053 = vmatpush.bf16.msrb.mxu3 %v6532_v26  ;;  %v6196_v7 = vor.u32 %v8132_v6, %v6195_v2  ;;  %v6452_v26 = vor.u32 %v8196_v24, %v6451_v22  ;;  %v5637_v6 = vld [vmem:[#allocation2 + $0xf0] sm:$0xf0]  ;;  %v8018_v22 = vld [vmem:[#allocation2 + $0x1c4] sm:$0xf] }
  0x62   :  { %2015 = vmatpush.bf16.msrb.mxu0 %v6132_v12  ;;  %v8200_v12 = vld [vmem:[#allocation2 + $0x76c] sm:$0xf0] }
  0x63   :  { %2028 = vmatpush.bf16.msrb.mxu1 %v6260_v16  ;;  %v6468_v13 = vor.u32 %v8200_v12, %v6467_v11  ;;  %v6052_v16 = vor.u32 %v8096_v15, %v6051_v14 }
  0x64   :  { %2041 = vmatpush.bf16.msrb.mxu2 %v6388_v36  ;;  %2054 = vmatpush.bf16.msrb.mxu3 %v6516_v38  ;;  %v6307_v36 = vld [vmem:[#allocation2 + $0x620] sm:$0xf] }
  0x65   :  { %v6308_v38 = vor.u32 %v8160_v37, %v6307_v36  ;;  %v5605_v36 = vld [vmem:[#allocation2 + $0xb0] sm:$0xf0] }
  0x66   :  { %2016 = vmatpush.bf16.msrb.mxu0 %v6116_v30 }
  0x67   :  { %2029 = vmatpush.bf16.msrb.mxu1 %v6244_v32  ;;  %v6036_v32 = vor.u32 %v8092_v28, %v6035_v27  ;;  %v5624_v28 = vor.u32 %v7986_v17, %v5621_v18  ;;  %v5573_v17 = vld [vmem:[#allocation2 + $0x70] sm:$0xf0]  ;;  %v8006_v18 = vld [vmem:[#allocation2 + $0x164] sm:$0xf] }
  0x68   :  { %2042 = vmatpush.bf16.msrb.mxu2 %v6372_v49  ;;  %2055 = vmatpush.bf16.msrb.mxu3 %v6500_v53  ;;  %v6420_v49 = vor.u32 %v8188_v47, %v6419_v46  ;;  %v8050_v46 = vld [vmem:[#allocation2 + $0x2c4] sm:$0xf]  ;;  %v5877_v47 = vld [vmem:[#allocation2 + $0x2d0] sm:$0xf0] }
  0x6a   :  { %2017 = vmatpush.bf16.msrb.mxu0 %v6100_v42  ;;  %v6291_v42 = vld [vmem:[#allocation2 + $0x600] sm:$0xf] }
  0x6b   :  { %2030 = vmatpush.bf16.msrb.mxu1 %v6228_v45  ;;  %v6292_v45 = vor.u32 %v8156_v43, %v6291_v42 }
  0x6c   :  { %2043 = vmatpush.bf16.msrb.mxu2 %v6356_v61  ;;  %2056 = vmatpush.bf16.msrb.mxu3 %v6484_v63 }
  0x6e   :  { %2018 = vmatpush.bf16.msrb.mxu0 %v6084_v54 }
  0x6f   :  { %2031 = vmatpush.bf16.msrb.mxu1 %v6212_v57  ;;  %v8831_v57 = vld [vmem:[%s9355_s5] sm:$0xff] }
  0x70   :  { %2044 = vmatpush.bf16.msrb.mxu2 %v6340_v10  ;;  %2057 = vmatpush.bf16.msrb.mxu3 %v6468_v13  ;;  %v376_v59 = vperm.slane %v8831_v57, 0  ;;  %v377_v62 = vperm.slane %v8831_v57, 1  ;;  %v378_v12 = vperm.slane %v8831_v57, 2 }
  0x72   :  { %2019 = vmatpush.bf16.msrb.mxu0 %v6068_v5  ;;  %v7990_v5 = vld [vmem:[#allocation2 + $0xe4] sm:$0xf] }
  0x73   :  { %2032 = vmatpush.bf16.msrb.mxu1 %v6196_v7  ;;  %v5640_v13 = vor.u32 %v7990_v5, %v5637_v6  ;;  %v5880_v5 = vor.u32 %v8050_v46, %v5877_v47  ;;  %v8038_v46 = vld [vmem:[#allocation2 + $0x264] sm:$0xf]  ;;  %v5829_v47 = vld [vmem:[#allocation2 + $0x270] sm:$0xf0] }
  0x74   :  { %2045 = vmatpush.bf16.msrb.mxu2 %v6324_v23  ;;  %2058 = vmatpush.bf16.msrb.mxu3 %v6452_v26  ;;  %v5749_v23 = vld [vmem:[#allocation2 + $0x1d0] sm:$0xf0] }
  0x76   :  { %2020 = vmatpush.bf16.msrb.mxu0 %v6052_v16  ;;  %v379_v16 = vperm.slane %v8831_v57, 3 }
  0x77   :  { %2033 = vmatpush.bf16.msrb.mxu1 %v6180_v19 }
  0x78   :  { %2046 = vmatpush.bf16.msrb.mxu2 %v6308_v38  ;;  %2059 = vmatpush.bf16.msrb.mxu3 %v6436_v41  ;;  %v8014_v38 = vld [vmem:[#allocation2 + $0x1a4] sm:$0xf]  ;;  %v380_v41 = vperm.slane %v8831_v57, 4 }
  0x7a   :  { %2021 = vmatpush.bf16.msrb.mxu0 %v6036_v32  ;;  %v8086_v32 = vld [vmem:[#allocation2 + $0x3e4] sm:$0xf] }
  0x7b   :  { %2034 = vmatpush.bf16.msrb.mxu1 %v6164_v35  ;;  %v7982_v35 = vld [vmem:[#allocation2 + $0xa4] sm:$0xf] }
  0x7c   :  { %2047 = vmatpush.bf16.msrb.mxu2 %v6292_v45  ;;  %2060 = vmatpush.bf16.msrb.mxu3 %v6420_v49  ;;  %v5608_v45 = vor.u32 %v7982_v35, %v5605_v36 }
  0x9a   :  { %v8812_v3 = vpop.f32.mrf.mxu0  ;;  %v8814_v4 = vpop.f32.mrf.mxu1 }
  0xa1   :  { %v8816_v25 = vpop.f32.mrf.mxu2 }
  0xa2   :  { %v8818_v30 = vpop.f32.mrf.mxu3  ;;  %v145_v31 = vpop.f32.mrf.mxu0 }
  0xa3   :  { %v158_v34 = vpop.f32.mrf.mxu1  ;;  %v5893_v31 = vld [vmem:[#allocation2 + $0x2f0] sm:$0xf0] }
  0xa4   :  { %v6021_v34 = vld [vmem:[#allocation2 + $0x3f0] sm:$0xf0]  ;;  %v5896_v40 = vor.u32 %v8054_v29, %v5893_v31 }
  0xa5   :  { %v6024_v43 = vor.u32 %v8086_v32, %v6021_v34  ;;  %v8074_v32 = vld [vmem:[#allocation2 + $0x384] sm:$0xf] }
  0xa9   :  { %v171_v48 = vpop.f32.mrf.mxu2 }
  0xaa   :  { %v184_v50 = vpop.f32.mrf.mxu3  ;;  %v8820_v51 = vpop.f32.mrf.mxu0  ;;  %v8082_v48 = vld [vmem:[#allocation2 + $0x3c4] sm:$0xf] }
  0xab   :  { %v8822_v52 = vpop.f32.mrf.mxu1 }
  0xb1   :  { %v8824_v53 = vpop.f32.mrf.mxu2 }
  0xb2   :  { %v8826_v54 = vpop.f32.mrf.mxu3  ;;  %v197_v55 = vpop.f32.mrf.mxu0 }
  0xb3   :  { %v210_v56 = vpop.f32.mrf.mxu1 }
  0xb4   :  { %v6005_v56 = vld [vmem:[#allocation2 + $0x3d0] sm:$0xf0] }
  0xb9   :  { %v223_v58 = vpop.f32.mrf.mxu2 }
  0xba   :  { %v236_v60 = vpop.f32.mrf.mxu3  ;;  %v279_v61 = vpop.f32.mrf.mxu0  ;;  %v7978_v58 = vld [vmem:[#allocation2 + $0x84] sm:$0xf] }
  0xbb   :  { %v280_v63 = vadd.f32 %v279_v61, %v8812_v3  ;;  %v292_v0 = vpop.f32.mrf.mxu1  ;;  %v5768_v3 = vor.u32 %v8022_v8, %v5765_v9  ;;  %v8046_v9 = vld [vmem:[#allocation2 + $0x2a4] sm:$0xf] }
  0xbc   :  { %v293_v1 = vadd.f32 %v292_v0, %v8814_v4  ;;  %v5717_v0 = vld [vmem:[#allocation2 + $0x190] sm:$0xf0] }
  0xbd   :  { %v392_v2 = vadd.f32 %v376_v59, %v280_v63  ;;  %v5589_v59 = vld [vmem:[#allocation2 + $0x90] sm:$0xf0]  ;;  %v8010_v63 = vld [vmem:[#allocation2 + $0x184] sm:$0xf] }
  0xbe   :  { %v393_v7 = vadd.f32 %v377_v62, %v293_v1  ;;  %v381_v62 = vperm.slane %v8831_v57, 5  ;;  %v5592_v8 = vor.u32 %v7978_v58, %v5589_v59  ;;  %v5541_v58 = vld [vmem:[#allocation2 + $0x30] sm:$0xf0] }
  0xbf   :  { %v400_v10 = vmax.f32 %v392_v2, 0.0 }
  0xc0   :  { %v401_v11 = vmax.f32 %v393_v7, 0.0  ;;  %v6008_v7 = vor.u32 %v8082_v48, %v6005_v56  ;;  %v5957_v56 = vld [vmem:[#allocation2 + $0x370] sm:$0xf0] }
  0xc1   :  { %v8838_v14 = vpack.c.bf16 %v400_v10, %v400_v10  ;;  %v305_v15 = vpop.f32.mrf.mxu2  ;;  %v5861_v10 = vld [vmem:[#allocation2 + $0x2b0] sm:$0xf0] }
  0xc2   :  { %v8841_v4 = vpack.c.bf16 %v401_v11, %v401_v11  ;;  %v306_v19 = vadd.f32 %v305_v15, %v8816_v25  ;;  %v318_v20 = vpop.f32.mrf.mxu3  ;;  %v281_v21 = vpop.f32.mrf.mxu0  ;;  %v5752_v25 = vor.u32 %v8018_v22, %v5749_v23  ;;  %v5989_v15 = vld [vmem:[#allocation2 + $0x3b0] sm:$0xf0]  ;;  %v383_v22 = vperm.slane %v8831_v57, 7 }
  0xc3   :  { %v319_v24 = vadd.f32 %v318_v20, %v8818_v30  ;;  %v294_v26 = vpop.f32.mrf.mxu1  ;;  %1970 = vmatmul.bf16.vlgmr.msra.gmra.mxu0 %v8838_v14  ;;  %v5733_v30 = vld [vmem:[#allocation2 + $0x1b0] sm:$0xf0]  ;;  %v382_v20 = vperm.slane %v8831_v57, 6 }
  0xc4   :  { %v394_v27 = vadd.f32 %v378_v12, %v306_v19  ;;  %1983 = vmatmul.bf16.vlgmr.msra.gmra.mxu1 %v8841_v4  ;;  %2066 = vmatpush.bf16.msra.mxu0 %v5640_v13  ;;  %v5736_v55 = vor.u32 %v8014_v38, %v5733_v30  ;;  %v5720_v12 = vor.u32 %v8010_v63, %v5717_v0  ;;  %v8078_v13 = vld [vmem:[#allocation2 + $0x3a4] sm:$0xf]  ;;  %v5845_v26 = vld [vmem:[#allocation2 + $0x290] sm:$0xf0] }
  0xc5   :  { %v395_v33 = vadd.f32 %v379_v16, %v319_v24  ;;  %2079 = vmatpush.bf16.msra.mxu1 %v5768_v3  ;;  %v7974_v16 = vld [vmem:[#allocation2 + $0x64] sm:$0xf]  ;;  %v5992_v23 = vor.u32 %v8078_v13, %v5989_v15  ;;  %v5685_v57 = vld [vmem:[#allocation2 + $0x150] sm:$0xf0]  ;;  %v5832_v63 = vor.u32 %v8038_v46, %v5829_v47 }
  0xc6   :  { %v402_v37 = vmax.f32 %v394_v27, 0.0  ;;  %v8042_v24 = vld [vmem:[#allocation2 + $0x284] sm:$0xf]  ;;  %v5576_v29 = vor.u32 %v7974_v16, %v5573_v17  ;;  %v5525_v13 = vld [vmem:[#allocation2 + $0x10] sm:$0xf0] }
  0xc7   :  { %v403_v39 = vmax.f32 %v395_v33, 0.0  ;;  %v5973_v33 = vld [vmem:[#allocation2 + $0x390] sm:$0xf0]  ;;  %v8002_v38 = vld [vmem:[#allocation2 + $0x144] sm:$0xf] }
  0xc8   :  { %v8848_v42 = vpack.c.bf16 %v402_v37, %v402_v37  ;;  %2067 = vmatpush.bf16.msra.mxu0 %v5624_v28  ;;  %v5557_v37 = vld [vmem:[#allocation2 + $0x50] sm:$0xf0]  ;;  %v7994_v16 = vld [vmem:[#allocation2 + $0x104] sm:$0xf] }
  0xc9   :  { %v8850_v49 = vpack.c.bf16 %v403_v39, %v403_v39  ;;  %2080 = vmatpush.bf16.msra.mxu1 %v5752_v25  ;;  %v307_v50 = vpop.f32.mrf.mxu2  ;;  %v7970_v25 = vld [vmem:[#allocation2 + $0x44] sm:$0xf]  ;;  %v6533_v47 = vld [vmem:[#allocation2 + $0x7f0] sm:$0xf0] }
  0xca   :  { %v320_v60 = vpop.f32.mrf.mxu3  ;;  %1996 = vmatmul.bf16.vlgmr.msra.gmra.mxu2 %v8848_v42  ;;  %v331_v61 = vpop.f32.mrf.mxu0  ;;  %v5560_v50 = vor.u32 %v7970_v25, %v5557_v37  ;;  %v8118_v17 = vld [vmem:[#allocation2 + $0x4e4] sm:$0xf]  ;;  %v6133_v25 = vld [vmem:[#allocation2 + $0x4d0] sm:$0xf0] }
  0xcb   :  { %2009 = vmatmul.bf16.vlgmr.msra.gmra.mxu3 %v8850_v49  ;;  %2092 = vmatpush.bf16.msra.mxu2 %v5896_v40  ;;  %v332_v1 = vadd.f32 %v331_v61, %v8820_v51  ;;  %v344_v2 = vpop.f32.mrf.mxu1  ;;  %v5701_v51 = vld [vmem:[#allocation2 + $0x170] sm:$0xf0]  ;;  %v5848_v40 = vor.u32 %v8042_v24, %v5845_v26  ;;  %v7998_v60 = vld [vmem:[#allocation2 + $0x124] sm:$0xf] }
  0xcc   :  { %2105 = vmatpush.bf16.msra.mxu3 %v6024_v43  ;;  %v345_v6 = vadd.f32 %v344_v2, %v8822_v52  ;;  %2068 = vmatpush.bf16.msra.mxu0 %v5608_v45  ;;  %v5864_v52 = vor.u32 %v8046_v9, %v5861_v10  ;;  %v5704_v31 = vor.u32 %v8006_v18, %v5701_v51  ;;  %v5669_v61 = vld [vmem:[#allocation2 + $0x130] sm:$0xf0]  ;;  %v8034_v2 = vld [vmem:[#allocation2 + $0x244] sm:$0xf] }
  0xcd   :  { %v396_v11 = vadd.f32 %v380_v41, %v332_v1  ;;  %2081 = vmatpush.bf16.msra.mxu1 %v5736_v55  ;;  %v5976_v45 = vor.u32 %v8074_v32, %v5973_v33  ;;  %v5688_v55 = vor.u32 %v8002_v38, %v5685_v57  ;;  %v5672_v9 = vor.u32 %v7998_v60, %v5669_v61  ;;  %v6149_v51 = vld [vmem:[#allocation2 + $0x4f0] sm:$0xf0]  ;;  %v8062_v26 = vld [vmem:[#allocation2 + $0x324] sm:$0xf] }
  0xce   :  { %v397_v3 = vadd.f32 %v381_v62, %v345_v6  ;;  %v8066_v6 = vld [vmem:[#allocation2 + $0x344] sm:$0xf]  ;;  %v5781_v57 = vld [vmem:[#allocation2 + $0x210] sm:$0xf0] }
  0xcf   :  { %v404_v19 = vmax.f32 %v396_v11, 0.0  ;;  %2093 = vmatpush.bf16.msra.mxu2 %v5880_v5  ;;  %v5813_v5 = vld [vmem:[#allocation2 + $0x250] sm:$0xf0]  ;;  %v8114_v32 = vld [vmem:[#allocation2 + $0x4c4] sm:$0xf] }
  0xd0   :  { %v405_v21 = vmax.f32 %v397_v3, 0.0  ;;  %2106 = vmatpush.bf16.msra.mxu3 %v6008_v7  ;;  %2069 = vmatpush.bf16.msra.mxu0 %v5592_v8  ;;  %v5941_v11 = vld [vmem:[#allocation2 + $0x350] sm:$0xf0]  ;;  %v5816_v18 = vor.u32 %v8034_v2, %v5813_v5  ;;  %v8026_v38 = vld [vmem:[#allocation2 + $0x204] sm:$0xf] }
  0xd1   :  { %v8859_v27 = vpack.c.bf16 %v404_v19, %v404_v19  ;;  %2082 = vmatpush.bf16.msra.mxu1 %v5720_v12  ;;  %v357_v28 = vpop.f32.mrf.mxu2  ;;  %v7962_v12 = vld [vmem:[#allocation2 + $0x4] sm:$0xf]  ;;  %v5653_v3 = vld [vmem:[#allocation2 + $0x110] sm:$0xf0] }
  0xd2   :  { %v8861_v34 = vpack.c.bf16 %v405_v21, %v405_v21  ;;  %v358_v35 = vadd.f32 %v357_v28, %v8824_v53  ;;  %v370_v36 = vpop.f32.mrf.mxu3  ;;  %v333_v30 = vpop.f32.mrf.mxu0  ;;  %v8070_v53 = vld [vmem:[#allocation2 + $0x364] sm:$0xf]  ;;  %v5656_v24 = vor.u32 %v7994_v16, %v5653_v3  ;;  %v5925_v28 = vld [vmem:[#allocation2 + $0x330] sm:$0xf0] }
  0xd3   :  { %v371_v39 = vadd.f32 %v370_v36, %v8826_v54  ;;  %2094 = vmatpush.bf16.msra.mxu2 %v5864_v52  ;;  %2022 = vmatmul.bf16.vlgmr.msrb.gmra.mxu0 %v8859_v27  ;;  %v346_v41 = vpop.f32.mrf.mxu1  ;;  %v7966_v54 = vld [vmem:[#allocation2 + $0x24] sm:$0xf]  ;;  %v5960_v1 = vor.u32 %v8070_v53, %v5957_v56  ;;  %v5944_v52 = vor.u32 %v8066_v6, %v5941_v11  ;;  %v6261_v36 = vld [vmem:[#allocation2 + $0x5d0] sm:$0xf0] }
  0xd4   :  { %v398_v43 = vadd.f32 %v382_v20, %v358_v35  ;;  %2107 = vmatpush.bf16.msra.mxu3 %v5992_v23  ;;  %2035 = vmatmul.bf16.vlgmr.msrb.gmra.mxu1 %v8861_v34  ;;  %v5544_v8 = vor.u32 %v7966_v54, %v5541_v58  ;;  %v8150_v19 = vld [vmem:[#allocation2 + $0x5e4] sm:$0xf]  ;;  %v6277_v20 = vld [vmem:[#allocation2 + $0x5f0] sm:$0xf0]  ;;  %v5528_v23 = vor.u32 %v7962_v12, %v5525_v13 }
  0xd5   :  { %v399_v48 = vadd.f32 %v383_v22, %v371_v39  ;;  %2070 = vmatpush.bf16.msra.mxu0 %v5576_v29  ;;  %2083 = vmatpush.bf16.msra.mxu1 %v5704_v31  ;;  %v8030_v21 = vld [vmem:[#allocation2 + $0x224] sm:$0xf]  ;;  %v5797_v22 = vld [vmem:[#allocation2 + $0x230] sm:$0xf0]  ;;  %v6152_v29 = vor.u32 %v8118_v17, %v6149_v51  ;;  %v6280_v31 = vor.u32 %v8150_v19, %v6277_v20 }
  0xd6   :  { %v406_v59 = vmax.f32 %v398_v43, 0.0  ;;  %v5800_v33 = vor.u32 %v8030_v21, %v5797_v22  ;;  %v8146_v35 = vld [vmem:[#allocation2 + $0x5c4] sm:$0xf]  ;;  %v5928_v37 = vor.u32 %v8062_v26, %v5925_v28  ;;  %v5909_v39 = vld [vmem:[#allocation2 + $0x310] sm:$0xf0]  ;;  %v6136_v43 = vor.u32 %v8114_v32, %v6133_v25 }
  0xd7   :  { %v407_v62 = vmax.f32 %v399_v48, 0.0  ;;  %2095 = vmatpush.bf16.msra.mxu2 %v5848_v40  ;;  %v8058_v30 = vld [vmem:[#allocation2 + $0x304] sm:$0xf]  ;;  %v6405_v41 = vld [vmem:[#allocation2 + $0x6f0] sm:$0xf0]  ;;  %v5784_v48 = vor.u32 %v8026_v38, %v5781_v57 }
  0xd8   :  { %v8867_v0 = vpack.c.bf16 %v406_v59, %v406_v59  ;;  %2108 = vmatpush.bf16.msra.mxu3 %v5976_v45  ;;  %v8182_v40 = vld [vmem:[#allocation2 + $0x6e4] sm:$0xf]  ;;  %v6264_v45 = vor.u32 %v8146_v35, %v6261_v36  ;;  %v6245_v56 = vld [vmem:[#allocation2 + $0x5b0] sm:$0xf0]  ;;  %v5912_v54 = vor.u32 %v8058_v30, %v5909_v39 }
  0xd9   :  { %v8869_v7 = vpack.c.bf16 %v407_v62, %v407_v62  ;;  %2071 = vmatpush.bf16.msra.mxu0 %v5560_v50  ;;  %2084 = vmatpush.bf16.msra.mxu1 %v5688_v55  ;;  %v359_v10 = vpop.f32.mrf.mxu2  ;;  %v8214_v46 = vld [vmem:[#allocation2 + $0x7e4] sm:$0xf]  ;;  %v6117_v50 = vld [vmem:[#allocation2 + $0x4b0] sm:$0xf0]  ;;  %v6408_v58 = vor.u32 %v8182_v40, %v6405_v41 }
  0xda   :  { %2048 = vmatmul.bf16.vlgmr.msrb.gmra.mxu2 %v8867_v0  ;;  %v372_v15 = vpop.f32.mrf.mxu3  ;;  %v8110_v53 = vld [vmem:[#allocation2 + $0x4a4] sm:$0xf]  ;;  %v6536_v59 = vor.u32 %v8214_v46, %v6533_v47  ;;  %v6389_v61 = vld [vmem:[#allocation2 + $0x6d0] sm:$0xf0] }
  0xdb   :  { %2061 = vmatmul.bf16.vlgmr.msrb.gmra.mxu3 %v8869_v7  ;;  %2096 = vmatpush.bf16.msra.mxu2 %v5832_v63  ;;  %v8142_v55 = vld [vmem:[#allocation2 + $0x5a4] sm:$0xf]  ;;  %v6120_v62 = vor.u32 %v8110_v53, %v6117_v50  ;;  %v6517_v2 = vld [vmem:[#allocation2 + $0x7d0] sm:$0xf0] }
  0xdc   :  { %2109 = vmatpush.bf16.msra.mxu3 %v5960_v1  ;;  %v8178_v60 = vld [vmem:[#allocation2 + $0x6c4] sm:$0xf]  ;;  %v6248_v63 = vor.u32 %v8142_v55, %v6245_v56  ;;  %v6101_v6 = vld [vmem:[#allocation2 + $0x490] sm:$0xf0] }
  0xdd   :  { %2072 = vmatpush.bf16.msra.mxu0 %v5544_v8  ;;  %2085 = vmatpush.bf16.msra.mxu1 %v5672_v9  ;;  %v8210_v1 = vld [vmem:[#allocation2 + $0x7c4] sm:$0xf]  ;;  %v6229_v9 = vld [vmem:[#allocation2 + $0x590] sm:$0xf0]  ;;  %v6392_v10 = vor.u32 %v8178_v60, %v6389_v61 }
  0xde   :  { %v8106_v5 = vld [vmem:[#allocation2 + $0x484] sm:$0xf]  ;;  %v6520_v11 = vor.u32 %v8210_v1, %v6517_v2  ;;  %v6373_v13 = vld [vmem:[#allocation2 + $0x6b0] sm:$0xf0]  ;;  %v7993_v2 = vld [vmem:[#allocation2 + $0xf4] sm:$0xf0] }
  0xdf   :  { %2097 = vmatpush.bf16.msra.mxu2 %v5816_v18  ;;  %v8138_v8 = vld [vmem:[#allocation2 + $0x584] sm:$0xf]  ;;  %v6104_v15 = vor.u32 %v8106_v5, %v6101_v6  ;;  %v6501_v17 = vld [vmem:[#allocation2 + $0x7b0] sm:$0xf0]  ;;  %v5771_v5 = vld [vmem:[#allocation2 + $0x1e8] sm:$0xf] }
  0xe0   :  { %2110 = vmatpush.bf16.msra.mxu3 %v5944_v52  ;;  %v8174_v12 = vld [vmem:[#allocation2 + $0x6a4] sm:$0xf]  ;;  %v6232_v16 = vor.u32 %v8138_v8, %v6229_v9  ;;  %v6085_v51 = vld [vmem:[#allocation2 + $0x470] sm:$0xf0]  ;;  %v8025_v6 = vld [vmem:[#allocation2 + $0x1f4] sm:$0xf0] }
  0xe1   :  { %2073 = vmatpush.bf16.msra.mxu0 %v5528_v23  ;;  %2086 = vmatpush.bf16.msra.mxu1 %v5656_v24  ;;  %v8206_v3 = vld [vmem:[#allocation2 + $0x7a4] sm:$0xf]  ;;  %v6213_v20 = vld [vmem:[#allocation2 + $0x570] sm:$0xf0]  ;;  %v6376_v52 = vor.u32 %v8174_v12, %v6373_v13 }
  0xe2   :  { %v8102_v18 = vld [vmem:[#allocation2 + $0x464] sm:$0xf]  ;;  %v6504_v21 = vor.u32 %v8206_v3, %v6501_v17  ;;  %v6357_v23 = vld [vmem:[#allocation2 + $0x690] sm:$0xf0]  ;;  %v5772_v3 = vor.u32 %v8025_v6, %v5771_v5  ;;  %v5627_v17 = vld [vmem:[#allocation2 + $0xc8] sm:$0xf] }
  0xe3   :  { %2098 = vmatpush.bf16.msra.mxu2 %v5800_v33  ;;  %v8134_v19 = vld [vmem:[#allocation2 + $0x564] sm:$0xf]  ;;  %v6088_v24 = vor.u32 %v8102_v18, %v6085_v51  ;;  %v6069_v32 = vld [vmem:[#allocation2 + $0x450] sm:$0xf0]  ;;  %v7989_v51 = vld [vmem:[#allocation2 + $0xd4] sm:$0xf0] }
  0xe4   :  { %2111 = vmatpush.bf16.msra.mxu3 %v5928_v37  ;;  %2074 = vmatmul.bf16.vlgmr.msra.gmra.mxu0 %v8838_v14  ;;  %v8170_v22 = vld [vmem:[#allocation2 + $0x684] sm:$0xf]  ;;  %v6216_v26 = vor.u32 %v8134_v19, %v6213_v20  ;;  %v6197_v25 = vld [vmem:[#allocation2 + $0x550] sm:$0xf0]  ;;  %v5755_v19 = vld [vmem:[#allocation2 + $0x1c8] sm:$0xf] }
  0xe5   :  { %2118 = vmatpush.bf16.msrb.mxu0 %v6152_v29  ;;  %2131 = vmatpush.bf16.msrb.mxu1 %v6280_v31  ;;  %v8202_v28 = vld [vmem:[#allocation2 + $0x784] sm:$0xf]  ;;  %v6485_v29 = vld [vmem:[#allocation2 + $0x790] sm:$0xf0]  ;;  %v6360_v35 = vor.u32 %v8170_v22, %v6357_v23  ;;  %v8021_v20 = vld [vmem:[#allocation2 + $0x1d4] sm:$0xf0] }
  0xe6   :  { %2087 = vmatmul.bf16.vlgmr.msra.gmra.mxu1 %v8841_v4  ;;  %v8098_v31 = vld [vmem:[#allocation2 + $0x444] sm:$0xf]  ;;  %v6488_v36 = vor.u32 %v8202_v28, %v6485_v29  ;;  %v6341_v38 = vld [vmem:[#allocation2 + $0x670] sm:$0xf0]  ;;  %v8057_v28 = vld [vmem:[#allocation2 + $0x2f4] sm:$0xf0]  ;;  %v5628_v29 = vor.u32 %v7989_v51, %v5627_v17 }
  0xe7   :  { %2099 = vmatpush.bf16.msra.mxu2 %v5784_v48  ;;  %v8130_v33 = vld [vmem:[#allocation2 + $0x544] sm:$0xf]  ;;  %v6072_v57 = vor.u32 %v8098_v31, %v6069_v32  ;;  %v6469_v40 = vld [vmem:[#allocation2 + $0x770] sm:$0xf0]  ;;  %v5756_v31 = vor.u32 %v8021_v20, %v5755_v19  ;;  %v6027_v32 = vld [vmem:[#allocation2 + $0x3e8] sm:$0xf] }
  0xe8   :  { %2112 = vmatpush.bf16.msra.mxu3 %v5912_v54  ;;  %v8166_v37 = vld [vmem:[#allocation2 + $0x664] sm:$0xf]  ;;  %v6200_v30 = vor.u32 %v8130_v33, %v6197_v25  ;;  %v6181_v46 = vld [vmem:[#allocation2 + $0x530] sm:$0xf0]  ;;  %v8089_v33 = vld [vmem:[#allocation2 + $0x3f4] sm:$0xf0] }
  0xe9   :  { %2119 = vmatpush.bf16.msrb.mxu0 %v6136_v43  ;;  %2132 = vmatpush.bf16.msrb.mxu1 %v6264_v45  ;;  %v8198_v39 = vld [vmem:[#allocation2 + $0x764] sm:$0xf]  ;;  %v6053_v43 = vld [vmem:[#allocation2 + $0x430] sm:$0xf0]  ;;  %v6344_v47 = vor.u32 %v8166_v37, %v6341_v38  ;;  %v5707_v6 = vld [vmem:[#allocation2 + $0x168] sm:$0xf] }
  0xea   :  { %2100 = vmatmul.bf16.vlgmr.msra.gmra.mxu2 %v8848_v42  ;;  %v8094_v41 = vld [vmem:[#allocation2 + $0x424] sm:$0xf]  ;;  %v6472_v53 = vor.u32 %v8198_v39, %v6469_v40  ;;  %v6325_v50 = vld [vmem:[#allocation2 + $0x650] sm:$0xf0]  ;;  %v6028_v39 = vor.u32 %v8089_v33, %v6027_v32  ;;  %v5883_v40 = vld [vmem:[#allocation2 + $0x2c8] sm:$0xf] }
  0xeb   :  { %2144 = vmatpush.bf16.msrb.mxu2 %v6408_v58  ;;  %2113 = vmatmul.bf16.vlgmr.msra.gmra.mxu3 %v8850_v49  ;;  %v8126_v45 = vld [vmem:[#allocation2 + $0x524] sm:$0xf]  ;;  %v6056_v56 = vor.u32 %v8094_v41, %v6053_v43  ;;  %v6453_v58 = vld [vmem:[#allocation2 + $0x750] sm:$0xf0]  ;;  %v8053_v41 = vld [vmem:[#allocation2 + $0x2d4] sm:$0xf0] }
  0xec   :  { %2157 = vmatpush.bf16.msrb.mxu3 %v6536_v59  ;;  %v8162_v48 = vld [vmem:[#allocation2 + $0x644] sm:$0xf]  ;;  %v6184_v54 = vor.u32 %v8126_v45, %v6181_v46  ;;  %v6037_v60 = vld [vmem:[#allocation2 + $0x410] sm:$0xf0]  ;;  %v6011_v45 = vld [vmem:[#allocation2 + $0x3c8] sm:$0xf] }
  0xed   :  { %2120 = vmatpush.bf16.msrb.mxu0 %v6120_v62  ;;  %2133 = vmatpush.bf16.msrb.mxu1 %v6248_v63  ;;  %v8194_v55 = vld [vmem:[#allocation2 + $0x744] sm:$0xf]  ;;  %v6165_v62 = vld [vmem:[#allocation2 + $0x510] sm:$0xf0]  ;;  %v5643_v63 = vld [vmem:[#allocation2 + $0xe8] sm:$0xf]  ;;  %v6328_v1 = vor.u32 %v8162_v48, %v6325_v50  ;;  %v5884_v50 = vor.u32 %v8053_v41, %v5883_v40 }
  0xee   :  { %v8090_v59 = vld [vmem:[#allocation2 + $0x404] sm:$0xf]  ;;  %v6456_v8 = vor.u32 %v8194_v55, %v6453_v58  ;;  %v6293_v22 = vld [vmem:[#allocation2 + $0x610] sm:$0xf0]  ;;  %v8085_v46 = vld [vmem:[#allocation2 + $0x3d4] sm:$0xf0] }
  0xef   :  { %2145 = vmatpush.bf16.msrb.mxu2 %v6392_v10  ;;  %v8122_v61 = vld [vmem:[#allocation2 + $0x504] sm:$0xf]  ;;  %v6309_v10 = vld [vmem:[#allocation2 + $0x630] sm:$0xf0]  ;;  %v7981_v48 = vld [vmem:[#allocation2 + $0x94] sm:$0xf0] }
  0xf0   :  { %2158 = vmatpush.bf16.msrb.mxu3 %v6520_v11  ;;  %v8158_v9 = vld [vmem:[#allocation2 + $0x624] sm:$0xf]  ;;  %v6040_v11 = vor.u32 %v8090_v59, %v6037_v60  ;;  %v6168_v12 = vor.u32 %v8122_v61, %v6165_v62  ;;  %v5723_v55 = vld [vmem:[#allocation2 + $0x188] sm:$0xf]  ;;  %v8049_v59 = vld [vmem:[#allocation2 + $0x2b4] sm:$0xf0] }
  0xf1   :  { %2121 = vmatpush.bf16.msrb.mxu0 %v6104_v15  ;;  %2134 = vmatpush.bf16.msrb.mxu1 %v6232_v16  ;;  %v8190_v13 = vld [vmem:[#allocation2 + $0x724] sm:$0xf]  ;;  %v6437_v15 = vld [vmem:[#allocation2 + $0x730] sm:$0xf0]  ;;  %v5644_v16 = vor.u32 %v7993_v2, %v5643_v63  ;;  %v6312_v18 = vor.u32 %v8158_v9, %v6309_v10  ;;  %v5867_v58 = vld [vmem:[#allocation2 + $0x2a8] sm:$0xf] }
  0xf2   :  { %v8186_v23 = vld [vmem:[#allocation2 + $0x704] sm:$0xf]  ;;  %v5995_v61 = vld [vmem:[#allocation2 + $0x3a8] sm:$0xf]  ;;  %v8081_v62 = vld [vmem:[#allocation2 + $0x3b4] sm:$0xf0]  ;;  %v5868_v5 = vor.u32 %v8049_v59, %v5867_v58 }
  0xf3   :  { %2146 = vmatpush.bf16.msrb.mxu2 %v6376_v52  ;;  %v6440_v52 = vor.u32 %v8190_v13, %v6437_v15  ;;  %v7977_v2 = vld [vmem:[#allocation2 + $0x74] sm:$0xf0]  ;;  %v5996_v9 = vor.u32 %v8081_v62, %v5995_v61  ;;  %v5851_v10 = vld [vmem:[#allocation2 + $0x288] sm:$0xf] }
  0xf4   :  { %2159 = vmatpush.bf16.msrb.mxu3 %v6504_v21  ;;  %v8154_v21 = vld [vmem:[#allocation2 + $0x604] sm:$0xf]  ;;  %v5979_v13 = vld [vmem:[#allocation2 + $0x388] sm:$0xf]  ;;  %v8077_v15 = vld [vmem:[#allocation2 + $0x394] sm:$0xf0] }
  0xf5   :  { %2122 = vmatpush.bf16.msrb.mxu0 %v6088_v24  ;;  %2135 = vmatpush.bf16.msrb.mxu1 %v6216_v26  ;;  %v6421_v24 = vld [vmem:[#allocation2 + $0x710] sm:$0xf0]  ;;  %v5899_v26 = vld [vmem:[#allocation2 + $0x2e8] sm:$0xf]  ;;  %v6296_v25 = vor.u32 %v8154_v21, %v6293_v22  ;;  %v7973_v17 = vld [vmem:[#allocation2 + $0x54] sm:$0xf0]  ;;  %v5980_v20 = vor.u32 %v8077_v15, %v5979_v13 }
  0xf6   :  { %v6424_v37 = vor.u32 %v8186_v23, %v6421_v24  ;;  %v5900_v38 = vor.u32 %v8057_v28, %v5899_v26  ;;  %v5691_v51 = vld [vmem:[#allocation2 + $0x148] sm:$0xf]  ;;  %v8005_v19 = vld [vmem:[#allocation2 + $0x154] sm:$0xf0] }
  0xf7   :  { %2147 = vmatpush.bf16.msrb.mxu2 %v6360_v35  ;;  %v5611_v35 = vld [vmem:[#allocation2 + $0xa8] sm:$0xf]  ;;  %v8041_v21 = vld [vmem:[#allocation2 + $0x274] sm:$0xf0]  ;;  %v5692_v26 = vor.u32 %v8005_v19, %v5691_v51 }
  0xf8   :  { %2160 = vmatpush.bf16.msrb.mxu3 %v6488_v36  ;;  %v7985_v36 = vld [vmem:[#allocation2 + $0xb4] sm:$0xf0]  ;;  %v5963_v23 = vld [vmem:[#allocation2 + $0x368] sm:$0xf] }
  0xf9   :  { %2123 = vmatpush.bf16.msrb.mxu0 %v6072_v57  ;;  %2136 = vmatpush.bf16.msrb.mxu1 %v6200_v30  ;;  %v5739_v57 = vld [vmem:[#allocation2 + $0x1a8] sm:$0xf]  ;;  %v8017_v30 = vld [vmem:[#allocation2 + $0x1b4] sm:$0xf0]  ;;  %v5612_v43 = vor.u32 %v7985_v36, %v5611_v35 }
  0xfa   :  { %v8073_v24 = vld [vmem:[#allocation2 + $0x374] sm:$0xf0]  ;;  %v5547_v28 = vld [vmem:[#allocation2 + $0x28] sm:$0xf] }
  0xfb   :  { %2148 = vmatpush.bf16.msrb.mxu2 %v6344_v47  ;;  %v5740_v47 = vor.u32 %v8017_v30, %v5739_v57  ;;  %v5675_v32 = vld [vmem:[#allocation2 + $0x128] sm:$0xf]  ;;  %v8001_v33 = vld [vmem:[#allocation2 + $0x134] sm:$0xf0] }
  0xfc   :  { %2161 = vmatpush.bf16.msrb.mxu3 %v6472_v53  ;;  %v5595_v53 = vld [vmem:[#allocation2 + $0x88] sm:$0xf]  ;;  %v8037_v36 = vld [vmem:[#allocation2 + $0x254] sm:$0xf0] }
  0xfd   :  { %2124 = vmatpush.bf16.msrb.mxu0 %v6056_v56  ;;  %2137 = vmatpush.bf16.msrb.mxu1 %v6184_v54  ;;  %v8013_v56 = vld [vmem:[#allocation2 + $0x194] sm:$0xf0]  ;;  %v6012_v54 = vor.u32 %v8085_v46, %v6011_v45  ;;  %v5596_v60 = vor.u32 %v7981_v48, %v5595_v53  ;;  %v5819_v35 = vld [vmem:[#allocation2 + $0x248] sm:$0xf] }
  0xfe   :  { %v5724_v63 = vor.u32 %v8013_v56, %v5723_v55  ;;  %v8069_v57 = vld [vmem:[#allocation2 + $0x354] sm:$0xf0]  ;;  %v5531_v30 = vld [vmem:[#allocation2 + $0x8] sm:$0xf]  ;;  %v5820_v45 = vor.u32 %v8037_v36, %v5819_v35 }
  0xff   :  { %2149 = vmatpush.bf16.msrb.mxu2 %v6328_v1  ;;  %v5579_v1 = vld [vmem:[#allocation2 + $0x68] sm:$0xf]  ;;  %v7965_v40 = vld [vmem:[#allocation2 + $0x14] sm:$0xf0] }
 0x100   :  { %2162 = vmatpush.bf16.msrb.mxu3 %v6456_v8  ;;  %v8009_v8 = vld [vmem:[#allocation2 + $0x174] sm:$0xf0]  ;;  %v5659_v41 = vld [vmem:[#allocation2 + $0x108] sm:$0xf] }
 0x101   :  { %2125 = vmatpush.bf16.msrb.mxu0 %v6040_v11  ;;  %2138 = vmatpush.bf16.msrb.mxu1 %v6168_v12  ;;  %v8045_v11 = vld [vmem:[#allocation2 + $0x294] sm:$0xf0]  ;;  %v5580_v12 = vor.u32 %v7977_v2, %v5579_v1  ;;  %v6155_v46 = vld [vmem:[#allocation2 + $0x4e8] sm:$0xf] }
 0x102   :  { %v6283_v53 = vld [vmem:[#allocation2 + $0x5e8] sm:$0xf]  ;;  %v8033_v56 = vld [vmem:[#allocation2 + $0x234] sm:$0xf0] }
 0x103   :  { %2150 = vmatpush.bf16.msrb.mxu2 %v6312_v18  ;;  %v5852_v18 = vor.u32 %v8045_v11, %v5851_v10  ;;  %v5803_v55 = vld [vmem:[#allocation2 + $0x228] sm:$0xf]  ;;  %v8065_v59 = vld [vmem:[#allocation2 + $0x334] sm:$0xf0] }
 0x104   :  { %2163 = vmatpush.bf16.msrb.mxu3 %v6440_v52  ;;  %2126 = vmatmul.bf16.vlgmr.msrb.gmra.mxu0 %v8859_v27  ;;  %v5835_v52 = vld [vmem:[#allocation2 + $0x268] sm:$0xf]  ;;  %v5804_v1 = vor.u32 %v8033_v56, %v5803_v55  ;;  %v8117_v2 = vld [vmem:[#allocation2 + $0x4d4] sm:$0xf0] }
 0x105   :  { %2170 = vmatpush.bf16.msra.mxu0 %v5644_v16  ;;  %2183 = vmatpush.bf16.msra.mxu1 %v5772_v3  ;;  %v5708_v16 = vor.u32 %v8009_v8, %v5707_v6  ;;  %v5563_v3 = vld [vmem:[#allocation2 + $0x48] sm:$0xf]  ;;  %v8149_v6 = vld [vmem:[#allocation2 + $0x5d4] sm:$0xf0] }
 0x106   :  { %2139 = vmatmul.bf16.vlgmr.msrb.gmra.mxu1 %v8861_v34  ;;  %v5564_v22 = vor.u32 %v7973_v17, %v5563_v3  ;;  %v5931_v58 = vld [vmem:[#allocation2 + $0x328] sm:$0xf]  ;;  %v8029_v10 = vld [vmem:[#allocation2 + $0x214] sm:$0xf0] }
 0x107   :  { %2151 = vmatpush.bf16.msrb.mxu2 %v6296_v25  ;;  %v5964_v25 = vor.u32 %v8073_v24, %v5963_v23  ;;  %v6139_v62 = vld [vmem:[#allocation2 + $0x4c8] sm:$0xf]  ;;  %v5932_v8 = vor.u32 %v8065_v59, %v5931_v58  ;;  %v8185_v15 = vld [vmem:[#allocation2 + $0x6f4] sm:$0xf0] }
 0x108   :  { %2164 = vmatpush.bf16.msrb.mxu3 %v6424_v37  ;;  %v5915_v11 = vld [vmem:[#allocation2 + $0x308] sm:$0xf]  ;;  %v8217_v17 = vld [vmem:[#allocation2 + $0x7f4] sm:$0xf0] }
 0x109   :  { %2171 = vmatpush.bf16.msra.mxu0 %v5628_v29  ;;  %2184 = vmatpush.bf16.msra.mxu1 %v5756_v31  ;;  %v7969_v29 = vld [vmem:[#allocation2 + $0x34] sm:$0xf0]  ;;  %v5836_v31 = vor.u32 %v8041_v21, %v5835_v52  ;;  %v6411_v13 = vld [vmem:[#allocation2 + $0x6e8] sm:$0xf] }
 0x10a   :  { %2152 = vmatmul.bf16.vlgmr.msrb.gmra.mxu2 %v8867_v0  ;;  %v5548_v37 = vor.u32 %v7969_v29, %v5547_v28  ;;  %v6539_v3 = vld [vmem:[#allocation2 + $0x7e8] sm:$0xf]  ;;  %v6412_v21 = vor.u32 %v8185_v15, %v6411_v13  ;;  %v8145_v23 = vld [vmem:[#allocation2 + $0x5b4] sm:$0xf0] }
 0x10b   :  { %2196 = vmatpush.bf16.msra.mxu2 %v5900_v38  ;;  %2165 = vmatmul.bf16.vlgmr.msrb.gmra.mxu3 %v8869_v7  ;;  %v5947_v38 = vld [vmem:[#allocation2 + $0x348] sm:$0xf]  ;;  %v6540_v24 = vor.u32 %v8217_v17, %v6539_v3  ;;  %v8181_v28 = vld [vmem:[#allocation2 + $0x6d4] sm:$0xf0] }
 0x10c   :  { %2209 = vmatpush.bf16.msra.mxu3 %v6028_v39  ;;  %v5676_v39 = vor.u32 %v8001_v33, %v5675_v32  ;;  %v5948_v48 = vor.u32 %v8069_v57, %v5947_v38  ;;  %v6123_v19 = vld [vmem:[#allocation2 + $0x4a8] sm:$0xf]  ;;  %v8213_v32 = vld [vmem:[#allocation2 + $0x7d4] sm:$0xf0] }
 0x10d   :  { %2172 = vmatpush.bf16.msra.mxu0 %v5612_v43  ;;  %2185 = vmatpush.bf16.msra.mxu1 %v5740_v47  ;;  %v7997_v43 = vld [vmem:[#allocation2 + $0x114] sm:$0xf0]  ;;  %v6363_v56 = vld [vmem:[#allocation2 + $0x688] sm:$0xf] }
 0x10e   :  { %v8121_v47 = vld [vmem:[#allocation2 + $0x4f4] sm:$0xf0]  ;;  %v6491_v59 = vld [vmem:[#allocation2 + $0x788] sm:$0xf] }
 0x10f   :  { %2197 = vmatpush.bf16.msra.mxu2 %v5884_v50  ;;  %v8153_v50 = vld [vmem:[#allocation2 + $0x5f4] sm:$0xf0]  ;;  %v6156_v61 = vor.u32 %v8121_v47, %v6155_v46  ;;  %v6091_v46 = vld [vmem:[#allocation2 + $0x468] sm:$0xf] }
 0x110   :  { %2210 = vmatpush.bf16.msra.mxu3 %v6012_v54  ;;  %v5532_v54 = vor.u32 %v7965_v40, %v5531_v30  ;;  %v8109_v35 = vld [vmem:[#allocation2 + $0x494] sm:$0xf0]  ;;  %v6379_v30 = vld [vmem:[#allocation2 + $0x6a8] sm:$0xf] }
 0x111   :  { %2173 = vmatpush.bf16.msra.mxu0 %v5596_v60  ;;  %2186 = vmatpush.bf16.msra.mxu1 %v5724_v63  ;;  %v5660_v60 = vor.u32 %v7997_v43, %v5659_v41  ;;  %v6284_v63 = vor.u32 %v8153_v50, %v6283_v53  ;;  %v8141_v38 = vld [vmem:[#allocation2 + $0x594] sm:$0xf0]  ;;  %v6507_v41 = vld [vmem:[#allocation2 + $0x7a8] sm:$0xf] }
 0x112   :  { %v8209_v43 = vld [vmem:[#allocation2 + $0x7b4] sm:$0xf0]  ;;  %v6059_v15 = vld [vmem:[#allocation2 + $0x428] sm:$0xf] }
 0x113   :  { %2198 = vmatpush.bf16.msra.mxu2 %v5868_v5  ;;  %v6267_v5 = vld [vmem:[#allocation2 + $0x5c8] sm:$0xf]  ;;  %v8105_v47 = vld [vmem:[#allocation2 + $0x474] sm:$0xf0]  ;;  %v6508_v55 = vor.u32 %v8209_v43, %v6507_v41  ;;  %v7987_v43 = vld [vmem:[#allocation2 + $0xcc] sm:$0xf] }
 0x114   :  { %2211 = vmatpush.bf16.msra.mxu3 %v5996_v9  ;;  %v5787_v9 = vld [vmem:[#allocation2 + $0x208] sm:$0xf]  ;;  %v8137_v50 = vld [vmem:[#allocation2 + $0x574] sm:$0xf0]  ;;  %v6092_v58 = vor.u32 %v8105_v47, %v6091_v46  ;;  %v5629_v47 = vld [vmem:[#allocation2 + $0xd8] sm:$0xf0] }
 0x115   :  { %2174 = vmatpush.bf16.msra.mxu0 %v5580_v12  ;;  %2187 = vmatpush.bf16.msra.mxu1 %v5708_v16  ;;  %v8061_v12 = vld [vmem:[#allocation2 + $0x314] sm:$0xf0]  ;;  %v6140_v16 = vor.u32 %v8117_v2, %v6139_v62  ;;  %v5788_v51 = vor.u32 %v8029_v10, %v5787_v9  ;;  %v6075_v62 = vld [vmem:[#allocation2 + $0x448] sm:$0xf] }
 0x116   :  { %v5916_v52 = vor.u32 %v8061_v12, %v5915_v11  ;;  %v6203_v2 = vld [vmem:[#allocation2 + $0x548] sm:$0xf]  ;;  %v8169_v9 = vld [vmem:[#allocation2 + $0x674] sm:$0xf0] }
 0x117   :  { %2199 = vmatpush.bf16.msra.mxu2 %v5852_v18  ;;  %v6268_v18 = vor.u32 %v8149_v6, %v6267_v5  ;;  %v8133_v5 = vld [vmem:[#allocation2 + $0x554] sm:$0xf0]  ;;  %v6475_v11 = vld [vmem:[#allocation2 + $0x768] sm:$0xf] }
 0x118   :  { %2212 = vmatpush.bf16.msra.mxu3 %v5980_v20  ;;  %v8113_v20 = vld [vmem:[#allocation2 + $0x4b4] sm:$0xf0]  ;;  %v6204_v13 = vor.u32 %v8133_v5, %v6203_v2  ;;  %v6187_v17 = vld [vmem:[#allocation2 + $0x528] sm:$0xf]  ;;  %v7983_v5 = vld [vmem:[#allocation2 + $0xac] sm:$0xf] }
 0x119   :  { %2175 = vmatpush.bf16.msra.mxu0 %v5564_v22  ;;  %2188 = vmatpush.bf16.msra.mxu1 %v5692_v26  ;;  %v6251_v22 = vld [vmem:[#allocation2 + $0x5a8] sm:$0xf]  ;;  %v6124_v29 = vor.u32 %v8113_v20, %v6123_v19  ;;  %v8201_v12 = vld [vmem:[#allocation2 + $0x774] sm:$0xf0] }
 0x11a   :  { %v6395_v26 = vld [vmem:[#allocation2 + $0x6c8] sm:$0xf]  ;;  %v6252_v33 = vor.u32 %v8145_v23, %v6251_v22  ;;  %v8165_v20 = vld [vmem:[#allocation2 + $0x654] sm:$0xf0] }
 0x11b   :  { %2200 = vmatpush.bf16.msra.mxu2 %v5836_v31  ;;  %v6523_v31 = vld [vmem:[#allocation2 + $0x7c8] sm:$0xf]  ;;  %v6396_v36 = vor.u32 %v8181_v28, %v6395_v26  ;;  %v8197_v22 = vld [vmem:[#allocation2 + $0x754] sm:$0xf0] }
 0x11c   :  { %2213 = vmatpush.bf16.msra.mxu3 %v5964_v25  ;;  %v6107_v25 = vld [vmem:[#allocation2 + $0x488] sm:$0xf]  ;;  %v6524_v57 = vor.u32 %v8213_v32, %v6523_v31  ;;  %v8093_v26 = vld [vmem:[#allocation2 + $0x414] sm:$0xf0]  ;;  %v7991_v32 = vld [vmem:[#allocation2 + $0xec] sm:$0xf] }
 0x11d   :  { %2176 = vmatpush.bf16.msra.mxu0 %v5548_v37  ;;  %2189 = vmatpush.bf16.msra.mxu1 %v5676_v39  ;;  %v6235_v37 = vld [vmem:[#allocation2 + $0x588] sm:$0xf]  ;;  %v8177_v39 = vld [vmem:[#allocation2 + $0x6b4] sm:$0xf0]  ;;  %v6108_v40 = vor.u32 %v8109_v35, %v6107_v25  ;;  %v8023_v25 = vld [vmem:[#allocation2 + $0x1ec] sm:$0xf] }
 0x11e   :  { %v6380_v53 = vor.u32 %v8177_v39, %v6379_v30  ;;  %v6331_v19 = vld [vmem:[#allocation2 + $0x648] sm:$0xf]  ;;  %v8193_v39 = vld [vmem:[#allocation2 + $0x734] sm:$0xf0] }
 0x11f   :  { %2201 = vmatpush.bf16.msra.mxu2 %v5820_v45  ;;  %v6236_v45 = vor.u32 %v8141_v38, %v6235_v37  ;;  %v6043_v23 = vld [vmem:[#allocation2 + $0x408] sm:$0xf]  ;;  %v6332_v31 = vor.u32 %v8165_v20, %v6331_v19  ;;  %v8161_v38 = vld [vmem:[#allocation2 + $0x634] sm:$0xf0]  ;;  %v5597_v19 = vld [vmem:[#allocation2 + $0x98] sm:$0xf0] }
 0x120   :  { %2214 = vmatpush.bf16.msra.mxu3 %v5948_v48  ;;  %v6219_v48 = vld [vmem:[#allocation2 + $0x568] sm:$0xf] }
 0x121   :  { %2177 = vmatpush.bf16.msra.mxu0 %v5532_v54  ;;  %2190 = vmatpush.bf16.msra.mxu1 %v5660_v60  ;;  %v8173_v54 = vld [vmem:[#allocation2 + $0x694] sm:$0xf0]  ;;  %v6171_v28 = vld [vmem:[#allocation2 + $0x508] sm:$0xf] }
 0x122   :  { %v8205_v60 = vld [vmem:[#allocation2 + $0x794] sm:$0xf0]  ;;  %v6315_v37 = vld [vmem:[#allocation2 + $0x628] sm:$0xf] }
 0x123   :  { %2202 = vmatpush.bf16.msra.mxu2 %v5804_v1  ;;  %v6364_v1 = vor.u32 %v8173_v54, %v6363_v56  ;;  %v6492_v6 = vor.u32 %v8205_v60, %v6491_v59  ;;  %v6443_v30 = vld [vmem:[#allocation2 + $0x728] sm:$0xf]  ;;  %v6316_v46 = vor.u32 %v8161_v38, %v6315_v37  ;;  %v8157_v56 = vld [vmem:[#allocation2 + $0x614] sm:$0xf0]  ;;  %v8055_v59 = vld [vmem:[#allocation2 + $0x2ec] sm:$0xf] }
 0x124   :  { %2215 = vmatpush.bf16.msra.mxu3 %v5932_v8  ;;  %2178 = vmatmul.bf16.vlgmr.msra.gmra.mxu0 %v8838_v14  ;;  %v6347_v8 = vld [vmem:[#allocation2 + $0x668] sm:$0xf]  ;;  %v5901_v60 = vld [vmem:[#allocation2 + $0x2f8] sm:$0xf0]  ;;  %v8007_v37 = vld [vmem:[#allocation2 + $0x16c] sm:$0xf] }
 0x125   :  { %2222 = vmatpush.bf16.msrb.mxu0 %v6156_v61  ;;  %2235 = vmatpush.bf16.msrb.mxu1 %v6284_v63  ;;  %v6220_v61 = vor.u32 %v8137_v50, %v6219_v48  ;;  %v8101_v63 = vld [vmem:[#allocation2 + $0x454] sm:$0xf0]  ;;  %v6348_v3 = vor.u32 %v8169_v9, %v6347_v8  ;;  %v5757_v48 = vld [vmem:[#allocation2 + $0x1d8] sm:$0xf0]  ;;  %v6444_v50 = vor.u32 %v8193_v39, %v6443_v30  ;;  %v6427_v54 = vld [vmem:[#allocation2 + $0x708] sm:$0xf] }
 0x126   :  { %2191 = vmatmul.bf16.vlgmr.msra.gmra.mxu1 %v8841_v4  ;;  %v6076_v10 = vor.u32 %v8101_v63, %v6075_v62  ;;  %v8087_v62 = vld [vmem:[#allocation2 + $0x3ec] sm:$0xf]  ;;  %v6029_v63 = vld [vmem:[#allocation2 + $0x3f8] sm:$0xf0]  ;;  %v5904_v9 = vor.u32 %v8055_v59, %v5901_v60 }
 0x127   :  { %2203 = vmatpush.bf16.msra.mxu2 %v5788_v51  ;;  %v6476_v51 = vor.u32 %v8201_v12, %v6475_v11  ;;  %v5741_v11 = vld [vmem:[#allocation2 + $0x1b8] sm:$0xf0]  ;;  %v6032_v12 = vor.u32 %v8087_v62, %v6029_v63  ;;  %v8043_v30 = vld [vmem:[#allocation2 + $0x28c] sm:$0xf] }
 0x128   :  { %2216 = vmatpush.bf16.msra.mxu3 %v5916_v52  ;;  %v5709_v38 = vld [vmem:[#allocation2 + $0x178] sm:$0xf0] }
 0x129   :  { %2223 = vmatpush.bf16.msrb.mxu0 %v6140_v16  ;;  %2236 = vmatpush.bf16.msrb.mxu1 %v6268_v18  ;;  %v8097_v16 = vld [vmem:[#allocation2 + $0x434] sm:$0xf0]  ;;  %v5853_v39 = vld [vmem:[#allocation2 + $0x298] sm:$0xf0] }
 0x12a   :  { %2204 = vmatmul.bf16.vlgmr.msra.gmra.mxu2 %v8848_v42  ;;  %v8129_v18 = vld [vmem:[#allocation2 + $0x534] sm:$0xf0]  ;;  %v6060_v52 = vor.u32 %v8097_v16, %v6059_v15  ;;  %v5885_v15 = vld [vmem:[#allocation2 + $0x2d8] sm:$0xf0] }
 0x12b   :  { %2248 = vmatpush.bf16.msrb.mxu2 %v6412_v21  ;;  %2217 = vmatmul.bf16.vlgmr.msra.gmra.mxu3 %v8850_v49  ;;  %v6459_v21 = vld [vmem:[#allocation2 + $0x748] sm:$0xf]  ;;  %v5965_v62 = vld [vmem:[#allocation2 + $0x378] sm:$0xf0] }
 0x12c   :  { %2261 = vmatpush.bf16.msrb.mxu3 %v6540_v24  ;;  %v6188_v24 = vor.u32 %v8129_v18, %v6187_v17  ;;  %v6460_v35 = vor.u32 %v8197_v22, %v6459_v21  ;;  %v6013_v17 = vld [vmem:[#allocation2 + $0x3d8] sm:$0xf0] }
 0x12d   :  { %2224 = vmatpush.bf16.msrb.mxu0 %v6124_v29  ;;  %2237 = vmatpush.bf16.msrb.mxu1 %v6252_v33  ;;  %v8125_v29 = vld [vmem:[#allocation2 + $0x514] sm:$0xf0]  ;;  %v5645_v33 = vld [vmem:[#allocation2 + $0xf8] sm:$0xf0] }
 0x12e   :  { %v5648_v41 = vor.u32 %v7991_v32, %v5645_v33  ;;  %v5725_v21 = vld [vmem:[#allocation2 + $0x198] sm:$0xf0] }
 0x12f   :  { %2249 = vmatpush.bf16.msrb.mxu2 %v6396_v36  ;;  %v5773_v36 = vld [vmem:[#allocation2 + $0x1f8] sm:$0xf0] }
 0x130   :  { %2262 = vmatpush.bf16.msrb.mxu3 %v6524_v57  ;;  %v6044_v57 = vor.u32 %v8093_v26, %v6043_v23  ;;  %v5869_v26 = vld [vmem:[#allocation2 + $0x2b8] sm:$0xf0] }
 0x131   :  { %2225 = vmatpush.bf16.msrb.mxu0 %v6108_v40  ;;  %2238 = vmatpush.bf16.msrb.mxu1 %v6236_v45  ;;  %v6172_v40 = vor.u32 %v8125_v29, %v6171_v28  ;;  %v5776_v45 = vor.u32 %v8023_v25, %v5773_v36  ;;  %v5997_v32 = vld [vmem:[#allocation2 + $0x3b8] sm:$0xf0]  ;;  %v7975_v25 = vld [vmem:[#allocation2 + $0x6c] sm:$0xf] }
 0x133   :  { %2250 = vmatpush.bf16.msrb.mxu2 %v6380_v53  ;;  %v8019_v53 = vld [vmem:[#allocation2 + $0x1cc] sm:$0xf] }
 0x134   :  { %2263 = vmatpush.bf16.msrb.mxu3 %v6508_v55  ;;  %v6299_v55 = vld [vmem:[#allocation2 + $0x608] sm:$0xf] }
 0x135   :  { %2226 = vmatpush.bf16.msrb.mxu0 %v6092_v58  ;;  %2239 = vmatpush.bf16.msrb.mxu1 %v6220_v61  ;;  %v8189_v58 = vld [vmem:[#allocation2 + $0x714] sm:$0xf0]  ;;  %v5632_v61 = vor.u32 %v7987_v43, %v5629_v47  ;;  %v6300_v2 = vor.u32 %v8157_v56, %v6299_v55  ;;  %v5981_v43 = vld [vmem:[#allocation2 + $0x398] sm:$0xf0] }
 0x136   :  { %v6428_v8 = vor.u32 %v8189_v58, %v6427_v54  ;;  %v5565_v47 = vld [vmem:[#allocation2 + $0x58] sm:$0xf0]  ;;  %v8039_v54 = vld [vmem:[#allocation2 + $0x26c] sm:$0xf] }
 0x137   :  { %2251 = vmatpush.bf16.msrb.mxu2 %v6364_v1  ;;  %v5760_v1 = vor.u32 %v8019_v53, %v5757_v48  ;;  %v5856_v53 = vor.u32 %v8043_v30, %v5853_v39  ;;  %v8003_v48 = vld [vmem:[#allocation2 + $0x14c] sm:$0xf]  ;;  %v5837_v58 = vld [vmem:[#allocation2 + $0x278] sm:$0xf0] }
 0x138   :  { %2264 = vmatpush.bf16.msrb.mxu3 %v6492_v6  ;;  %v5613_v6 = vld [vmem:[#allocation2 + $0xb8] sm:$0xf0]  ;;  %v8115_v30 = vld [vmem:[#allocation2 + $0x4cc] sm:$0xf] }
 0x139   :  { %2227 = vmatpush.bf16.msrb.mxu0 %v6076_v10  ;;  %2240 = vmatpush.bf16.msrb.mxu1 %v6204_v13  ;;  %v8015_v10 = vld [vmem:[#allocation2 + $0x1ac] sm:$0xf]  ;;  %v5616_v16 = vor.u32 %v7983_v5, %v5613_v6  ;;  %v5840_v5 = vor.u32 %v8039_v54, %v5837_v58  ;;  %v6413_v54 = vld [vmem:[#allocation2 + $0x6f8] sm:$0xf0] }
 0x13a   :  { %v8051_v13 = vld [vmem:[#allocation2 + $0x2cc] sm:$0xf]  ;;  %v5744_v18 = vor.u32 %v8015_v10, %v5741_v11  ;;  %v5821_v11 = vld [vmem:[#allocation2 + $0x258] sm:$0xf0] }
 0x13b   :  { %2252 = vmatpush.bf16.msrb.mxu2 %v6348_v3  ;;  %v8083_v3 = vld [vmem:[#allocation2 + $0x3cc] sm:$0xf]  ;;  %v5888_v20 = vor.u32 %v8051_v13, %v5885_v15 }
 0x13c   :  { %2265 = vmatpush.bf16.msrb.mxu3 %v6476_v51  ;;  %v7979_v51 = vld [vmem:[#allocation2 + $0x8c] sm:$0xf]  ;;  %v6016_v23 = vor.u32 %v8083_v3, %v6013_v17 }
 0x13d   :  { %2228 = vmatpush.bf16.msrb.mxu0 %v6060_v52  ;;  %2241 = vmatpush.bf16.msrb.mxu1 %v6188_v24  ;;  %v8011_v52 = vld [vmem:[#allocation2 + $0x18c] sm:$0xf]  ;;  %v5600_v29 = vor.u32 %v7979_v51, %v5597_v19  ;;  %v5533_v51 = vld [vmem:[#allocation2 + $0x18] sm:$0xf0] }
 0x13e   :  { %v8047_v24 = vld [vmem:[#allocation2 + $0x2ac] sm:$0xf]  ;;  %v5728_v33 = vor.u32 %v8011_v52, %v5725_v21 }
 0x13f   :  { %2253 = vmatpush.bf16.msrb.mxu2 %v6332_v31  ;;  %v8079_v31 = vld [vmem:[#allocation2 + $0x3ac] sm:$0xf]  ;;  %v5872_v36 = vor.u32 %v8047_v24, %v5869_v26 }
 0x140   :  { %2266 = vmatpush.bf16.msrb.mxu3 %v6460_v35  ;;  %v8887_v22 = vpop.f32.mrf.mxu0  ;;  %v5581_v35 = vld [vmem:[#allocation2 + $0x78] sm:$0xf0]  ;;  %v7999_v6 = vld [vmem:[#allocation2 + $0x12c] sm:$0xf] }
 0x141   :  { %2229 = vmatpush.bf16.msrb.mxu0 %v6044_v57  ;;  %2242 = vmatpush.bf16.msrb.mxu1 %v6172_v40  ;;  %v8890_v28 = vpop.f32.mrf.mxu1  ;;  %v6000_v57 = vor.u32 %v8079_v31, %v5997_v32  ;;  %v5584_v40 = vor.u32 %v7975_v25, %v5581_v35  ;;  %v8035_v10 = vld [vmem:[#allocation2 + $0x24c] sm:$0xf]  ;;  %v6285_v31 = vld [vmem:[#allocation2 + $0x5f8] sm:$0xf0] }
 0x142   :  { %v8067_v15 = vld [vmem:[#allocation2 + $0x34c] sm:$0xf]  ;;  %v5824_v52 = vor.u32 %v8035_v10, %v5821_v11  ;;  %v6253_v10 = vld [vmem:[#allocation2 + $0x5b8] sm:$0xf0] }
 0x143   :  { %2254 = vmatpush.bf16.msrb.mxu2 %v6316_v46  ;;  %v7971_v46 = vld [vmem:[#allocation2 + $0x4c] sm:$0xf] }
 0x144   :  { %2267 = vmatpush.bf16.msrb.mxu3 %v6444_v50  ;;  %2230 = vmatmul.bf16.vlgmr.msrb.gmra.mxu0 %v8859_v27  ;;  %v5693_v50 = vld [vmem:[#allocation2 + $0x158] sm:$0xf0]  ;;  %v5568_v60 = vor.u32 %v7971_v46, %v5565_v47  ;;  %v7963_v3 = vld [vmem:[#allocation2 + $0xc] sm:$0xf] }
 0x145   :  { %2274 = vmatpush.bf16.msra.mxu0 %v5648_v41  ;;  %2287 = vmatpush.bf16.msra.mxu1 %v5776_v45  ;;  %v8075_v41 = vld [vmem:[#allocation2 + $0x38c] sm:$0xf]  ;;  %v5712_v45 = vor.u32 %v8007_v37, %v5709_v38  ;;  %v5696_v63 = vor.u32 %v8003_v48, %v5693_v50  ;;  %v5536_v35 = vor.u32 %v7963_v3, %v5533_v51  ;;  %v5933_v37 = vld [vmem:[#allocation2 + $0x338] sm:$0xf0] }
 0x146   :  { %2243 = vmatmul.bf16.vlgmr.msrb.gmra.mxu1 %v8861_v34  ;;  %v5984_v56 = vor.u32 %v8075_v41, %v5981_v43  ;;  %v7995_v19 = vld [vmem:[#allocation2 + $0x10c] sm:$0xf]  ;;  %v6141_v41 = vld [vmem:[#allocation2 + $0x4d8] sm:$0xf0] }
 0x147   :  { %2255 = vmatpush.bf16.msrb.mxu2 %v6300_v2  ;;  %v5549_v2 = vld [vmem:[#allocation2 + $0x38] sm:$0xf0]  ;;  %v8119_v21 = vld [vmem:[#allocation2 + $0x4ec] sm:$0xf] }
 0x148   :  { %2268 = vmatpush.bf16.msrb.mxu3 %v6428_v8  ;;  %v1973_v55 = vpop.f32.mrf.mxu0  ;;  %v5677_v8 = vld [vmem:[#allocation2 + $0x138] sm:$0xf0]  ;;  %v8151_v24 = vld [vmem:[#allocation2 + $0x5ec] sm:$0xf] }
 0x149   :  { %2275 = vmatpush.bf16.msra.mxu0 %v5632_v61  ;;  %2288 = vmatpush.bf16.msra.mxu1 %v5760_v1  ;;  %v1986_v59 = vpop.f32.mrf.mxu1  ;;  %v8071_v61 = vld [vmem:[#allocation2 + $0x36c] sm:$0xf]  ;;  %v6288_v39 = vor.u32 %v8151_v24, %v6285_v31  ;;  %v5917_v55 = vld [vmem:[#allocation2 + $0x318] sm:$0xf0] }
 0x14a   :  { %2256 = vmatmul.bf16.vlgmr.msrb.gmra.mxu2 %v8867_v0  ;;  %v7967_v1 = vld [vmem:[#allocation2 + $0x2c] sm:$0xf]  ;;  %v6144_v59 = vor.u32 %v8115_v30, %v6141_v41  ;;  %v6525_v51 = vld [vmem:[#allocation2 + $0x7d8] sm:$0xf0] }
 0x14b   :  { %2300 = vmatpush.bf16.msra.mxu2 %v5904_v9  ;;  %2269 = vmatmul.bf16.vlgmr.msrb.gmra.mxu3 %v8869_v7  ;;  %v5968_v9 = vor.u32 %v8071_v61, %v5965_v62  ;;  %v5552_v13 = vor.u32 %v7967_v1, %v5549_v2  ;;  %v8031_v32 = vld [vmem:[#allocation2 + $0x22c] sm:$0xf]  ;;  %v6541_v61 = vld [vmem:[#allocation2 + $0x7f8] sm:$0xf0] }
 0x14c   :  { %2313 = vmatpush.bf16.msra.mxu3 %v6032_v12  ;;  %v8147_v43 = vld [vmem:[#allocation2 + $0x5cc] sm:$0xf]  ;;  %v6125_v2 = vld [vmem:[#allocation2 + $0x4b8] sm:$0xf0] }
 0x14d   :  { %2276 = vmatpush.bf16.msra.mxu0 %v5616_v16  ;;  %2289 = vmatpush.bf16.msra.mxu1 %v5744_v18  ;;  %v8893_v12 = vpop.f32.mrf.mxu2  ;;  %v5949_v16 = vld [vmem:[#allocation2 + $0x358] sm:$0xf0]  ;;  %v5680_v18 = vor.u32 %v7999_v6, %v5677_v8  ;;  %v8027_v47 = vld [vmem:[#allocation2 + $0x20c] sm:$0xf] }
 0x14e   :  { %v8895_v17 = vpop.f32.mrf.mxu3  ;;  %v8059_v48 = vld [vmem:[#allocation2 + $0x30c] sm:$0xf]  ;;  %v6381_v31 = vld [vmem:[#allocation2 + $0x6b8] sm:$0xf0] }
 0x14f   :  { %2301 = vmatpush.bf16.msra.mxu2 %v5888_v20  ;;  %v5661_v20 = vld [vmem:[#allocation2 + $0x118] sm:$0xf0]  ;;  %v8111_v1 = vld [vmem:[#allocation2 + $0x4ac] sm:$0xf]  ;;  %v5920_v6 = vor.u32 %v8059_v48, %v5917_v55 }
 0x150   :  { %2314 = vmatpush.bf16.msra.mxu3 %v6016_v23  ;;  %v6157_v23 = vld [vmem:[#allocation2 + $0x4f8] sm:$0xf0]  ;;  %v8897_v26 = vpop.f32.mrf.mxu0  ;;  %v5664_v38 = vor.u32 %v7995_v19, %v5661_v20  ;;  %v6128_v3 = vor.u32 %v8111_v1, %v6125_v2  ;;  %v8107_v20 = vld [vmem:[#allocation2 + $0x48c] sm:$0xf] }
 0x151   :  { %2277 = vmatpush.bf16.msra.mxu0 %v5600_v29  ;;  %2290 = vmatpush.bf16.msra.mxu1 %v5728_v33  ;;  %v5952_v29 = vor.u32 %v8067_v15, %v5949_v16  ;;  %v5805_v33 = vld [vmem:[#allocation2 + $0x238] sm:$0xf0]  ;;  %v8899_v25 = vpop.f32.mrf.mxu1  ;;  %v8179_v15 = vld [vmem:[#allocation2 + $0x6cc] sm:$0xf] }
 0x152   :  { %v6397_v16 = vld [vmem:[#allocation2 + $0x6d8] sm:$0xf0]  ;;  %v8199_v2 = vld [vmem:[#allocation2 + $0x76c] sm:$0xf] }
 0x153   :  { %2302 = vmatpush.bf16.msra.mxu2 %v5872_v36  ;;  %v8063_v36 = vld [vmem:[#allocation2 + $0x32c] sm:$0xf]  ;;  %v6077_v55 = vld [vmem:[#allocation2 + $0x458] sm:$0xf0] }
 0x154   :  { %2315 = vmatpush.bf16.msra.mxu3 %v6000_v57  ;;  %v6160_v57 = vor.u32 %v8119_v21, %v6157_v23  ;;  %v5936_v46 = vor.u32 %v8063_v36, %v5933_v37  ;;  %v8139_v21 = vld [vmem:[#allocation2 + $0x58c] sm:$0xf]  ;;  %v6237_v23 = vld [vmem:[#allocation2 + $0x598] sm:$0xf0] }
 0x155   :  { %2278 = vmatpush.bf16.msra.mxu0 %v5584_v40  ;;  %2291 = vmatpush.bf16.msra.mxu1 %v5712_v45  ;;  %v5808_v40 = vor.u32 %v8031_v32, %v5805_v33  ;;  %v6269_v45 = vld [vmem:[#allocation2 + $0x5d8] sm:$0xf0]  ;;  %v1999_v50 = vpop.f32.mrf.mxu2  ;;  %v6240_v37 = vor.u32 %v8139_v21, %v6237_v23  ;;  %v8091_v23 = vld [vmem:[#allocation2 + $0x40c] sm:$0xf] }
 0x156   :  { %v2012_v58 = vpop.f32.mrf.mxu3  ;;  %v6272_v62 = vor.u32 %v8147_v43, %v6269_v45  ;;  %v6509_v36 = vld [vmem:[#allocation2 + $0x7b8] sm:$0xf0]  ;;  %v8171_v45 = vld [vmem:[#allocation2 + $0x68c] sm:$0xf] }
 0x157   :  { %2303 = vmatpush.bf16.msra.mxu2 %v5856_v53  ;;  %v5789_v53 = vld [vmem:[#allocation2 + $0x218] sm:$0xf0]  ;;  %v8099_v50 = vld [vmem:[#allocation2 + $0x44c] sm:$0xf] }
 0x158   :  { %2316 = vmatpush.bf16.msra.mxu3 %v5984_v56  ;;  %v8183_v56 = vld [vmem:[#allocation2 + $0x6ec] sm:$0xf]  ;;  %v6205_v58 = vld [vmem:[#allocation2 + $0x558] sm:$0xf0]  ;;  %v6080_v1 = vor.u32 %v8099_v50, %v6077_v55 }
 0x159   :  { %2279 = vmatpush.bf16.msra.mxu0 %v5568_v60  ;;  %2292 = vmatpush.bf16.msra.mxu1 %v5696_v63  ;;  %v8215_v60 = vld [vmem:[#allocation2 + $0x7ec] sm:$0xf]  ;;  %v5792_v63 = vor.u32 %v8027_v47, %v5789_v53  ;;  %v6416_v8 = vor.u32 %v8183_v56, %v6413_v54  ;;  %v2038_v11 = vpop.f32.mrf.mxu1  ;;  %v6301_v55 = vld [vmem:[#allocation2 + $0x618] sm:$0xf0] }
 0x15a   :  { %v8203_v53 = vld [vmem:[#allocation2 + $0x78c] sm:$0xf] }
 0x15b   :  { %2304 = vmatpush.bf16.msra.mxu2 %v5840_v5  ;;  %v2025_v5 = vpop.f32.mrf.mxu0  ;;  %v8131_v54 = vld [vmem:[#allocation2 + $0x54c] sm:$0xf] }
 0x15c   :  { %2317 = vmatpush.bf16.msra.mxu3 %v5968_v9  ;;  %v8143_v9 = vld [vmem:[#allocation2 + $0x5ac] sm:$0xf]  ;;  %v6477_v5 = vld [vmem:[#allocation2 + $0x778] sm:$0xf0] }
 0x15d   :  { %2280 = vmatpush.bf16.msra.mxu0 %v5552_v13  ;;  %2293 = vmatpush.bf16.msra.mxu1 %v5680_v18  ;;  %v6544_v13 = vor.u32 %v8215_v60, %v6541_v61  ;;  %v8211_v18 = vld [vmem:[#allocation2 + $0x7cc] sm:$0xf]  ;;  %v6256_v19 = vor.u32 %v8143_v9, %v6253_v10  ;;  %v6061_v9 = vld [vmem:[#allocation2 + $0x438] sm:$0xf0] }
 0x15e   :  { %v6528_v24 = vor.u32 %v8211_v18, %v6525_v51  ;;  %v8905_v32 = vpop.f32.mrf.mxu3  ;;  %v8167_v61 = vld [vmem:[#allocation2 + $0x66c] sm:$0xf]  ;;  %v6333_v51 = vld [vmem:[#allocation2 + $0x658] sm:$0xf0] }
 0x15f   :  { %2305 = vmatpush.bf16.msra.mxu2 %v5824_v52  ;;  %v6400_v52 = vor.u32 %v8179_v15, %v6397_v16  ;;  %v8127_v11 = vld [vmem:[#allocation2 + $0x52c] sm:$0xf]  ;;  %v8916_v15 = vld [vmem:[%s9357_s7] sm:$0xf] }
 0x160   :  { %2318 = vmatpush.bf16.msra.mxu3 %v5952_v29  ;;  %v8175_v29 = vld [vmem:[#allocation2 + $0x6ac] sm:$0xf] }
 0x161   :  { %2281 = vmatpush.bf16.msra.mxu0 %v5536_v35  ;;  %2294 = vmatpush.bf16.msra.mxu1 %v5664_v38  ;;  %v8207_v35 = vld [vmem:[#allocation2 + $0x7ac] sm:$0xf]  ;;  %v6384_v30 = vor.u32 %v8175_v29, %v6381_v31  ;;  %v674_v29 = vperm.slane %v8916_v15, 0 }
 0x162   :  { %v8103_v38 = vld [vmem:[#allocation2 + $0x46c] sm:$0xf]  ;;  %v6512_v43 = vor.u32 %v8207_v35, %v6509_v36  ;;  %v6173_v35 = vld [vmem:[#allocation2 + $0x518] sm:$0xf0] }
 0x163   :  { %2306 = vmatpush.bf16.msra.mxu2 %v5808_v40  ;;  %v6221_v40 = vld [vmem:[#allocation2 + $0x578] sm:$0xf0]  ;;  %v8909_v41 = vpop.f32.mrf.mxu0  ;;  %v8163_v18 = vld [vmem:[#allocation2 + $0x64c] sm:$0xf] }
 0x164   :  { %2319 = vmatpush.bf16.msra.mxu3 %v5936_v46  ;;  %2282 = vmatmul.bf16.vlgmr.msra.gmra.mxu0 %v8838_v14  ;;  %v6109_v14 = vld [vmem:[#allocation2 + $0x498] sm:$0xf0]  ;;  %v8911_v46 = vpop.f32.mrf.mxu1  ;;  %v6336_v31 = vor.u32 %v8163_v18, %v6333_v51  ;;  %v8155_v50 = vld [vmem:[#allocation2 + $0x60c] sm:$0xf] }
 0x165   :  { %2326 = vmatpush.bf16.msrb.mxu0 %v6160_v57  ;;  %2339 = vmatpush.bf16.msrb.mxu1 %v6288_v39  ;;  %v6112_v33 = vor.u32 %v8107_v20, %v6109_v14  ;;  %v6093_v57 = vld [vmem:[#allocation2 + $0x478] sm:$0xf0]  ;;  %v8135_v39 = vld [vmem:[#allocation2 + $0x56c] sm:$0xf] }
 0x166   :  { %2295 = vmatmul.bf16.vlgmr.msra.gmra.mxu1 %v8841_v4  ;;  %v8903_v4 = vpop.f32.mrf.mxu2  ;;  %v6096_v47 = vor.u32 %v8103_v38, %v6093_v57  ;;  %v6224_v48 = vor.u32 %v8135_v39, %v6221_v40  ;;  %v8195_v14 = vld [vmem:[#allocation2 + $0x74c] sm:$0xf]  ;;  %v6317_v38 = vld [vmem:[#allocation2 + $0x638] sm:$0xf0] }
 0x167   :  { %2307 = vmatpush.bf16.msra.mxu2 %v5792_v63  ;;  %v2064_v63 = vpop.f32.mrf.mxu3  ;;  %v8191_v40 = vld [vmem:[#allocation2 + $0x72c] sm:$0xf] }
 0x168   :  { %2320 = vmatpush.bf16.msra.mxu3 %v5920_v6  ;;  %v6208_v6 = vor.u32 %v8131_v54, %v6205_v58  ;;  %v6429_v54 = vld [vmem:[#allocation2 + $0x718] sm:$0xf0]  ;;  %v8224_v58 = vld [vmem:[%s9358_s8 + $0x30] sm:$0xff] }
 0x169   :  { %2327 = vmatpush.bf16.msrb.mxu0 %v6144_v59  ;;  %2340 = vmatpush.bf16.msrb.mxu1 %v6272_v62  ;;  %v6349_v62 = vld [vmem:[#allocation2 + $0x678] sm:$0xf0] }
 0x16a   :  { %2308 = vmatmul.bf16.vlgmr.msra.gmra.mxu2 %v8848_v42  ;;  %v6365_v42 = vld [vmem:[#allocation2 + $0x698] sm:$0xf0]  ;;  %v6352_v10 = vor.u32 %v8167_v61, %v6349_v62  ;;  %v675_v61 = vperm.slane %v8916_v15, 1 }
 0x16b   :  { %2352 = vmatpush.bf16.msrb.mxu2 %v6416_v8  ;;  %2321 = vmatmul.bf16.vlgmr.msra.gmra.mxu3 %v8850_v49  ;;  %v6493_v49 = vld [vmem:[#allocation2 + $0x798] sm:$0xf0]  ;;  %v6368_v56 = vor.u32 %v8171_v45, %v6365_v42  ;;  %v8095_v8 = vld [vmem:[#allocation2 + $0x42c] sm:$0xf]  ;;  %v2077_v16 = vpop.f32.mrf.mxu0  ;;  %v8225_v42 = vld [vmem:[%s9358_s8 + $0x38] sm:$0xff] }
 0x16c   :  { %2365 = vmatpush.bf16.msrb.mxu3 %v6544_v13  ;;  %v6496_v60 = vor.u32 %v8203_v53, %v6493_v49  ;;  %v6189_v13 = vld [vmem:[#allocation2 + $0x538] sm:$0xf0]  ;;  %v6064_v20 = vor.u32 %v8095_v8, %v6061_v9  ;;  %v8233_v49 = vld [vmem:[%s9358_s8 + $0x78] sm:$0xff]  ;;  %v8228_v16 = vld [vmem:[%s9358_s8 + $0x50] sm:$0xff] }
 0x16d   :  { %2328 = vmatpush.bf16.msrb.mxu0 %v6128_v3  ;;  %2341 = vmatpush.bf16.msrb.mxu1 %v6256_v19  ;;  %v6480_v3 = vor.u32 %v8199_v2, %v6477_v5  ;;  %v2090_v19 = vpop.f32.mrf.mxu1  ;;  %v6192_v21 = vor.u32 %v8127_v11, %v6189_v13  ;;  %v8231_v5 = vld [vmem:[%s9358_s8 + $0x68] sm:$0xff] }
 0x16e   :  { %v2051_v59 = vpop.f32.mrf.mxu2 }
 0x16f   :  { %2353 = vmatpush.bf16.msrb.mxu2 %v6400_v52  ;;  %v6461_v52 = vld [vmem:[#allocation2 + $0x758] sm:$0xf0]  ;;  %v6304_v59 = vor.u32 %v8155_v50, %v6301_v55 }
 0x170   :  { %2366 = vmatpush.bf16.msrb.mxu3 %v6528_v24  ;;  %v6045_v24 = vld [vmem:[#allocation2 + $0x418] sm:$0xf0]  ;;  %v6464_v36 = vor.u32 %v8195_v14, %v6461_v52  ;;  %v8241_v52 = vld [vmem:[%s9358_s8 + $0xb8] sm:$0xff] }
 0x171   :  { %2329 = vmatpush.bf16.msrb.mxu0 %v6112_v33  ;;  %2342 = vmatpush.bf16.msrb.mxu1 %v6240_v37  ;;  %v8123_v33 = vld [vmem:[#allocation2 + $0x50c] sm:$0xf]  ;;  %v6048_v39 = vor.u32 %v8091_v23, %v6045_v24  ;;  %v8218_v24 = vld [vmem:[%s9358_s8] sm:$0xff] }
 0x172   :  { %v8159_v37 = vld [vmem:[#allocation2 + $0x62c] sm:$0xf]  ;;  %v6176_v45 = vor.u32 %v8123_v33, %v6173_v35  ;;  %v8234_v55 = vld [vmem:[%s9358_s8 + $0x80] sm:$0xff] }
 0x173   :  { %2354 = vmatpush.bf16.msrb.mxu2 %v6384_v30  ;;  %v2114_v30 = vpop.f32.mrf.mxu3  ;;  %v6320_v53 = vor.u32 %v8159_v37, %v6317_v38 }
 0x174   :  { %2367 = vmatpush.bf16.msrb.mxu3 %v6512_v43  ;;  %v6445_v43 = vld [vmem:[#allocation2 + $0x738] sm:$0xf0] }
 0x175   :  { %2330 = vmatpush.bf16.msrb.mxu0 %v6096_v47  ;;  %2343 = vmatpush.bf16.msrb.mxu1 %v6224_v48  ;;  %v1972_v47 = vadd.f32 %v8887_v22, %v674_v29  ;;  %v6448_v48 = vor.u32 %v8191_v40, %v6445_v43  ;;  %v8237_v43 = vld [vmem:[%s9358_s8 + $0x98] sm:$0xff] }
 0x176   :  { %v2101_v57 = vpop.f32.mrf.mxu2 }
 0x177   :  { %2355 = vmatpush.bf16.msrb.mxu2 %v6368_v56  ;;  %v8187_v56 = vld [vmem:[#allocation2 + $0x70c] sm:$0xf]  ;;  %v1985_v22 = vadd.f32 %v8890_v28, %v1972_v47  ;;  %v8223_v28 = vld [vmem:[%s9358_s8 + $0x28] sm:$0xff] }
 0x178   :  { %2368 = vmatpush.bf16.msrb.mxu3 %v6496_v60  ;;  %v8232_v60 = vld [vmem:[%s9358_s8 + $0x70] sm:$0xff]  ;;  %v6432_v62 = vor.u32 %v8187_v56, %v6429_v54  ;;  %v676_v56 = vperm.slane %v8916_v15, 2 }
 0x179   :  { %2331 = vmatpush.bf16.msrb.mxu0 %v6080_v1  ;;  %2344 = vmatpush.bf16.msrb.mxu1 %v6208_v6  ;;  %v1998_v63 = vadd.f32 %v8893_v12, %v1985_v22  ;;  %v8230_v6 = vld [vmem:[%s9358_s8 + $0x60] sm:$0xff] }
 0x17b   :  { %2356 = vmatpush.bf16.msrb.mxu2 %v6352_v10  ;;  %v2116_v2 = vpop.f32.mrf.mxu3  ;;  %v2011_v12 = vadd.f32 %v8895_v17, %v1998_v63 }
 0x17c   :  { %2369 = vmatpush.bf16.msrb.mxu3 %v6480_v3 }
 0x17d   :  { %2332 = vmatpush.bf16.msrb.mxu0 %v6064_v20  ;;  %2345 = vmatpush.bf16.msrb.mxu1 %v6192_v21 }
 0x17e   :  { %v2103_v1 = vpop.f32.mrf.mxu2 }
 0x17f   :  { %2357 = vmatpush.bf16.msrb.mxu2 %v6336_v31 }
 0x180   :  { %2370 = vmatpush.bf16.msrb.mxu3 %v6464_v36  ;;  %v8240_v36 = vld [vmem:[%s9358_s8 + $0xb0] sm:$0xff] }
 0x181   :  { %2333 = vmatpush.bf16.msrb.mxu0 %v6048_v39  ;;  %2346 = vmatpush.bf16.msrb.mxu1 %v6176_v45  ;;  %v2127_v9 = vpop.f32.mrf.mxu0  ;;  %v8238_v39 = vld [vmem:[%s9358_s8 + $0xa0] sm:$0xff] }
 0x183   :  { %2358 = vmatpush.bf16.msrb.mxu2 %v6320_v53  ;;  %v2140_v10 = vpop.f32.mrf.mxu1 }
 0x184   :  { %2371 = vmatpush.bf16.msrb.mxu3 %v6448_v48  ;;  %2334 = vmatmul.bf16.vlgmr.msrb.gmra.mxu0 %v8859_v27  ;;  %v2076_v27 = vadd.f32 %v8909_v41, %v675_v61  ;;  %v2024_v41 = vadd.f32 %v8897_v26, %v2011_v12  ;;  %v8220_v26 = vld [vmem:[%s9358_s8 + $0x10] sm:$0xff]  ;;  %v8249_v12 = vld [vmem:[%s9358_s8 + $0xf8] sm:$0xff] }
 0x185   :  { %2646 = vmatpush.bf16.msra.mxu0 %v8225_v42  ;;  %2659 = vmatpush.bf16.msra.mxu1 %v8233_v49  ;;  %v8236_v42 = vld [vmem:[%s9358_s8 + $0x90] sm:$0xff]  ;;  %v8235_v49 = vld [vmem:[%s9358_s8 + $0x88] sm:$0xff] }
 0x186   :  { %2347 = vmatmul.bf16.vlgmr.msrb.gmra.mxu1 %v8861_v34  ;;  %v8222_v34 = vld [vmem:[%s9358_s8 + $0x20] sm:$0xff]  ;;  %v2089_v8 = vadd.f32 %v8911_v46, %v2076_v27  ;;  %v2037_v11 = vadd.f32 %v8899_v25, %v2024_v41  ;;  %v8219_v25 = vld [vmem:[%s9358_s8 + $0x8] sm:$0xff] }
 0x187   :  { %2359 = vmatpush.bf16.msrb.mxu2 %v6304_v59 }
 0x188   :  { %2372 = vmatpush.bf16.msrb.mxu3 %v6432_v62  ;;  %v2102_v17 = vadd.f32 %v2101_v57, %v2089_v8  ;;  %v2050_v46 = vadd.f32 %v8903_v4, %v2037_v11  ;;  %v8227_v4 = vld [vmem:[%s9358_s8 + $0x48] sm:$0xff]  ;;  %v8246_v11 = vld [vmem:[%s9358_s8 + $0xe0] sm:$0xff] }
 0x189   :  { %2647 = vmatpush.bf16.msra.mxu0 %v8224_v58  ;;  %2660 = vmatpush.bf16.msra.mxu1 %v8232_v60  ;;  %v2129_v18 = vpop.f32.mrf.mxu0  ;;  %v8239_v57 = vld [vmem:[%s9358_s8 + $0xa8] sm:$0xff] }
 0x18a   :  { %2360 = vmatmul.bf16.vlgmr.msrb.gmra.mxu2 %v8867_v0  ;;  %v8221_v0 = vld [vmem:[%s9358_s8 + $0x18] sm:$0xff]  ;;  %v2115_v13 = vadd.f32 %v2114_v30, %v2102_v17  ;;  %v2063_v19 = vadd.f32 %v8905_v32, %v2050_v46  ;;  %v8226_v32 = vld [vmem:[%s9358_s8 + $0x40] sm:$0xff] }
 0x18b   :  { %2373 = vmatmul.bf16.vlgmr.msrb.gmra.mxu3 %v8869_v7  ;;  %v8229_v7 = vld [vmem:[%s9358_s8 + $0x58] sm:$0xff]  ;;  %v2142_v51 = vpop.f32.mrf.mxu1  ;;  %2672 = vmatpush.bf16.msra.mxu2 %v8241_v52 }
 0x18c   :  { %v2128_v3 = vadd.f32 %v2127_v9, %v2115_v13  ;;  %v2378_v29 = vmax.f32 %v2063_v19, 0.0  ;;  %2685 = vmatpush.bf16.msra.mxu3 %v8249_v12  ;;  %v8248_v9 = vld [vmem:[%s9358_s8 + $0xf0] sm:$0xff]  ;;  %v8243_v51 = vld [vmem:[%s9358_s8 + $0xc8] sm:$0xff] }
 0x18d   :  { %2648 = vmatpush.bf16.msra.mxu0 %v8223_v28  ;;  %2661 = vmatpush.bf16.msra.mxu1 %v8231_v5  ;;  %v2153_v14 = vpop.f32.mrf.mxu2 }
 0x18e   :  { %v2141_v20 = vadd.f32 %v2140_v10, %v2128_v3  ;;  %v2166_v23 = vpop.f32.mrf.mxu3  ;;  %v2382_v35 = vpack.c.bf16 %v2378_v29, %v2378_v29 }
 0x18f   :  { %2673 = vmatpush.bf16.msra.mxu2 %v8240_v36 }
 0x190   :  { %v2154_v21 = vadd.f32 %v2153_v14, %v2141_v20  ;;  %2686 = vmatpush.bf16.msra.mxu3 %v8248_v9  ;;  %v677_v20 = vperm.slane %v8916_v15, 3 }
 0x191   :  { %2649 = vmatpush.bf16.msra.mxu0 %v8222_v34  ;;  %2662 = vmatpush.bf16.msra.mxu1 %v8230_v6 }
 0x192   :  { %v2167_v31 = vadd.f32 %v2166_v23, %v2154_v21 }
 0x193   :  { %2674 = vmatpush.bf16.msra.mxu2 %v8239_v57 }
 0x194   :  { %v2379_v33 = vmax.f32 %v2167_v31, 0.0 }
 0x195   :  { %2650 = vmatpush.bf16.msra.mxu0 %v8221_v0  ;;  %2663 = vmatpush.bf16.msra.mxu1 %v8229_v7  ;;  %v2155_v38 = vpop.f32.mrf.mxu2  ;;  %v8247_v0 = vld [vmem:[%s9358_s8 + $0xe8] sm:$0xff] }
 0x196   :  { %v2383_v37 = vpack.c.bf16 %v2379_v33, %v2379_v33  ;;  %v2168_v30 = vpop.f32.mrf.mxu3  ;;  %2687 = vmatpush.bf16.msra.mxu3 %v8247_v0  ;;  %v2700_v33 = vld [vmem:[%s9378_s20] sm:$0xff] }
 0x197   :  { %2675 = vmatpush.bf16.msra.mxu2 %v8238_v39  ;;  %2702 = vrot.lane.b32.xlu0 %v2700_v33, %s8643_s21  ;;  %v2713_v0 = vld [vmem:[%s9360_s10] sm:$0xff] }
 0x199   :  { %2651 = vmatpush.bf16.msra.mxu0 %v8220_v26  ;;  %2664 = vmatpush.bf16.msra.mxu1 %v8228_v16  ;;  %v8245_v26 = vld [vmem:[%s9358_s8 + $0xd8] sm:$0xff]  ;;  %v8244_v16 = vld [vmem:[%s9358_s8 + $0xd0] sm:$0xff] }
 0x19a   :  { %2688 = vmatpush.bf16.msra.mxu3 %v8246_v11 }
 0x19b   :  { %2676 = vmatpush.bf16.msra.mxu2 %v8237_v43 }
 0x19d   :  { %2652 = vmatpush.bf16.msra.mxu0 %v8219_v25  ;;  %2665 = vmatpush.bf16.msra.mxu1 %v8227_v4  ;;  %v8242_v4 = vld [vmem:[%s9358_s8 + $0xc0] sm:$0xff] }
 0x19e   :  { %2689 = vmatpush.bf16.msra.mxu3 %v8245_v26 }
 0x19f   :  { %2677 = vmatpush.bf16.msra.mxu2 %v8236_v42 }
 0x1a1   :  { %2653 = vmatpush.bf16.msra.mxu0 %v8218_v24  ;;  %2666 = vmatpush.bf16.msra.mxu1 %v8226_v32  ;;  %v2179_v40 = vpop.f32.mrf.mxu0 }
 0x1a2   :  { %v2180_v22 = vadd.f32 %v2179_v40, %v676_v56  ;;  %2690 = vmatpush.bf16.msra.mxu3 %v8244_v16 }
 0x1a3   :  { %v2192_v45 = vpop.f32.mrf.mxu1  ;;  %2678 = vmatpush.bf16.msra.mxu2 %v8235_v49 }
 0x1a4   :  { %2654 = vmatmul.bf16.vlgmr.msra.gmra.mxu0 %v2382_v35  ;;  %2667 = vmatmul.bf16.vlgmr.msra.gmra.mxu1 %v2383_v37  ;;  %v2193_v59 = vadd.f32 %v2192_v45, %v2180_v22 }
 0x1a6   :  { %2691 = vmatpush.bf16.msra.mxu3 %v8243_v51 }
 0x1a7   :  { %2679 = vmatpush.bf16.msra.mxu2 %v8234_v55 }
 0x1a9   :  { %v2181_v47 = vpop.f32.mrf.mxu0 }
 0x1aa   :  { %2692 = vmatpush.bf16.msra.mxu3 %v8242_v4  ;;  %v8579_v47 = vld [vmem:[%s9359_s9] ss:$0 sm:$0xff]  ;;  %s8644_s9 = smov 127   ;;  %v6908_v4 = vld [vmem:[#allocation4 + $0x1c0] sm:$0xf] }
 0x1ab   :  { %v2194_v53 = vpop.f32.mrf.mxu1 }
 0x1ad   :  { %v2205_v48 = vpop.f32.mrf.mxu2 }
 0x1ae   :  { %v2218_v50 = vpop.f32.mrf.mxu3  ;;  %v2206_v61 = vadd.f32 %v2205_v48, %v2193_v59 }
 0x1b0   :  { %v2219_v63 = vadd.f32 %v2218_v50, %v2206_v61 }
 0x1b5   :  { %v2207_v54 = vpop.f32.mrf.mxu2 }
 0x1b6   :  { %v2220_v58 = vpop.f32.mrf.mxu3 }
 0x1c1   :  { %v2231_v60 = vpop.f32.mrf.mxu0 }
 0x1c2   :  { %v2232_v1 = vadd.f32 %v2231_v60, %v2219_v63 }
 0x1c3   :  { %v2244_v62 = vpop.f32.mrf.mxu1 }
 0x1c4   :  { %v2245_v5 = vadd.f32 %v2244_v62, %v2232_v1 }
 0x1c9   :  { %v2233_v2 = vpop.f32.mrf.mxu0 }
 0x1cb   :  { %v2246_v28 = vpop.f32.mrf.mxu1 }
 0x1cc   :  { %v2715_v28 = vld [vmem:[%s9361_s11] sm:$0xf] }
 0x1cd   :  { %v2257_v27 = vpop.f32.mrf.mxu2  ;;  %2717 = vst [vmem:[#allocation1] ss:$9 sm:$0xff] %v2715_v28 }
 0x1ce   :  { %v2258_v34 = vadd.f32 %v2257_v27, %v2245_v5  ;;  %v2270_v6 = vpop.f32.mrf.mxu3  ;;  %v8645_v27 = vmov 0  }
 0x1cf   :  { %v2728_v12 = vsel %vm2726_vm3, 65535, %v8645_v27  ;;  %v7324_v27 = vld [vmem:[#allocation4 + $0x500] sm:$0xf] }
 0x1d0   :  { %v2271_v8 = vadd.f32 %v2270_v6, %v2258_v34 }
 0x1d2   :  { %v2380_v41 = vmax.f32 %v2271_v8, 0.0 }
 0x1d4   :  { %v2384_v17 = vpack.c.bf16 %v2380_v41, %v2380_v41  ;;  %v2718_v5 = vld [vmem:[#allocation1] sm:$0xff]  ;;  %v2719_v34 = vld [vmem:[#allocation1 + $0x9] sm:$0xff]  ;;  %v2720_v6 = vld [vmem:[#allocation1 + $0x12] sm:$0xff] }
 0x1d5   :  { %v2259_v10 = vpop.f32.mrf.mxu2  ;;  %v2729_v8 = vand.u32 %v2728_v12, %v2718_v5  ;;  %v2731_v41 = vand.u32 %v2728_v12, %v2719_v34  ;;  %v2733_v9 = vand.u32 %v2728_v12, %v2720_v6  ;;  %v7580_v34 = vld [vmem:[#allocation4 + $0x700] sm:$0xf] }
 0x1d6   :  { %v2272_v7 = vpop.f32.mrf.mxu3  ;;  %2680 = vmatmul.bf16.vlgmr.msra.gmra.mxu2 %v2384_v17  ;;  %v2721_v17 = vld [vmem:[#allocation1 + $0x1b] sm:$0xff]  ;;  %v8478_v6 = vld [vmem:[#allocation4 + $0x71c] sm:$0xf0] }
 0x1d7   :  { %v2735_v10 = vand.u32 %v2728_v12, %v2721_v17  ;;  %2744 = vmatpush.bf16.msrb.mxu0 %v2729_v8  ;;  %2757 = vmatpush.bf16.msrb.mxu1 %v2731_v41  ;;  %2790 = vst [vmem:[#allocation1] ss:$4 sm:$0xff] %v2713_v0  ;;  %v8414_v12 = vld [vmem:[#allocation4 + $0x51c] sm:$0xf0] }
 0x1d8   :  { %2770 = vmatpush.bf16.msrb.mxu2 %v2733_v9  ;;  %v6780_v9 = vld [vmem:[#allocation4 + $0xc0] sm:$0xf] }
 0x1d9   :  { %2783 = vmatpush.bf16.msrb.mxu3 %v2735_v10  ;;  %v8278_v17 = vld [vmem:[#allocation4 + $0xdc] sm:$0xf0] }
 0x1da   :  { %v7036_v10 = vld [vmem:[#allocation4 + $0x2c0] sm:$0xf] }
 0x1db   :  { %v8342_v0 = vld [vmem:[#allocation4 + $0x2dc] sm:$0xf0] }
 0x1de   :  { %v2791_v7 = vld.sshfl [vmem:[#allocation1] sm:$0xff pattern:$0x73625140]  ;;  %v2792_v11 = vld.sshfl [vmem:[#allocation1 + $0x8] sm:$0xff pattern:$0x73625140] }
 0x1df   :  { %v2797_v26 = vsel %vm117_vm0, %v2792_v11, 0  ;;  %v7581_v11 = vor.u32 %v8478_v6, %v7580_v34  ;;  %v8446_v34 = vld [vmem:[#allocation4 + $0x61c] sm:$0xf0]  ;;  %v8434_v6 = vld [vmem:[#allocation4 + $0x5c4] sm:$0xf] }
 0x1e0   :  { %2823 = vmatpush.bf16.msra.mxu1 %v2797_v26  ;;  %v8406_v26 = vld [vmem:[#allocation4 + $0x4dc] sm:$0xf0] }
 0x1e1   :  { %v2283_v13 = vpop.f32.mrf.mxu0 }
 0x1e2   :  { %v2284_v21 = vadd.f32 %v2283_v13, %v677_v20  ;;  %v2795_v13 = vsel %vm117_vm0, %v2791_v7, 0  ;;  %v8310_v20 = vld [vmem:[#allocation4 + $0x1dc] sm:$0xf0]  ;;  %v7325_v7 = vor.u32 %v8414_v12, %v7324_v27 }
 0x1e3   :  { %v2296_v46 = vpop.f32.mrf.mxu1  ;;  %2810 = vmatpush.bf16.msra.mxu0 %v2795_v13  ;;  %v6909_v33 = vor.u32 %v8310_v20, %v6908_v4  ;;  %v7292_v13 = vld [vmem:[#allocation4 + $0x4c0] sm:$0xf] }
 0x1e4   :  { %v2297_v23 = vadd.f32 %v2296_v46, %v2284_v21  ;;  %v2793_v46 = vld.sshfl [vmem:[#allocation1 + $0x10] sm:$0xff pattern:$0x73625140]  ;;  %v7420_v21 = vld [vmem:[#allocation4 + $0x5c0] sm:$0xf]  ;;  %v7293_v20 = vor.u32 %v8406_v26, %v7292_v13 }
 0x1e5   :  { %v2799_v16 = vsel %vm117_vm0, %v2793_v46, 0  ;;  %v7548_v46 = vld [vmem:[#allocation4 + $0x6c0] sm:$0xf]  ;;  %v8354_v13 = vld [vmem:[#allocation4 + $0x344] sm:$0xf] }
 0x1e6   :  { %2836 = vmatpush.bf16.msra.mxu2 %v2799_v16  ;;  %v8470_v16 = vld [vmem:[#allocation4 + $0x6dc] sm:$0xf0] }
 0x1e7   :  { %v8334_v4 = vld [vmem:[#allocation4 + $0x29c] sm:$0xf0] }
 0x1e8   :  { %v7452_v12 = vld [vmem:[#allocation4 + $0x600] sm:$0xf] }
 0x1e9   :  { %v2285_v3 = vpop.f32.mrf.mxu0 }
 0x1ea   :  { %v2794_v3 = vld.sshfl [vmem:[#allocation1 + $0x18] sm:$0xff pattern:$0x73625140] }
 0x1eb   :  { %v2298_v18 = vpop.f32.mrf.mxu1 }
 0x1ec   :  { %v2801_v18 = vsel %vm117_vm0, %v2794_v3, 0  ;;  %v6781_v3 = vor.u32 %v8278_v17, %v6780_v9  ;;  %v8498_v9 = vld [vmem:[#allocation4 + $0x7c4] sm:$0xf] }
 0x1ed   :  { %v2309_v25 = vpop.f32.mrf.mxu2  ;;  %v7678_v17 = vld [vmem:[#allocation4 + $0x7e0] sm:$0xf0] }
 0x1ee   :  { %v2322_v19 = vpop.f32.mrf.mxu3  ;;  %v2310_v29 = vadd.f32 %v2309_v25, %v2297_v23  ;;  %v8438_v23 = vld [vmem:[#allocation4 + $0x5dc] sm:$0xf0] }
 0x1f0   :  { %v2323_v31 = vadd.f32 %v2322_v19, %v2310_v29  ;;  %v7676_v29 = vld [vmem:[#allocation4 + $0x7c0] sm:$0xf] }
 0x1f5   :  { %v2311_v14 = vpop.f32.mrf.mxu2 }
 0x1f6   :  { %v2324_v52 = vpop.f32.mrf.mxu3  ;;  %v7164_v14 = vld [vmem:[#allocation4 + $0x3c0] sm:$0xf] }
 0x1f7   :  { %v8374_v52 = vld [vmem:[#allocation4 + $0x3dc] sm:$0xf0] }
 0x201   :  { %v2335_v24 = vpop.f32.mrf.mxu0 }
 0x202   :  { %v2336_v35 = vadd.f32 %v2335_v24, %v2323_v31 }
 0x203   :  { %v2348_v32 = vpop.f32.mrf.mxu1 }
 0x204   :  { %v2349_v38 = vadd.f32 %v2348_v32, %v2336_v35  ;;  %v8502_v32 = vld [vmem:[#allocation4 + $0x7dc] sm:$0xf0]  ;;  %v7165_v35 = vor.u32 %v8374_v52, %v7164_v14  ;;  %v7549_v14 = vor.u32 %v8470_v16, %v7548_v46  ;;  %v7102_v46 = vld [vmem:[#allocation4 + $0x360] sm:$0xf0] }
 0x205   :  { %v7260_v52 = vld [vmem:[#allocation4 + $0x480] sm:$0xf]  ;;  %v7105_v16 = vor.u32 %v8354_v13, %v7102_v46  ;;  %v8386_v13 = vld [vmem:[#allocation4 + $0x444] sm:$0xf] }
 0x206   :  { %v8450_v46 = vld [vmem:[#allocation4 + $0x644] sm:$0xf] }
 0x209   :  { %v2337_v36 = vpop.f32.mrf.mxu0  ;;  %v2703_v63 = vpop.permute.xlu0 %2702 }
 0x20a   :  { %v6876_v36 = vld [vmem:[#allocation4 + $0x180] sm:$0xf] }
 0x20b   :  { %v2350_v37 = vpop.f32.mrf.mxu1 }
 0x20c   :  { %v8302_v37 = vld [vmem:[#allocation4 + $0x19c] sm:$0xf0] }
 0x20d   :  { %v2361_v57 = vpop.f32.mrf.mxu2 }
 0x20e   :  { %v2362_v15 = vadd.f32 %v2361_v57, %v2349_v38  ;;  %v2374_v30 = vpop.f32.mrf.mxu3  ;;  %v7132_v38 = vld [vmem:[#allocation4 + $0x380] sm:$0xf] }
 0x20f   :  { %v8366_v57 = vld [vmem:[#allocation4 + $0x39c] sm:$0xf0] }
 0x210   :  { %v2375_v39 = vadd.f32 %v2374_v30, %v2362_v15  ;;  %v7421_v15 = vor.u32 %v8438_v23, %v7420_v21  ;;  %v7677_v30 = vor.u32 %v8502_v32, %v7676_v29  ;;  %v8398_v21 = vld [vmem:[#allocation4 + $0x49c] sm:$0xf0] }
 0x211   :  { %v7516_v23 = vld [vmem:[#allocation4 + $0x680] sm:$0xf] }
 0x212   :  { %v2381_v40 = vmax.f32 %v2375_v39, 0.0  ;;  %v7388_v39 = vld [vmem:[#allocation4 + $0x580] sm:$0xf] }
 0x214   :  { %v2385_v43 = vpack.c.bf16 %v2381_v40, %v2381_v40  ;;  %v8430_v40 = vld [vmem:[#allocation4 + $0x59c] sm:$0xf0] }
 0x215   :  { %v2363_v45 = vpop.f32.mrf.mxu2 }
 0x216   :  { %v2376_v42 = vpop.f32.mrf.mxu3  ;;  %2693 = vmatmul.bf16.vlgmr.msra.gmra.mxu3 %v2385_v43  ;;  %v7644_v43 = vld [vmem:[#allocation4 + $0x780] sm:$0xf] }
 0x217   :  { %2849 = vmatpush.bf16.msra.mxu3 %v2801_v18  ;;  %v8494_v45 = vld [vmem:[#allocation4 + $0x79c] sm:$0xf0]  ;;  %v6877_v42 = vor.u32 %v8302_v37, %v6876_v36  ;;  %v7037_v18 = vor.u32 %v8342_v0, %v7036_v10  ;;  %v7261_v37 = vor.u32 %v8398_v21, %v7260_v52  ;;  %v7681_v0 = vor.u32 %v8498_v9, %v7678_v17  ;;  %v8346_v52 = vld [vmem:[#allocation4 + $0x304] sm:$0xf] }
 0x218   :  { %v8326_v36 = vld [vmem:[#allocation4 + $0x25c] sm:$0xf0]  ;;  %v8250_v9 = vld [vmem:[#allocation4 + $0x4] sm:$0xf] }
 0x219   :  { %v6686_v17 = vld [vmem:[#allocation4 + $0x20] sm:$0xf0] }
 0x221   :  { %v2655_v53 = vpop.f32.mrf.mxu0  ;;  %v2668_v48 = vpop.f32.mrf.mxu1 }
 0x222   :  { %v2656_v49 = vadd.f32 %v8579_v47, %v2655_v53  ;;  %v7133_v47 = vor.u32 %v8366_v57, %v7132_v38  ;;  %v6844_v53 = vld [vmem:[#allocation4 + $0x140] sm:$0xf] }
 0x223   :  { %v7228_v57 = vld [vmem:[#allocation4 + $0x440] sm:$0xf] }
 0x224   :  { %v2669_v50 = vadd.f32 %v2668_v48, %v2656_v49  ;;  %v8294_v49 = vld [vmem:[#allocation4 + $0x15c] sm:$0xf0] }
 0x225   :  { %v7100_v48 = vld [vmem:[#allocation4 + $0x340] sm:$0xf] }
 0x229   :  { %v2657_v55 = vpop.f32.mrf.mxu0  ;;  %v2670_v56 = vpop.f32.mrf.mxu1 }
 0x22a   :  { %v7389_v55 = vor.u32 %v8430_v40, %v7388_v39  ;;  %v7645_v56 = vor.u32 %v8494_v45, %v7644_v43  ;;  %v8454_v39 = vld [vmem:[#allocation4 + $0x65c] sm:$0xf0] }
 0x22b   :  { %v6684_v43 = vld [vmem:[#allocation4] sm:$0xf] }
 0x22c   :  { %v8254_v45 = vld [vmem:[#allocation4 + $0x1c] sm:$0xf0] }
 0x259   :  { %v2681_v54 = vpop.f32.mrf.mxu2 }
 0x25a   :  { %v2682_v22 = vadd.f32 %v2681_v54, %v2669_v50  ;;  %v8358_v50 = vld [vmem:[#allocation4 + $0x35c] sm:$0xf0] }
 0x25b   :  { %v7356_v54 = vld [vmem:[#allocation4 + $0x540] sm:$0xf] }
 0x261   :  { %v2683_v58 = vpop.f32.mrf.mxu2 }
 0x262   :  { %v8422_v58 = vld [vmem:[#allocation4 + $0x55c] sm:$0xf0] }
 0x263   :  { %v7357_v28 = vor.u32 %v8422_v58, %v7356_v54  ;;  %v6685_v54 = vor.u32 %v8254_v45, %v6684_v43  ;;  %v8474_v43 = vld [vmem:[#allocation4 + $0x704] sm:$0xf] }
 0x299   :  { %v2694_v59 = vpop.f32.mrf.mxu3 }
 0x29a   :  { %v2695_v60 = vadd.f32 %v2694_v59, %v2682_v22  ;;  %v7612_v22 = vld [vmem:[#allocation4 + $0x740] sm:$0xf] }
 0x29b   :  { %v8486_v59 = vld [vmem:[#allocation4 + $0x75c] sm:$0xf0] }
 0x29c   :  { %v2698_v61 = vmul.f32 1.442695, %v2695_v60  ;;  %5485 = vst.msk [vmem:[%s9368_s18] sm:$0xff] %vm2722_vm2, %v2695_v60  ;;  %v7613_v5 = vor.u32 %v8486_v59, %v7612_v22 }
 0x29e   :  { %8581 = vpow2.f32 %v2698_v61  ;;  %v7101_v61 = vor.u32 %v8358_v50, %v7100_v48  ;;  %v6910_v50 = vld [vmem:[#allocation4 + $0x1e0] sm:$0xf0] }
 0x2a1   :  { %v2696_v62 = vpop.f32.mrf.mxu3 }
 0x2a2   :  { %v6812_v62 = vld [vmem:[#allocation4 + $0x100] sm:$0xf] }
 0x2a4   :  { %v8582_v1 = vpop.eup %8581 }
 0x2a5   :  { %v2705_v2 = vmul.f32 %v8582_v1, %v2703_v63  ;;  %5487 = vrot.lane.b32.xlu1 %v8582_v1, %s8644_s9  ;;  %v8286_v63 = vld [vmem:[#allocation4 + $0x11c] sm:$0xf0] }
 0x2a6   :  { %v7068_v1 = vld [vmem:[#allocation4 + $0x300] sm:$0xf]  ;;  %v6813_v8 = vor.u32 %v8286_v63, %v6812_v62  ;;  %v8362_v62 = vld [vmem:[#allocation4 + $0x384] sm:$0xf] }
 0x2a7   :  { %2707 = vrot.lane.b32.xlu0 %v2705_v2, %s8644_s9  ;;  %v8350_v2 = vld [vmem:[#allocation4 + $0x31c] sm:$0xf0] }
 0x2a8   :  { %v7069_v41 = vor.u32 %v8350_v2, %v7068_v1  ;;  %v7134_v1 = vld [vmem:[#allocation4 + $0x3a0] sm:$0xf0]  ;;  %v7196_v2 = vld [vmem:[#allocation4 + $0x400] sm:$0xf] }
 0x317   :  { %v5488_v51 = vpop.permute.xlu1 %5487 }
 0x318   :  { %5490 = vst.msk [vmem:[%s9369_s19] sm:$0xff] %vm2722_vm2, %v5488_v51  ;;  %v6748_v51 = vld [vmem:[#allocation4 + $0x80] sm:$0xf] }
 0x319   :  { %v2708_v25 = vpop.permute.xlu0 %2707 }
 0x31a   :  { %v2710_v19 = vadd.f32 %v2708_v25, %v2695_v60  ;;  %v6845_v60 = vor.u32 %v8294_v49, %v6844_v53  ;;  %v8270_v25 = vld [vmem:[#allocation4 + $0x9c] sm:$0xf0]  ;;  %v8306_v53 = vld [vmem:[#allocation4 + $0x1c4] sm:$0xf] }
 0x31b   :  { %v6749_v29 = vor.u32 %v8270_v25, %v6748_v51  ;;  %v6913_v22 = vor.u32 %v8306_v53, %v6910_v50  ;;  %v8490_v51 = vld [vmem:[#allocation4 + $0x784] sm:$0xf] }
 0x31c   :  { %v6673_v24 = vclamps-f32 %v2710_v19, 1.0  ;;  %v7004_v19 = vld [vmem:[#allocation4 + $0x280] sm:$0xf]  ;;  %v8266_v53 = vld [vmem:[#allocation4 + $0x84] sm:$0xf] }
 0x31d   :  { %v7005_v32 = vor.u32 %v8334_v4, %v7004_v19  ;;  %v7646_v19 = vld [vmem:[#allocation4 + $0x7a0] sm:$0xf0] }
 0x31e   :  { %v2714_v31 = vpack.c.bf16 %v6673_v24, %v6673_v24  ;;  %v8462_v24 = vld [vmem:[#allocation4 + $0x69c] sm:$0xf0]  ;;  %v7649_v4 = vor.u32 %v8490_v51, %v7646_v19  ;;  %v8378_v51 = vld [vmem:[#allocation4 + $0x404] sm:$0xf] }
 0x31f   :  { %v7517_v38 = vor.u32 %v8462_v24, %v7516_v23  ;;  %v7070_v23 = vld [vmem:[#allocation4 + $0x320] sm:$0xf0] }
 0x320   :  { %6674 = vmatmul.msk.bf16.vlgmr.msrb.gmra.mxu0 %vm2722_vm2, %v2714_v31  ;;  %6675 = vmatmul.msk.bf16.vlgmr.msrb.gmra.mxu1 %vm2722_vm2, %v2714_v31  ;;  %v7073_v24 = vor.u32 %v8346_v52, %v7070_v23 }
 0x321   :  { %6676 = vmatmul.msk.bf16.vlgmr.msrb.gmra.mxu2 %vm2722_vm2, %v2714_v31  ;;  %6677 = vmatmul.msk.bf16.vlgmr.msrb.gmra.mxu3 %vm2722_vm2, %v2714_v31  ;;  %v6716_v31 = vld [vmem:[#allocation4 + $0x40] sm:$0xf] }
 0x322   :  { %4431 = vmatpush.bf16.msrb.mxu0 %v6909_v33  ;;  %4444 = vmatpush.bf16.msrb.mxu1 %v7165_v35  ;;  %v8262_v33 = vld [vmem:[#allocation4 + $0x5c] sm:$0xf0] }
 0x323   :  { %4457 = vmatpush.bf16.msrb.mxu2 %v7421_v15  ;;  %4470 = vmatpush.bf16.msrb.mxu3 %v7677_v30  ;;  %v6972_v35 = vld [vmem:[#allocation4 + $0x240] sm:$0xf]  ;;  %v6717_v40 = vor.u32 %v8262_v33, %v6716_v31  ;;  %v8482_v31 = vld [vmem:[#allocation4 + $0x744] sm:$0xf] }
 0x324   :  { %v8390_v15 = vld [vmem:[#allocation4 + $0x45c] sm:$0xf0] }
 0x325   :  { %v7484_v30 = vld [vmem:[#allocation4 + $0x640] sm:$0xf]  ;;  %v7229_v49 = vor.u32 %v8390_v15, %v7228_v57  ;;  %v8338_v15 = vld [vmem:[#allocation4 + $0x2c4] sm:$0xf] }
 0x326   :  { %4432 = vmatpush.bf16.msrb.mxu0 %v6877_v42  ;;  %4445 = vmatpush.bf16.msrb.mxu1 %v7133_v47  ;;  %v6940_v42 = vld [vmem:[#allocation4 + $0x200] sm:$0xf]  ;;  %v7485_v48 = vor.u32 %v8454_v39, %v7484_v30  ;;  %v7038_v30 = vld [vmem:[#allocation4 + $0x2e0] sm:$0xf0] }
 0x327   :  { %4458 = vmatpush.bf16.msrb.mxu2 %v7389_v55  ;;  %4471 = vmatpush.bf16.msrb.mxu3 %v7645_v56  ;;  %v8318_v47 = vld [vmem:[#allocation4 + $0x21c] sm:$0xf0]  ;;  %v8370_v55 = vld [vmem:[#allocation4 + $0x3c4] sm:$0xf]  ;;  %v7041_v39 = vor.u32 %v8338_v15, %v7038_v30 }
 0x328   :  { %v7166_v56 = vld [vmem:[#allocation4 + $0x3e0] sm:$0xf0]  ;;  %v6941_v58 = vor.u32 %v8318_v47, %v6940_v42 }
 0x329   :  { %v7169_v59 = vor.u32 %v8370_v55, %v7166_v56  ;;  %v7582_v42 = vld [vmem:[#allocation4 + $0x720] sm:$0xf0] }
 0x32a   :  { %4433 = vmatpush.bf16.msrb.mxu0 %v6845_v60  ;;  %4446 = vmatpush.bf16.msrb.mxu1 %v7101_v61  ;;  %v8298_v60 = vld [vmem:[#allocation4 + $0x184] sm:$0xf]  ;;  %v7585_v47 = vor.u32 %v8474_v43, %v7582_v42  ;;  %v8311_v43 = vld [vmem:[#allocation4 + $0x1e4] sm:$0xf0] }
 0x32b   :  { %4459 = vmatpush.bf16.msrb.mxu2 %v7357_v28  ;;  %4472 = vmatpush.bf16.msrb.mxu3 %v7613_v5  ;;  %v6878_v61 = vld [vmem:[#allocation4 + $0x1a0] sm:$0xf0]  ;;  %v8382_v28 = vld [vmem:[#allocation4 + $0x41c] sm:$0xf0]  ;;  %v7137_v5 = vor.u32 %v8362_v62, %v7134_v1  ;;  %v8375_v42 = vld [vmem:[#allocation4 + $0x3e4] sm:$0xf0] }
 0x32c   :  { %v6881_v63 = vor.u32 %v8298_v60, %v6878_v61  ;;  %v7197_v27 = vor.u32 %v8382_v28, %v7196_v2  ;;  %v7006_v55 = vld [vmem:[#allocation4 + $0x2a0] sm:$0xf0] }
 0x32d   :  { %v7550_v60 = vld [vmem:[#allocation4 + $0x6e0] sm:$0xf0] }
 0x32e   :  { %4434 = vmatpush.bf16.msrb.mxu0 %v6813_v8  ;;  %4447 = vmatpush.bf16.msrb.mxu1 %v7069_v41  ;;  %v7453_v8 = vor.u32 %v8446_v34, %v7452_v12  ;;  %v7422_v41 = vld [vmem:[#allocation4 + $0x5e0] sm:$0xf0] }
 0x32f   :  { %4460 = vmatpush.bf16.msrb.mxu2 %v7325_v7  ;;  %4473 = vmatpush.bf16.msrb.mxu3 %v7581_v11  ;;  %v7425_v10 = vor.u32 %v8434_v6, %v7422_v41  ;;  %v8290_v7 = vld [vmem:[#allocation4 + $0x144] sm:$0xf] }
 0x330   :  { %6678 = vmatmul.msk.bf16.vlgmr.msra.gmra.mxu0 %vm113_vm1, %v8794_v44  ;;  %6679 = vmatmul.msk.bf16.vlgmr.msra.gmra.mxu1 %vm113_vm1, %v8794_v44  ;;  %v6846_v11 = vld [vmem:[#allocation4 + $0x160] sm:$0xf0] }
 0x331   :  { %6680 = vmatmul.msk.bf16.vlgmr.msra.gmra.mxu2 %vm113_vm1, %v8794_v44  ;;  %6681 = vmatmul.msk.bf16.vlgmr.msra.gmra.mxu3 %vm113_vm1, %v8794_v44  ;;  %v6973_v44 = vor.u32 %v8326_v36, %v6972_v35  ;;  %v6849_v26 = vor.u32 %v8290_v7, %v6846_v11  ;;  %v7614_v35 = vld [vmem:[#allocation4 + $0x760] sm:$0xf0] }
 0x332   :  { %4435 = vmatpush.bf16.msrb.mxu0 %v6781_v3  ;;  %4448 = vmatpush.bf16.msrb.mxu1 %v7037_v18  ;;  %v8426_v3 = vld [vmem:[#allocation4 + $0x584] sm:$0xf] }
 0x333   :  { %4461 = vmatpush.bf16.msrb.mxu2 %v7293_v20  ;;  %4474 = vmatpush.bf16.msrb.mxu3 %v7549_v14  ;;  %v7390_v18 = vld [vmem:[#allocation4 + $0x5a0] sm:$0xf0] }
 0x334   :  { %v7393_v25 = vor.u32 %v8426_v3, %v7390_v18  ;;  %v8282_v20 = vld [vmem:[#allocation4 + $0x104] sm:$0xf] }
 0x335   :  { %v6814_v14 = vld [vmem:[#allocation4 + $0x120] sm:$0xf0] }
 0x336   :  { %4436 = vmatpush.bf16.msrb.mxu0 %v6749_v29  ;;  %4449 = vmatpush.bf16.msrb.mxu1 %v7005_v32  ;;  %v6817_v21 = vor.u32 %v8282_v20, %v6814_v14  ;;  %v8418_v29 = vld [vmem:[#allocation4 + $0x544] sm:$0xf] }
 0x337   :  { %4462 = vmatpush.bf16.msrb.mxu2 %v7261_v37  ;;  %4475 = vmatpush.bf16.msrb.mxu3 %v7517_v38  ;;  %v7358_v32 = vld [vmem:[#allocation4 + $0x560] sm:$0xf0]  ;;  %v7617_v38 = vor.u32 %v8482_v31, %v7614_v35  ;;  %v2855_v31 = vld [vmem:[%s9362_s12] sm:$0xf] }
 0x338   :  { %v7361_v33 = vor.u32 %v8418_v29, %v7358_v32  ;;  %v8274_v36 = vld [vmem:[#allocation4 + $0xc4] sm:$0xf] }
 0x339   :  { %v6782_v37 = vld [vmem:[#allocation4 + $0xe0] sm:$0xf0] }
 0x33a   :  { %4437 = vmatpush.bf16.msrb.mxu0 %v6717_v40  ;;  %4450 = vmatpush.bf16.msrb.mxu1 %v6973_v44  ;;  %v6785_v57 = vor.u32 %v8274_v36, %v6782_v37  ;;  %v8410_v40 = vld [vmem:[#allocation4 + $0x504] sm:$0xf]  ;;  %v2857_v36 = vperm.slane %v2855_v31, 0  ;;  %v2858_v37 = vperm.slane %v2855_v31, 1 }
 0x33b   :  { %4463 = vmatpush.bf16.msrb.mxu2 %v7229_v49  ;;  %4476 = vmatpush.bf16.msrb.mxu3 %v7485_v48  ;;  %v7326_v44 = vld [vmem:[#allocation4 + $0x520] sm:$0xf0] }
 0x33c   :  { %v7329_v45 = vor.u32 %v8410_v40, %v7326_v44  ;;  %v6750_v49 = vld [vmem:[#allocation4 + $0xa0] sm:$0xf0] }
 0x33d   :  { %v8330_v48 = vld [vmem:[#allocation4 + $0x284] sm:$0xf]  ;;  %v6753_v50 = vor.u32 %v8266_v53, %v6750_v49  ;;  %v2859_v49 = vperm.slane %v2855_v31, 2 }
 0x33e   :  { %4438 = vmatpush.bf16.msrb.mxu0 %v6685_v54  ;;  %4451 = vmatpush.bf16.msrb.mxu1 %v6941_v58  ;;  %v7009_v56 = vor.u32 %v8330_v48, %v7006_v55  ;;  %v8402_v54 = vld [vmem:[#allocation4 + $0x4c4] sm:$0xf]  ;;  %v2860_v48 = vperm.slane %v2855_v31, 3 }
 0x33f   :  { %4464 = vmatpush.bf16.msrb.mxu2 %v7197_v27  ;;  %4477 = vmatpush.bf16.msrb.mxu3 %v7453_v8  ;;  %v7294_v58 = vld [vmem:[#allocation4 + $0x4e0] sm:$0xf0] }
 0x340   :  { %v8258_v62 = vld [vmem:[#allocation4 + $0x44] sm:$0xf] }
 0x341   :  { %v8322_v2 = vld [vmem:[#allocation4 + $0x244] sm:$0xf] }
 0x342   :  { %4483 = vmatpush.bf16.msra.mxu0 %v6913_v22  ;;  %4496 = vmatpush.bf16.msra.mxu1 %v7169_v59  ;;  %v8466_v22 = vld [vmem:[#allocation4 + $0x6c4] sm:$0xf]  ;;  %v7297_v59 = vor.u32 %v8402_v54, %v7294_v58  ;;  %v8303_v54 = vld [vmem:[#allocation4 + $0x1a4] sm:$0xf0] }
 0x343   :  { %4509 = vmatpush.bf16.msra.mxu2 %v7425_v10  ;;  %4522 = vmatpush.bf16.msra.mxu3 %v7681_v0  ;;  %v7553_v61 = vor.u32 %v8466_v22, %v7550_v60  ;;  %v6974_v28 = vld [vmem:[#allocation4 + $0x260] sm:$0xf0]  ;;  %v6689_v0 = vor.u32 %v8250_v9, %v6686_v17  ;;  %v8503_v9 = vld [vmem:[#allocation4 + $0x7e4] sm:$0xf0] }
 0x344   :  { %v8394_v27 = vld [vmem:[#allocation4 + $0x484] sm:$0xf]  ;;  %v6852_v17 = vld [vmem:[#allocation4 + $0x148] sm:$0xf] }
 0x345   :  { %v7262_v12 = vld [vmem:[#allocation4 + $0x4a0] sm:$0xf0] }
 0x346   :  { %4484 = vmatpush.bf16.msra.mxu0 %v6881_v63  ;;  %4497 = vmatpush.bf16.msra.mxu1 %v7137_v5  ;;  %v6718_v63 = vld [vmem:[#allocation4 + $0x60] sm:$0xf0]  ;;  %v6977_v5 = vor.u32 %v8322_v2, %v6974_v28  ;;  %v7265_v6 = vor.u32 %v8394_v27, %v7262_v12  ;;  %v7428_v27 = vld [vmem:[#allocation4 + $0x5c8] sm:$0xf] }
 0x347   :  { %4510 = vmatpush.bf16.msra.mxu2 %v7393_v25  ;;  %4523 = vmatpush.bf16.msra.mxu3 %v7649_v4  ;;  %v6721_v1 = vor.u32 %v8258_v62, %v6718_v63  ;;  %v8458_v34 = vld [vmem:[#allocation4 + $0x684] sm:$0xf]  ;;  %v8367_v62 = vld [vmem:[#allocation4 + $0x3a4] sm:$0xf0] }
 0x348   :  { %v7518_v8 = vld [vmem:[#allocation4 + $0x6a0] sm:$0xf0]  ;;  %v8439_v12 = vld [vmem:[#allocation4 + $0x5e4] sm:$0xf0] }
 0x349   :  { %v7521_v41 = vor.u32 %v8458_v34, %v7518_v8  ;;  %v8314_v10 = vld [vmem:[#allocation4 + $0x204] sm:$0xf]  ;;  %v7684_v34 = vld [vmem:[#allocation4 + $0x7c8] sm:$0xf] }
 0x34a   :  { %4485 = vmatpush.bf16.msra.mxu0 %v6849_v26  ;;  %4498 = vmatpush.bf16.msra.mxu1 %v7105_v16  ;;  %v6942_v7 = vld [vmem:[#allocation4 + $0x220] sm:$0xf0] }
 0x34b   :  { %4511 = vmatpush.bf16.msra.mxu2 %v7361_v33  ;;  %4524 = vmatpush.bf16.msra.mxu3 %v7617_v38  ;;  %v6945_v11 = vor.u32 %v8314_v10, %v6942_v7  ;;  %v7230_v26 = vld [vmem:[#allocation4 + $0x460] sm:$0xf0]  ;;  %v8295_v10 = vld [vmem:[#allocation4 + $0x164] sm:$0xf0] }
 0x34c   :  { %v7233_v16 = vor.u32 %v8386_v13, %v7230_v26  ;;  %v7486_v3 = vld [vmem:[#allocation4 + $0x660] sm:$0xf0]  ;;  %v8359_v7 = vld [vmem:[#allocation4 + $0x364] sm:$0xf0]  ;;  %v7429_v26 = vor.u32 %v8439_v12, %v7428_v27 }
 0x34d   :  { %v7489_v18 = vor.u32 %v8450_v46, %v7486_v3  ;;  %v7198_v25 = vld [vmem:[#allocation4 + $0x420] sm:$0xf0]  ;;  %v7685_v46 = vor.u32 %v8503_v9, %v7684_v34  ;;  %v7396_v3 = vld [vmem:[#allocation4 + $0x588] sm:$0xf] }
 0x34e   :  { %4486 = vmatpush.bf16.msra.mxu0 %v6817_v21  ;;  %4499 = vmatpush.bf16.msra.mxu1 %v7073_v24  ;;  %v7201_v19 = vor.u32 %v8378_v51, %v7198_v25  ;;  %v8442_v4 = vld [vmem:[#allocation4 + $0x604] sm:$0xf]  ;;  %v8263_v27 = vld [vmem:[#allocation4 + $0x64] sm:$0xf0] }
 0x34f   :  { %4512 = vmatpush.bf16.msra.mxu2 %v7329_v45  ;;  %4525 = vmatpush.bf16.msra.mxu3 %v7585_v47  ;;  %v7454_v20 = vld [vmem:[#allocation4 + $0x620] sm:$0xf0]  ;;  %v7172_v45 = vld [vmem:[#allocation4 + $0x3c8] sm:$0xf] }
 0x350   :  { %v7457_v14 = vor.u32 %v8442_v4, %v7454_v20  ;;  %v7173_v55 = vor.u32 %v8375_v42, %v7172_v45  ;;  %v7652_v4 = vld [vmem:[#allocation4 + $0x788] sm:$0xf] }
 0x351   :  { %v8495_v20 = vld [vmem:[#allocation4 + $0x7a4] sm:$0xf0] }
 0x352   :  { %4487 = vmatpush.bf16.msra.mxu0 %v6785_v57  ;;  %4500 = vmatpush.bf16.msra.mxu1 %v7041_v39  ;;  %v6916_v39 = vld [vmem:[#allocation4 + $0x1c8] sm:$0xf]  ;;  %v7653_v31 = vor.u32 %v8495_v20, %v7652_v4  ;;  %v8371_v4 = vld [vmem:[#allocation4 + $0x3cc] sm:$0xf] }
 0x353   :  { %4513 = vmatpush.bf16.msra.mxu2 %v7297_v59  ;;  %4526 = vmatpush.bf16.msra.mxu3 %v7553_v61  ;;  %v7140_v61 = vld [vmem:[#allocation4 + $0x388] sm:$0xf]  ;;  %v7174_v20 = vld [vmem:[#allocation4 + $0x3e8] sm:$0xf0] }
 0x354   :  { %v7332_v45 = vld [vmem:[#allocation4 + $0x508] sm:$0xf] }
 0x355   :  { %v8415_v42 = vld [vmem:[#allocation4 + $0x524] sm:$0xf0] }
 0x356   :  { %4488 = vmatpush.bf16.msra.mxu0 %v6753_v50  ;;  %4501 = vmatpush.bf16.msra.mxu1 %v7009_v56  ;;  %v6917_v50 = vor.u32 %v8311_v43, %v6916_v39  ;;  %v6884_v56 = vld [vmem:[#allocation4 + $0x188] sm:$0xf] }
 0x357   :  { %4514 = vmatpush.bf16.msra.mxu2 %v7265_v6  ;;  %4527 = vmatpush.bf16.msra.mxu3 %v7521_v41  ;;  %v7141_v41 = vor.u32 %v8367_v62, %v7140_v61  ;;  %v7044_v39 = vld [vmem:[#allocation4 + $0x2c8] sm:$0xf] }
 0x358   :  { %v7300_v61 = vld [vmem:[#allocation4 + $0x4c8] sm:$0xf] }
 0x359   :  { %v8407_v62 = vld [vmem:[#allocation4 + $0x4e4] sm:$0xf0] }
 0x35a   :  { %4489 = vmatpush.bf16.msra.mxu0 %v6721_v1  ;;  %4502 = vmatpush.bf16.msra.mxu1 %v6977_v5  ;;  %v6885_v5 = vor.u32 %v8303_v54, %v6884_v56  ;;  %v7012_v56 = vld [vmem:[#allocation4 + $0x288] sm:$0xf] }
 0x35b   :  { %4515 = vmatpush.bf16.msra.mxu2 %v7233_v16  ;;  %4528 = vmatpush.bf16.msra.mxu3 %v7489_v18  ;;  %v6853_v16 = vor.u32 %v8295_v10, %v6852_v17  ;;  %v8431_v18 = vld [vmem:[#allocation4 + $0x5a4] sm:$0xf0] }
 0x35c   :  { %v8335_v54 = vld [vmem:[#allocation4 + $0x2a4] sm:$0xf0] }
 0x35d   :  { %v6980_v12 = vld [vmem:[#allocation4 + $0x248] sm:$0xf] }
 0x35e   :  { %4490 = vmatpush.bf16.msra.mxu0 %v6689_v0  ;;  %4503 = vmatpush.bf16.msra.mxu1 %v6945_v11  ;;  %v7108_v0 = vld [vmem:[#allocation4 + $0x348] sm:$0xf] }
 0x35f   :  { %4516 = vmatpush.bf16.msra.mxu2 %v7201_v19  ;;  %4529 = vmatpush.bf16.msra.mxu3 %v7457_v14  ;;  %v7109_v19 = vor.u32 %v8359_v7, %v7108_v0  ;;  %v6820_v14 = vld [vmem:[#allocation4 + $0x108] sm:$0xf] }
 0x360   :  { %v8327_v34 = vld [vmem:[#allocation4 + $0x264] sm:$0xf0] }
 0x361   :  { %v8399_v9 = vld [vmem:[#allocation4 + $0x4a4] sm:$0xf0]  ;;  %v6981_v7 = vor.u32 %v8327_v34, %v6980_v12  ;;  %v8347_v12 = vld [vmem:[#allocation4 + $0x30c] sm:$0xf] }
 0x362   :  { %v7524_v17 = vld [vmem:[#allocation4 + $0x688] sm:$0xf]  ;;  %v7078_v34 = vld [vmem:[#allocation4 + $0x328] sm:$0xf0] }
 0x363   :  { %v8463_v10 = vld [vmem:[#allocation4 + $0x6a4] sm:$0xf0] }
 0x39d   :  { %v2746_v52 = vpop.f32.mrf.mxu0  ;;  %v2759_v21 = vpop.f32.mrf.mxu1 }
 0x3a4   :  { %v2772_v23 = vpop.f32.mrf.mxu2  ;;  %v2785_v24 = vpop.f32.mrf.mxu3 }
 0x3a5   :  { %v2748_v29 = vpop.f32.mrf.mxu0  ;;  %v2761_v32 = vpop.f32.mrf.mxu1 }
 0x3a6   :  { %v8351_v29 = vld [vmem:[#allocation4 + $0x324] sm:$0xf0]  ;;  %v7397_v32 = vor.u32 %v8431_v18, %v7396_v3  ;;  %v6918_v3 = vld [vmem:[#allocation4 + $0x1e8] sm:$0xf0] }
 0x3ac   :  { %v2774_v33 = vpop.f32.mrf.mxu2  ;;  %v2787_v35 = vpop.f32.mrf.mxu3 }
 0x3ad   :  { %v2812_v38 = vpop.f32.mrf.mxu0  ;;  %v2825_v57 = vpop.f32.mrf.mxu1  ;;  %v7364_v33 = vld [vmem:[#allocation4 + $0x548] sm:$0xf] }
 0x3ae   :  { %v2813_v15 = vadd.f32 %v2812_v38, %v2746_v52  ;;  %v2826_v30 = vadd.f32 %v2825_v57, %v2759_v21  ;;  %v7620_v38 = vld [vmem:[#allocation4 + $0x748] sm:$0xf] }
 0x3af   :  { %v8487_v57 = vld [vmem:[#allocation4 + $0x764] sm:$0xf0] }
 0x3b0   :  { %v2865_v40 = vadd.f32 %v2857_v36, %v2813_v15  ;;  %v2866_v44 = vadd.f32 %v2858_v37, %v2826_v30  ;;  %v8423_v37 = vld [vmem:[#allocation4 + $0x564] sm:$0xf0]  ;;  %v7621_v43 = vor.u32 %v8487_v57, %v7620_v38  ;;  %v7142_v57 = vld [vmem:[#allocation4 + $0x3a8] sm:$0xf0] }
 0x3b1   :  { %v6788_v15 = vld [vmem:[#allocation4 + $0xc8] sm:$0xf] }
 0x3b2   :  { %v2869_v47 = vmax.f32 %v2865_v40, 0.0  ;;  %v2870_v53 = vmax.f32 %v2866_v44, 0.0  ;;  %v8279_v30 = vld [vmem:[#allocation4 + $0xe4] sm:$0xf0]  ;;  %v7365_v44 = vor.u32 %v8423_v37, %v7364_v33  ;;  %v8299_v33 = vld [vmem:[#allocation4 + $0x18c] sm:$0xf] }
 0x3b3   :  { %v8343_v40 = vld [vmem:[#allocation4 + $0x2e4] sm:$0xf0] }
 0x3b4   :  { %v9071_v58 = vpack.c.bf16 %v2869_v47, %v2869_v47  ;;  %v9073_v22 = vpack.c.bf16 %v2870_v53, %v2870_v53  ;;  %v2838_v59 = vpop.f32.mrf.mxu2  ;;  %v2851_v60 = vpop.f32.mrf.mxu3  ;;  %v7588_v47 = vld [vmem:[#allocation4 + $0x708] sm:$0xf] }
 0x3b5   :  { %v2839_v63 = vadd.f32 %v2838_v59, %v2772_v23  ;;  %v2852_v1 = vadd.f32 %v2851_v60, %v2785_v24  ;;  %v2814_v2 = vpop.f32.mrf.mxu0  ;;  %v2827_v28 = vpop.f32.mrf.mxu1  ;;  %v8287_v23 = vld [vmem:[#allocation4 + $0x124] sm:$0xf0]  ;;  %v7333_v59 = vor.u32 %v8415_v42, %v7332_v45  ;;  %v8499_v45 = vld [vmem:[#allocation4 + $0x7cc] sm:$0xf] }
 0x3b6   :  { %4439 = vmatmul.bf16.vlgmr.msrb.gmra.mxu0 %v9071_v58  ;;  %4452 = vmatmul.bf16.vlgmr.msrb.gmra.mxu1 %v9073_v22  ;;  %v7076_v24 = vld [vmem:[#allocation4 + $0x308] sm:$0xf]  ;;  %v6821_v35 = vor.u32 %v8287_v23, %v6820_v14  ;;  %v7013_v28 = vor.u32 %v8335_v54, %v7012_v56  ;;  %v7686_v42 = vld [vmem:[#allocation4 + $0x7e8] sm:$0xf0] }
 0x3b7   :  { %v2867_v6 = vadd.f32 %v2859_v49, %v2839_v63  ;;  %v2868_v8 = vadd.f32 %v2860_v48, %v2852_v1  ;;  %4535 = vmatpush.bf16.msrb.mxu0 %v6917_v50  ;;  %4548 = vmatpush.bf16.msrb.mxu1 %v7173_v55  ;;  %v7077_v36 = vor.u32 %v8351_v29, %v7076_v24  ;;  %v8479_v53 = vld [vmem:[#allocation4 + $0x724] sm:$0xf0]  ;;  %v8355_v56 = vld [vmem:[#allocation4 + $0x34c] sm:$0xf] }
 0x3b8   :  { %v6789_v49 = vor.u32 %v8279_v30, %v6788_v15  ;;  %v7045_v48 = vor.u32 %v8343_v40, %v7044_v39  ;;  %v6756_v50 = vld [vmem:[#allocation4 + $0x88] sm:$0xf]  ;;  %v7589_v60 = vor.u32 %v8479_v53, %v7588_v47  ;;  %v7110_v54 = vld [vmem:[#allocation4 + $0x368] sm:$0xf0] }
 0x3b9   :  { %v2871_v11 = vmax.f32 %v2867_v6, 0.0  ;;  %v2872_v13 = vmax.f32 %v2868_v8, 0.0  ;;  %v8271_v55 = vld [vmem:[#allocation4 + $0xa4] sm:$0xf0]  ;;  %v7301_v6 = vor.u32 %v8407_v62, %v7300_v61  ;;  %v8427_v61 = vld [vmem:[#allocation4 + $0x58c] sm:$0xf] }
 0x3ba   :  { %v7556_v63 = vld [vmem:[#allocation4 + $0x6c8] sm:$0xf]  ;;  %v6757_v2 = vor.u32 %v8271_v55, %v6756_v50  ;;  %v6854_v55 = vld [vmem:[#allocation4 + $0x168] sm:$0xf0] }
 0x3bb   :  { %v9077_v51 = vpack.c.bf16 %v2871_v11, %v2871_v11  ;;  %v9079_v25 = vpack.c.bf16 %v2872_v13, %v2872_v13  ;;  %4536 = vmatpush.bf16.msrb.mxu0 %v6885_v5  ;;  %4549 = vmatpush.bf16.msrb.mxu1 %v7141_v41  ;;  %v8471_v1 = vld [vmem:[#allocation4 + $0x6e4] sm:$0xf0]  ;;  %v7398_v62 = vld [vmem:[#allocation4 + $0x5a8] sm:$0xf0] }
 0x3bc   :  { %v2840_v52 = vpop.f32.mrf.mxu2  ;;  %v2853_v21 = vpop.f32.mrf.mxu3  ;;  %v6724_v5 = vld [vmem:[#allocation4 + $0x48] sm:$0xf]  ;;  %v7557_v8 = vor.u32 %v8471_v1, %v7556_v63  ;;  %v8491_v63 = vld [vmem:[#allocation4 + $0x78c] sm:$0xf] }
 0x3bd   :  { %4465 = vmatmul.bf16.vlgmr.msrb.gmra.mxu2 %v9077_v51  ;;  %4478 = vmatmul.bf16.vlgmr.msrb.gmra.mxu3 %v9079_v25  ;;  %v7268_v41 = vld [vmem:[#allocation4 + $0x488] sm:$0xf]  ;;  %v6725_v0 = vor.u32 %v8263_v27, %v6724_v5  ;;  %v7654_v1 = vld [vmem:[#allocation4 + $0x7a8] sm:$0xf0] }
 0x3be   :  { %4561 = vmatpush.bf16.msrb.mxu2 %v7429_v26  ;;  %4574 = vmatpush.bf16.msrb.mxu3 %v7685_v46  ;;  %v6692_v11 = vld [vmem:[#allocation4 + $0x8] sm:$0xf]  ;;  %v7269_v18 = vor.u32 %v8399_v9, %v7268_v41  ;;  %v8283_v5 = vld [vmem:[#allocation4 + $0x10c] sm:$0xf] }
 0x3bf   :  { %4537 = vmatpush.bf16.msrb.mxu0 %v6853_v16  ;;  %4550 = vmatpush.bf16.msrb.mxu1 %v7109_v19  ;;  %v8255_v13 = vld [vmem:[#allocation4 + $0x24] sm:$0xf0]  ;;  %v8307_v16 = vld [vmem:[#allocation4 + $0x1cc] sm:$0xf]  ;;  %v7525_v19 = vor.u32 %v8463_v10, %v7524_v17 }
 0x3c0   :  { %v6948_v26 = vld [vmem:[#allocation4 + $0x208] sm:$0xf]  ;;  %v6693_v24 = vor.u32 %v8255_v13, %v6692_v11  ;;  %v6822_v27 = vld [vmem:[#allocation4 + $0x128] sm:$0xf0] }
 0x3c1   :  { %v8319_v46 = vld [vmem:[#allocation4 + $0x224] sm:$0xf0]  ;;  %v8419_v41 = vld [vmem:[#allocation4 + $0x54c] sm:$0xf] }
 0x3c2   :  { %4562 = vmatpush.bf16.msrb.mxu2 %v7397_v32  ;;  %4575 = vmatpush.bf16.msrb.mxu3 %v7653_v31  ;;  %v7236_v14 = vld [vmem:[#allocation4 + $0x448] sm:$0xf]  ;;  %v6949_v29 = vor.u32 %v8319_v46, %v6948_v26  ;;  %v6921_v32 = vor.u32 %v8307_v16, %v6918_v3  ;;  %v7177_v31 = vor.u32 %v8371_v4, %v7174_v20  ;;  %v7366_v9 = vld [vmem:[#allocation4 + $0x568] sm:$0xf0] }
 0x3c3   :  { %4538 = vmatpush.bf16.msrb.mxu0 %v6821_v35  ;;  %4551 = vmatpush.bf16.msrb.mxu1 %v7077_v36  ;;  %v8391_v52 = vld [vmem:[#allocation4 + $0x464] sm:$0xf0]  ;;  %v6886_v35 = vld [vmem:[#allocation4 + $0x1a8] sm:$0xf0]  ;;  %v7369_v16 = vor.u32 %v8419_v41, %v7366_v9  ;;  %v6892_v41 = vld [vmem:[#allocation4 + $0x190] sm:$0xf] }
 0x3c4   :  { %v7492_v21 = vld [vmem:[#allocation4 + $0x648] sm:$0xf]  ;;  %v8363_v36 = vld [vmem:[#allocation4 + $0x38c] sm:$0xf]  ;;  %v7237_v37 = vor.u32 %v8391_v52, %v7236_v14  ;;  %v6889_v47 = vor.u32 %v8299_v33, %v6886_v35  ;;  %v8304_v9 = vld [vmem:[#allocation4 + $0x1ac] sm:$0xf0] }
 0x3c5   :  { %v8455_v23 = vld [vmem:[#allocation4 + $0x664] sm:$0xf0]  ;;  %v7145_v53 = vor.u32 %v8363_v36, %v7142_v57  ;;  %v8483_v17 = vld [vmem:[#allocation4 + $0x74c] sm:$0xf] }
 0x3c6   :  { %4563 = vmatpush.bf16.msrb.mxu2 %v7365_v44  ;;  %4576 = vmatpush.bf16.msrb.mxu3 %v7621_v43  ;;  %v7493_v38 = vor.u32 %v8455_v23, %v7492_v21  ;;  %v7204_v15 = vld [vmem:[#allocation4 + $0x408] sm:$0xf]  ;;  %v8435_v44 = vld [vmem:[#allocation4 + $0x5cc] sm:$0xf] }
 0x3c7   :  { %4491 = vmatmul.bf16.vlgmr.msra.gmra.mxu0 %v9071_v58  ;;  %4504 = vmatmul.bf16.vlgmr.msra.gmra.mxu1 %v9073_v22  ;;  %v8383_v30 = vld [vmem:[#allocation4 + $0x424] sm:$0xf0]  ;;  %v7430_v43 = vld [vmem:[#allocation4 + $0x5e8] sm:$0xf0] }
 0x3c8   :  { %4539 = vmatpush.bf16.msrb.mxu0 %v6789_v49  ;;  %4552 = vmatpush.bf16.msrb.mxu1 %v7045_v48  ;;  %v7460_v39 = vld [vmem:[#allocation4 + $0x608] sm:$0xf]  ;;  %v8291_v49 = vld [vmem:[#allocation4 + $0x14c] sm:$0xf]  ;;  %v7205_v48 = vor.u32 %v8383_v30, %v7204_v15 }
 0x3c9   :  { %v8447_v40 = vld [vmem:[#allocation4 + $0x624] sm:$0xf0]  ;;  %v7622_v10 = vld [vmem:[#allocation4 + $0x768] sm:$0xf0] }
 0x3ca   :  { %4564 = vmatpush.bf16.msrb.mxu2 %v7333_v59  ;;  %4577 = vmatpush.bf16.msrb.mxu3 %v7589_v60  ;;  %v7461_v50 = vor.u32 %v8447_v40, %v7460_v39  ;;  %v7433_v59 = vor.u32 %v8435_v44, %v7430_v43  ;;  %v7689_v60 = vor.u32 %v8499_v45, %v7686_v42  ;;  %v8275_v11 = vld [vmem:[#allocation4 + $0xcc] sm:$0xf] }
 0x3cb   :  { %v6790_v13 = vld [vmem:[#allocation4 + $0xe8] sm:$0xf0]  ;;  %v7625_v3 = vor.u32 %v8483_v17, %v7622_v10  ;;  %v7148_v17 = vld [vmem:[#allocation4 + $0x390] sm:$0xf] }
 0x3cc   :  { %4540 = vmatpush.bf16.msrb.mxu0 %v6757_v2  ;;  %4553 = vmatpush.bf16.msrb.mxu1 %v7013_v28  ;;  %v6857_v2 = vor.u32 %v8291_v49, %v6854_v55  ;;  %v7113_v28 = vor.u32 %v8355_v56, %v7110_v54  ;;  %v8339_v26 = vld [vmem:[#allocation4 + $0x2cc] sm:$0xf]  ;;  %v6793_v14 = vor.u32 %v8275_v11, %v6790_v13 }
 0x3cd   :  { %4517 = vmatmul.bf16.vlgmr.msra.gmra.mxu2 %v9077_v51  ;;  %4530 = vmatmul.bf16.vlgmr.msra.gmra.mxu3 %v9079_v25  ;;  %v7046_v46 = vld [vmem:[#allocation4 + $0x2e8] sm:$0xf0] }
 0x3ce   :  { %4565 = vmatpush.bf16.msrb.mxu2 %v7301_v6  ;;  %4578 = vmatpush.bf16.msrb.mxu3 %v7557_v8  ;;  %v7401_v6 = vor.u32 %v8427_v61, %v7398_v62  ;;  %v7657_v8 = vor.u32 %v8491_v63, %v7654_v1  ;;  %v8475_v4 = vld [vmem:[#allocation4 + $0x70c] sm:$0xf]  ;;  %v7049_v52 = vor.u32 %v8339_v26, %v7046_v46  ;;  %v7180_v63 = vld [vmem:[#allocation4 + $0x3d0] sm:$0xf] }
 0x3cf   :  { %v7590_v20 = vld [vmem:[#allocation4 + $0x728] sm:$0xf0]  ;;  %v8376_v1 = vld [vmem:[#allocation4 + $0x3ec] sm:$0xf0] }
 0x3d0   :  { %4541 = vmatpush.bf16.msrb.mxu0 %v6725_v0  ;;  %4554 = vmatpush.bf16.msrb.mxu1 %v6981_v7  ;;  %v6825_v0 = vor.u32 %v8283_v5, %v6822_v27  ;;  %v7081_v7 = vor.u32 %v8347_v12, %v7078_v34  ;;  %v8267_v21 = vld [vmem:[#allocation4 + $0x8c] sm:$0xf] }
 0x3d1   :  { %v6758_v23 = vld [vmem:[#allocation4 + $0xa8] sm:$0xf0] }
 0x3d2   :  { %4566 = vmatpush.bf16.msrb.mxu2 %v7269_v18  ;;  %4579 = vmatpush.bf16.msrb.mxu3 %v7525_v19  ;;  %v8411_v18 = vld [vmem:[#allocation4 + $0x50c] sm:$0xf] }
 0x3d3   :  { %v7334_v19 = vld [vmem:[#allocation4 + $0x528] sm:$0xf0] }
 0x3d4   :  { %4542 = vmatpush.bf16.msrb.mxu0 %v6693_v24  ;;  %4555 = vmatpush.bf16.msrb.mxu1 %v6949_v29  ;;  %v8331_v24 = vld [vmem:[#allocation4 + $0x28c] sm:$0xf] }
 0x3d5   :  { %v7014_v29 = vld [vmem:[#allocation4 + $0x2a8] sm:$0xf0] }
 0x3d6   :  { %4567 = vmatpush.bf16.msrb.mxu2 %v7237_v37  ;;  %4580 = vmatpush.bf16.msrb.mxu3 %v7493_v38  ;;  %v8403_v33 = vld [vmem:[#allocation4 + $0x4cc] sm:$0xf]  ;;  %v6761_v38 = vor.u32 %v8267_v21, %v6758_v23  ;;  %v7017_v57 = vor.u32 %v8331_v24, %v7014_v29  ;;  %v6860_v21 = vld [vmem:[#allocation4 + $0x150] sm:$0xf] }
 0x3d7   :  { %4543 = vmatmul.bf16.vlgmr.msrb.gmra.mxu0 %v9071_v58  ;;  %4556 = vmatmul.bf16.vlgmr.msrb.gmra.mxu1 %v9073_v22  ;;  %v7302_v35 = vld [vmem:[#allocation4 + $0x4e8] sm:$0xf0]  ;;  %v8296_v23 = vld [vmem:[#allocation4 + $0x16c] sm:$0xf0] }
 0x3d8   :  { %4587 = vmatpush.bf16.msra.mxu0 %v6921_v32  ;;  %4600 = vmatpush.bf16.msra.mxu1 %v7177_v31  ;;  %v7337_v32 = vor.u32 %v8411_v18, %v7334_v19  ;;  %v7593_v31 = vor.u32 %v8475_v4, %v7590_v20  ;;  %v8467_v36 = vld [vmem:[#allocation4 + $0x6cc] sm:$0xf]  ;;  %v7305_v44 = vor.u32 %v8403_v33, %v7302_v35  ;;  %v7692_v18 = vld [vmem:[#allocation4 + $0x7d0] sm:$0xf] }
 0x3d9   :  { %v7558_v37 = vld [vmem:[#allocation4 + $0x6e8] sm:$0xf0]  ;;  %v8504_v19 = vld [vmem:[#allocation4 + $0x7ec] sm:$0xf0]  ;;  %v6893_v4 = vor.u32 %v8304_v9, %v6892_v41 }
 0x3da   :  { %4568 = vmatpush.bf16.msrb.mxu2 %v7205_v48  ;;  %4581 = vmatpush.bf16.msrb.mxu3 %v7461_v50  ;;  %v8259_v15 = vld [vmem:[#allocation4 + $0x4c] sm:$0xf]  ;;  %v7561_v43 = vor.u32 %v8467_v36, %v7558_v37  ;;  %v7693_v29 = vor.u32 %v8504_v19, %v7692_v18  ;;  %v7404_v33 = vld [vmem:[#allocation4 + $0x590] sm:$0xf] }
 0x3db   :  { %v6726_v30 = vld [vmem:[#allocation4 + $0x68] sm:$0xf0]  ;;  %v8432_v35 = vld [vmem:[#allocation4 + $0x5ac] sm:$0xf0] }
 0x3dc   :  { %4588 = vmatpush.bf16.msra.mxu0 %v6889_v47  ;;  %4601 = vmatpush.bf16.msra.mxu1 %v7145_v53  ;;  %v8323_v39 = vld [vmem:[#allocation4 + $0x24c] sm:$0xf]  ;;  %v6729_v49 = vor.u32 %v8259_v15, %v6726_v30  ;;  %v7660_v36 = vld [vmem:[#allocation4 + $0x790] sm:$0xf] }
 0x3dd   :  { %4569 = vmatmul.bf16.vlgmr.msrb.gmra.mxu2 %v9077_v51  ;;  %4582 = vmatmul.bf16.vlgmr.msrb.gmra.mxu3 %v9079_v25  ;;  %v6982_v40 = vld [vmem:[#allocation4 + $0x268] sm:$0xf0]  ;;  %v8496_v37 = vld [vmem:[#allocation4 + $0x7ac] sm:$0xf0] }
 0x3de   :  { %4613 = vmatpush.bf16.msra.mxu2 %v7433_v59  ;;  %4626 = vmatpush.bf16.msra.mxu3 %v7689_v60  ;;  %v8395_v45 = vld [vmem:[#allocation4 + $0x48c] sm:$0xf]  ;;  %v6985_v48 = vor.u32 %v8323_v39, %v6982_v40  ;;  %v6924_v59 = vld [vmem:[#allocation4 + $0x1d0] sm:$0xf]  ;;  %v7405_v39 = vor.u32 %v8432_v35, %v7404_v33  ;;  %v7661_v40 = vor.u32 %v8496_v37, %v7660_v36  ;;  %v8308_v33 = vld [vmem:[#allocation4 + $0x1d4] sm:$0xf] }
 0x3df   :  { %v7270_v42 = vld [vmem:[#allocation4 + $0x4a8] sm:$0xf0]  ;;  %v8312_v60 = vld [vmem:[#allocation4 + $0x1ec] sm:$0xf0]  ;;  %v6926_v35 = vld [vmem:[#allocation4 + $0x1f0] sm:$0xf0] }
 0x3e0   :  { %4589 = vmatpush.bf16.msra.mxu0 %v6857_v2  ;;  %4602 = vmatpush.bf16.msra.mxu1 %v7113_v28  ;;  %v8459_v47 = vld [vmem:[#allocation4 + $0x68c] sm:$0xf]  ;;  %v7273_v61 = vor.u32 %v8395_v45, %v7270_v42  ;;  %v6828_v15 = vld [vmem:[#allocation4 + $0x110] sm:$0xf]  ;;  %v8372_v36 = vld [vmem:[#allocation4 + $0x3d4] sm:$0xf] }
 0x3e1   :  { %v7526_v53 = vld [vmem:[#allocation4 + $0x6a8] sm:$0xf0]  ;;  %v8288_v30 = vld [vmem:[#allocation4 + $0x12c] sm:$0xf0]  ;;  %v7182_v37 = vld [vmem:[#allocation4 + $0x3f0] sm:$0xf0] }
 0x3e2   :  { %4614 = vmatpush.bf16.msra.mxu2 %v7401_v6  ;;  %4627 = vmatpush.bf16.msra.mxu3 %v7657_v8  ;;  %v8251_v50 = vld [vmem:[#allocation4 + $0xc] sm:$0xf]  ;;  %v7529_v62 = vor.u32 %v8459_v47, %v7526_v53  ;;  %v6925_v6 = vor.u32 %v8312_v60, %v6924_v59  ;;  %v7181_v8 = vor.u32 %v8376_v1, %v7180_v63  ;;  %v7372_v45 = vld [vmem:[#allocation4 + $0x550] sm:$0xf] }
 0x3e3   :  { %v6694_v55 = vld [vmem:[#allocation4 + $0x28] sm:$0xf0]  ;;  %v8424_v42 = vld [vmem:[#allocation4 + $0x56c] sm:$0xf0] }
 0x3e4   :  { %4590 = vmatpush.bf16.msra.mxu0 %v6825_v0  ;;  %4603 = vmatpush.bf16.msra.mxu1 %v7081_v7  ;;  %v8315_v56 = vld [vmem:[#allocation4 + $0x20c] sm:$0xf]  ;;  %v6697_v12 = vor.u32 %v8251_v50, %v6694_v55  ;;  %v8368_v7 = vld [vmem:[#allocation4 + $0x3ac] sm:$0xf0] }
 0x3e5   :  { %v6950_v54 = vld [vmem:[#allocation4 + $0x228] sm:$0xf0]  ;;  %v7149_v20 = vor.u32 %v8368_v7, %v7148_v17  ;;  %v7628_v47 = vld [vmem:[#allocation4 + $0x750] sm:$0xf] }
 0x3e6   :  { %4615 = vmatpush.bf16.msra.mxu2 %v7369_v16  ;;  %4628 = vmatpush.bf16.msra.mxu3 %v7625_v3  ;;  %v8387_v2 = vld [vmem:[#allocation4 + $0x44c] sm:$0xf]  ;;  %v6953_v34 = vor.u32 %v8315_v56, %v6950_v54  ;;  %v7436_v16 = vld [vmem:[#allocation4 + $0x5d0] sm:$0xf]  ;;  %v7373_v56 = vor.u32 %v8424_v42, %v7372_v45  ;;  %v8300_v45 = vld [vmem:[#allocation4 + $0x194] sm:$0xf] }
 0x3e7   :  { %v7238_v28 = vld [vmem:[#allocation4 + $0x468] sm:$0xf0]  ;;  %v8440_v3 = vld [vmem:[#allocation4 + $0x5ec] sm:$0xf0]  ;;  %v6894_v42 = vld [vmem:[#allocation4 + $0x1b0] sm:$0xf0] }
 0x3e8   :  { %4591 = vmatpush.bf16.msra.mxu0 %v6793_v14  ;;  %4604 = vmatpush.bf16.msra.mxu1 %v7049_v52  ;;  %v8451_v5 = vld [vmem:[#allocation4 + $0x64c] sm:$0xf]  ;;  %v7241_v10 = vor.u32 %v8387_v2, %v7238_v28  ;;  %v7437_v24 = vor.u32 %v8440_v3, %v7436_v16  ;;  %v8488_v53 = vld [vmem:[#allocation4 + $0x76c] sm:$0xf0] }
 0x3e9   :  { %v7494_v27 = vld [vmem:[#allocation4 + $0x668] sm:$0xf0]  ;;  %v6796_v50 = vld [vmem:[#allocation4 + $0xd0] sm:$0xf]  ;;  %v7629_v54 = vor.u32 %v8488_v53, %v7628_v47  ;;  %v8364_v47 = vld [vmem:[#allocation4 + $0x394] sm:$0xf] }
 0x3ea   :  { %4616 = vmatpush.bf16.msra.mxu2 %v7337_v32  ;;  %4629 = vmatpush.bf16.msra.mxu3 %v7593_v31  ;;  %v7497_v0 = vor.u32 %v8451_v5, %v7494_v27  ;;  %v8379_v11 = vld [vmem:[#allocation4 + $0x40c] sm:$0xf]  ;;  %v7116_v32 = vld [vmem:[#allocation4 + $0x350] sm:$0xf] }
 0x3eb   :  { %v7206_v13 = vld [vmem:[#allocation4 + $0x428] sm:$0xf0]  ;;  %v8360_v31 = vld [vmem:[#allocation4 + $0x36c] sm:$0xf0] }
 0x3ec   :  { %4592 = vmatpush.bf16.msra.mxu0 %v6761_v38  ;;  %4605 = vmatpush.bf16.msra.mxu1 %v7017_v57  ;;  %v8443_v26 = vld [vmem:[#allocation4 + $0x60c] sm:$0xf]  ;;  %v7209_v14 = vor.u32 %v8379_v11, %v7206_v13  ;;  %v6861_v38 = vor.u32 %v8296_v23, %v6860_v21  ;;  %v7117_v57 = vor.u32 %v8360_v31, %v7116_v32  ;;  %v8280_v55 = vld [vmem:[#allocation4 + $0xec] sm:$0xf0] }
 0x3ed   :  { %v7462_v46 = vld [vmem:[#allocation4 + $0x628] sm:$0xf0]  ;;  %v7052_v59 = vld [vmem:[#allocation4 + $0x2d0] sm:$0xf]  ;;  %v6797_v2 = vor.u32 %v8280_v55, %v6796_v50 }
 0x3ee   :  { %4617 = vmatpush.bf16.msra.mxu2 %v7305_v44  ;;  %4630 = vmatpush.bf16.msra.mxu3 %v7561_v43  ;;  %v7465_v52 = vor.u32 %v8443_v26, %v7462_v46  ;;  %v7084_v44 = vld [vmem:[#allocation4 + $0x310] sm:$0xf] }
 0x3ef   :  { %v8352_v43 = vld [vmem:[#allocation4 + $0x32c] sm:$0xf0] }
 0x3f0   :  { %4593 = vmatpush.bf16.msra.mxu0 %v6729_v49  ;;  %4606 = vmatpush.bf16.msra.mxu1 %v6985_v48  ;;  %v6829_v49 = vor.u32 %v8288_v30, %v6828_v15  ;;  %v7085_v48 = vor.u32 %v8352_v43, %v7084_v44  ;;  %v8344_v60 = vld [vmem:[#allocation4 + $0x2ec] sm:$0xf0]  ;;  %v6929_v44 = vor.u32 %v8308_v33, %v6926_v35  ;;  %v8412_v33 = vld [vmem:[#allocation4 + $0x514] sm:$0xf] }
 0x3f1   :  { %v7596_v63 = vld [vmem:[#allocation4 + $0x710] sm:$0xf]  ;;  %v7053_v28 = vor.u32 %v8344_v60, %v7052_v59  ;;  %v7185_v43 = vor.u32 %v8372_v36, %v7182_v37  ;;  %v8436_v59 = vld [vmem:[#allocation4 + $0x5d4] sm:$0xf] }
 0x3f2   :  { %4618 = vmatpush.bf16.msra.mxu2 %v7273_v61  ;;  %4631 = vmatpush.bf16.msra.mxu3 %v7529_v62  ;;  %v7340_v61 = vld [vmem:[#allocation4 + $0x510] sm:$0xf]  ;;  %v7438_v60 = vld [vmem:[#allocation4 + $0x5f0] sm:$0xf0] }
 0x3f3   :  { %v8416_v62 = vld [vmem:[#allocation4 + $0x52c] sm:$0xf0]  ;;  %v7342_v35 = vld [vmem:[#allocation4 + $0x530] sm:$0xf0] }
 0x3f4   :  { %4594 = vmatpush.bf16.msra.mxu0 %v6697_v12  ;;  %4607 = vmatpush.bf16.msra.mxu1 %v6953_v34  ;;  %v8480_v1 = vld [vmem:[#allocation4 + $0x72c] sm:$0xf0]  ;;  %v7341_v12 = vor.u32 %v8416_v62, %v7340_v61  ;;  %v8500_v61 = vld [vmem:[#allocation4 + $0x7d4] sm:$0xf] }
 0x3f5   :  { %v6764_v5 = vld [vmem:[#allocation4 + $0x90] sm:$0xf]  ;;  %v7597_v34 = vor.u32 %v8480_v1, %v7596_v63  ;;  %v7694_v62 = vld [vmem:[#allocation4 + $0x7f0] sm:$0xf0]  ;;  %v6897_v63 = vor.u32 %v8300_v45, %v6894_v42 }
 0x3f6   :  { %4619 = vmatpush.bf16.msra.mxu2 %v7241_v10  ;;  %4632 = vmatpush.bf16.msra.mxu3 %v7497_v0  ;;  %v8272_v27 = vld [vmem:[#allocation4 + $0xac] sm:$0xf0]  ;;  %v8476_v36 = vld [vmem:[#allocation4 + $0x714] sm:$0xf] }
 0x3f7   :  { %4595 = vmatmul.bf16.vlgmr.msra.gmra.mxu0 %v9071_v58  ;;  %4608 = vmatmul.bf16.vlgmr.msra.gmra.mxu1 %v9073_v22  ;;  %v7308_v41 = vld [vmem:[#allocation4 + $0x4d0] sm:$0xf]  ;;  %v6765_v0 = vor.u32 %v8272_v27, %v6764_v5  ;;  %v8292_v5 = vld [vmem:[#allocation4 + $0x154] sm:$0xf] }
 0x3f8   :  { %4639 = vmatpush.bf16.msrb.mxu0 %v6925_v6  ;;  %4652 = vmatpush.bf16.msrb.mxu1 %v7181_v8  ;;  %v7020_v6 = vld [vmem:[#allocation4 + $0x290] sm:$0xf]  ;;  %v6862_v27 = vld [vmem:[#allocation4 + $0x170] sm:$0xf0] }
 0x3f9   :  { %v8336_v8 = vld [vmem:[#allocation4 + $0x2ac] sm:$0xf0]  ;;  %v7598_v37 = vld [vmem:[#allocation4 + $0x730] sm:$0xf0] }
 0x3fa   :  { %4620 = vmatpush.bf16.msra.mxu2 %v7209_v14  ;;  %4633 = vmatpush.bf16.msra.mxu3 %v7465_v52  ;;  %v8408_v9 = vld [vmem:[#allocation4 + $0x4ec] sm:$0xf0]  ;;  %v7021_v7 = vor.u32 %v8336_v8, %v7020_v6  ;;  %v8356_v6 = vld [vmem:[#allocation4 + $0x354] sm:$0xf] }
 0x3fb   :  { %v7564_v17 = vld [vmem:[#allocation4 + $0x6d0] sm:$0xf]  ;;  %v7309_v26 = vor.u32 %v8408_v9, %v7308_v41  ;;  %v7118_v8 = vld [vmem:[#allocation4 + $0x370] sm:$0xf0] }
 0x3fc   :  { %4640 = vmatpush.bf16.msrb.mxu0 %v6893_v4  ;;  %4653 = vmatpush.bf16.msrb.mxu1 %v7149_v20  ;;  %v8472_v10 = vld [vmem:[#allocation4 + $0x6ec] sm:$0xf0]  ;;  %v8428_v41 = vld [vmem:[#allocation4 + $0x594] sm:$0xf] }
 0x3fd   :  { %4621 = vmatmul.bf16.vlgmr.msra.gmra.mxu2 %v9077_v51  ;;  %4634 = vmatmul.bf16.vlgmr.msra.gmra.mxu3 %v9079_v25  ;;  %v6732_v11 = vld [vmem:[#allocation4 + $0x50] sm:$0xf]  ;;  %v7565_v46 = vor.u32 %v8472_v10, %v7564_v17  ;;  %v7406_v9 = vld [vmem:[#allocation4 + $0x5b0] sm:$0xf0] }
 0x3fe   :  { %4665 = vmatpush.bf16.msrb.mxu2 %v7437_v24  ;;  %4678 = vmatpush.bf16.msrb.mxu3 %v7693_v29  ;;  %v8264_v13 = vld [vmem:[#allocation4 + $0x6c] sm:$0xf0]  ;;  %v8492_v17 = vld [vmem:[#allocation4 + $0x794] sm:$0xf] }
 0x3ff   :  { %v6988_v16 = vld [vmem:[#allocation4 + $0x250] sm:$0xf]  ;;  %v6733_v14 = vor.u32 %v8264_v13, %v6732_v11  ;;  %v7662_v10 = vld [vmem:[#allocation4 + $0x7b0] sm:$0xf0] }
 0x400   :  { %4641 = vmatpush.bf16.msrb.mxu0 %v6861_v38  ;;  %4654 = vmatpush.bf16.msrb.mxu1 %v7117_v57  ;;  %v8328_v3 = vld [vmem:[#allocation4 + $0x26c] sm:$0xf0]  ;;  %v8284_v11 = vld [vmem:[#allocation4 + $0x114] sm:$0xf] }
 0x401   :  { %v7276_v18 = vld [vmem:[#allocation4 + $0x490] sm:$0xf]  ;;  %v6989_v52 = vor.u32 %v8328_v3, %v6988_v16  ;;  %v6830_v13 = vld [vmem:[#allocation4 + $0x130] sm:$0xf0] }
 0x402   :  { %4666 = vmatpush.bf16.msrb.mxu2 %v7405_v39  ;;  %4679 = vmatpush.bf16.msrb.mxu3 %v7661_v40  ;;  %v8400_v19 = vld [vmem:[#allocation4 + $0x4ac] sm:$0xf0]  ;;  %v8348_v16 = vld [vmem:[#allocation4 + $0x314] sm:$0xf] }
 0x403   :  { %v7532_v4 = vld [vmem:[#allocation4 + $0x690] sm:$0xf]  ;;  %v7277_v29 = vor.u32 %v8400_v19, %v7276_v18  ;;  %v7086_v3 = vld [vmem:[#allocation4 + $0x330] sm:$0xf0] }
 0x404   :  { %4642 = vmatpush.bf16.msrb.mxu0 %v6829_v49  ;;  %4655 = vmatpush.bf16.msrb.mxu1 %v7085_v48  ;;  %v8464_v20 = vld [vmem:[#allocation4 + $0x6ac] sm:$0xf0]  ;;  %v7150_v48 = vld [vmem:[#allocation4 + $0x3b0] sm:$0xf0] }
 0x405   :  { %v6700_v21 = vld [vmem:[#allocation4 + $0x10] sm:$0xf]  ;;  %v7533_v32 = vor.u32 %v8464_v20, %v7532_v4  ;;  %v7153_v1 = vor.u32 %v8364_v47, %v7150_v48  ;;  %v8420_v18 = vld [vmem:[#allocation4 + $0x554] sm:$0xf] }
 0x406   :  { %4667 = vmatpush.bf16.msrb.mxu2 %v7373_v56  ;;  %4680 = vmatpush.bf16.msrb.mxu3 %v7629_v54  ;;  %v8256_v23 = vld [vmem:[#allocation4 + $0x2c] sm:$0xf0]  ;;  %v7374_v19 = vld [vmem:[#allocation4 + $0x570] sm:$0xf0] }
 0x407   :  { %v6956_v24 = vld [vmem:[#allocation4 + $0x210] sm:$0xf]  ;;  %v6701_v39 = vor.u32 %v8256_v23, %v6700_v21  ;;  %v8484_v4 = vld [vmem:[#allocation4 + $0x754] sm:$0xf] }
 0x408   :  { %4643 = vmatpush.bf16.msrb.mxu0 %v6797_v2  ;;  %4656 = vmatpush.bf16.msrb.mxu1 %v7053_v28  ;;  %v8320_v31 = vld [vmem:[#allocation4 + $0x22c] sm:$0xf0]  ;;  %v7630_v20 = vld [vmem:[#allocation4 + $0x770] sm:$0xf0] }
 0x409   :  { %v7244_v38 = vld [vmem:[#allocation4 + $0x450] sm:$0xf]  ;;  %v6957_v40 = vor.u32 %v8320_v31, %v6956_v24  ;;  %v8276_v21 = vld [vmem:[#allocation4 + $0xd4] sm:$0xf]  ;;  %v7377_v24 = vor.u32 %v8420_v18, %v7374_v19  ;;  %v8305_v19 = vld [vmem:[#allocation4 + $0x1b4] sm:$0xf0] }
 0x40a   :  { %4668 = vmatpush.bf16.msrb.mxu2 %v7341_v12  ;;  %4681 = vmatpush.bf16.msrb.mxu3 %v7597_v34  ;;  %v8392_v57 = vld [vmem:[#allocation4 + $0x46c] sm:$0xf0]  ;;  %v7441_v12 = vor.u32 %v8436_v59, %v7438_v60  ;;  %v7697_v34 = vor.u32 %v8500_v61, %v7694_v62  ;;  %v6798_v23 = vld [vmem:[#allocation4 + $0xf0] sm:$0xf0] }
 0x40b   :  { %v7500_v15 = vld [vmem:[#allocation4 + $0x650] sm:$0xf]  ;;  %v7245_v53 = vor.u32 %v8392_v57, %v7244_v38  ;;  %v7054_v31 = vld [vmem:[#allocation4 + $0x2f0] sm:$0xf0]  ;;  %v6801_v38 = vor.u32 %v8276_v21, %v6798_v23 }
 0x40c   :  { %4644 = vmatpush.bf16.msrb.mxu0 %v6765_v0  ;;  %4657 = vmatpush.bf16.msrb.mxu1 %v7021_v7  ;;  %v8456_v30 = vld [vmem:[#allocation4 + $0x66c] sm:$0xf0]  ;;  %v6865_v0 = vor.u32 %v8292_v5, %v6862_v27  ;;  %v7121_v7 = vor.u32 %v8356_v6, %v7118_v8  ;;  %v8404_v45 = vld [vmem:[#allocation4 + $0x4d4] sm:$0xf] }
 0x40d   :  { %v7501_v49 = vor.u32 %v8456_v30, %v7500_v15  ;;  %v7212_v50 = vld [vmem:[#allocation4 + $0x410] sm:$0xf]  ;;  %v8268_v15 = vld [vmem:[#allocation4 + $0x94] sm:$0xf] }
 0x40e   :  { %4669 = vmatpush.bf16.msrb.mxu2 %v7309_v26  ;;  %4682 = vmatpush.bf16.msrb.mxu3 %v7565_v46  ;;  %v8384_v55 = vld [vmem:[#allocation4 + $0x42c] sm:$0xf0]  ;;  %v7409_v26 = vor.u32 %v8428_v41, %v7406_v9  ;;  %v7665_v46 = vor.u32 %v8492_v17, %v7662_v10  ;;  %v6766_v30 = vld [vmem:[#allocation4 + $0xb0] sm:$0xf0]  ;;  %v6932_v41 = vld [vmem:[#allocation4 + $0x1d8] sm:$0xf] }
 0x40f   :  { %v7468_v56 = vld [vmem:[#allocation4 + $0x610] sm:$0xf]  ;;  %v7213_v2 = vor.u32 %v8384_v55, %v7212_v50  ;;  %v7310_v42 = vld [vmem:[#allocation4 + $0x4f0] sm:$0xf0]  ;;  %v8313_v9 = vld [vmem:[#allocation4 + $0x1f4] sm:$0xf0] }
 0x410   :  { %4645 = vmatpush.bf16.msrb.mxu0 %v6733_v14  ;;  %4658 = vmatpush.bf16.msrb.mxu1 %v6989_v52  ;;  %v8448_v54 = vld [vmem:[#allocation4 + $0x62c] sm:$0xf0]  ;;  %v6833_v14 = vor.u32 %v8284_v11, %v6830_v13  ;;  %v7089_v52 = vor.u32 %v8348_v16, %v7086_v3  ;;  %v8468_v47 = vld [vmem:[#allocation4 + $0x6d4] sm:$0xf]  ;;  %v7188_v17 = vld [vmem:[#allocation4 + $0x3d8] sm:$0xf]  ;;  %v6933_v3 = vor.u32 %v8313_v9, %v6932_v41 }
 0x411   :  { %v7469_v28 = vor.u32 %v8448_v54, %v7468_v56  ;;  %v8260_v50 = vld [vmem:[#allocation4 + $0x54] sm:$0xf]  ;;  %v7313_v56 = vor.u32 %v8404_v45, %v7310_v42  ;;  %v8377_v10 = vld [vmem:[#allocation4 + $0x3f4] sm:$0xf0] }
 0x412   :  { %4670 = vmatpush.bf16.msrb.mxu2 %v7277_v29  ;;  %4683 = vmatpush.bf16.msrb.mxu3 %v7533_v32  ;;  %v7633_v29 = vor.u32 %v8484_v4, %v7630_v20  ;;  %v8340_v32 = vld [vmem:[#allocation4 + $0x2d4] sm:$0xf]  ;;  %v6900_v16 = vld [vmem:[#allocation4 + $0x198] sm:$0xf]  ;;  %v7189_v18 = vor.u32 %v8377_v10, %v7188_v17 }
 0x413   :  { %v7057_v57 = vor.u32 %v8340_v32, %v7054_v31  ;;  %v6734_v55 = vld [vmem:[#allocation4 + $0x70] sm:$0xf0]  ;;  %v7156_v4 = vld [vmem:[#allocation4 + $0x398] sm:$0xf] }
 0x414   :  { %4646 = vmatpush.bf16.msrb.mxu0 %v6701_v39  ;;  %4659 = vmatpush.bf16.msrb.mxu1 %v6957_v40  ;;  %v7345_v39 = vor.u32 %v8412_v33, %v7342_v35  ;;  %v7601_v40 = vor.u32 %v8476_v36, %v7598_v37  ;;  %v8324_v59 = vld [vmem:[#allocation4 + $0x254] sm:$0xf]  ;;  %v8369_v20 = vld [vmem:[#allocation4 + $0x3b4] sm:$0xf0]  ;;  %v6901_v37 = vor.u32 %v8305_v19, %v6900_v16 }
 0x415   :  { %v6990_v60 = vld [vmem:[#allocation4 + $0x270] sm:$0xf0]  ;;  %v7444_v32 = vld [vmem:[#allocation4 + $0x5d8] sm:$0xf] }
 0x416   :  { %4671 = vmatpush.bf16.msrb.mxu2 %v7245_v53  ;;  %4684 = vmatpush.bf16.msrb.mxu3 %v7501_v49  ;;  %v7566_v53 = vld [vmem:[#allocation4 + $0x6f0] sm:$0xf0]  ;;  %v6769_v49 = vor.u32 %v8268_v15, %v6766_v30  ;;  %v8441_v31 = vld [vmem:[#allocation4 + $0x5f4] sm:$0xf0] }
 0x417   :  { %4647 = vmatmul.bf16.vlgmr.msrb.gmra.mxu0 %v9071_v58  ;;  %4660 = vmatmul.bf16.vlgmr.msrb.gmra.mxu1 %v9073_v22  ;;  %v7569_v54 = vor.u32 %v8468_v47, %v7566_v53  ;;  %v8396_v61 = vld [vmem:[#allocation4 + $0x494] sm:$0xf]  ;;  %v7700_v33 = vld [vmem:[#allocation4 + $0x7d8] sm:$0xf] }
 0x418   :  { %4691 = vmatpush.bf16.msra.mxu0 %v6929_v44  ;;  %4704 = vmatpush.bf16.msra.mxu1 %v7185_v43  ;;  %v8332_v44 = vld [vmem:[#allocation4 + $0x294] sm:$0xf]  ;;  %v8505_v35 = vld [vmem:[#allocation4 + $0x7f4] sm:$0xf0] }
 0x419   :  { %v7022_v43 = vld [vmem:[#allocation4 + $0x2b0] sm:$0xf0]  ;;  %v9102_v36 = vld [vmem:[%s9364_s14] sm:$0xff] }
 0x41a   :  { %4672 = vmatpush.bf16.msrb.mxu2 %v7213_v2  ;;  %4685 = vmatpush.bf16.msrb.mxu3 %v7469_v28  ;;  %v7025_v48 = vor.u32 %v8332_v44, %v7022_v43  ;;  %v7278_v62 = vld [vmem:[#allocation4 + $0x4b0] sm:$0xf0]  ;;  %v6737_v2 = vor.u32 %v8260_v50, %v6734_v55  ;;  %v6993_v28 = vor.u32 %v8324_v59, %v6990_v60  ;;  %v6868_v30 = vld [vmem:[#allocation4 + $0x158] sm:$0xf]  ;;  %v3135_v42 = vperm.slane %v9102_v36, 0 }
 0x41b   :  { %v8252_v5 = vld [vmem:[#allocation4 + $0x14] sm:$0xf]  ;;  %v7445_v44 = vor.u32 %v8441_v31, %v7444_v32  ;;  %v7701_v43 = vor.u32 %v8505_v35, %v7700_v33  ;;  %v8361_v45 = vld [vmem:[#allocation4 + $0x374] sm:$0xf0] }
 0x41c   :  { %4692 = vmatpush.bf16.msra.mxu0 %v6897_v63  ;;  %4705 = vmatpush.bf16.msra.mxu1 %v7153_v1  ;;  %v8460_v63 = vld [vmem:[#allocation4 + $0x694] sm:$0xf]  ;;  %v7412_v47 = vld [vmem:[#allocation4 + $0x598] sm:$0xf] }
 0x41d   :  { %4673 = vmatmul.bf16.vlgmr.msrb.gmra.mxu2 %v9077_v51  ;;  %4686 = vmatmul.bf16.vlgmr.msrb.gmra.mxu3 %v9079_v25  ;;  %v7534_v1 = vld [vmem:[#allocation4 + $0x6b0] sm:$0xf0]  ;;  %v8433_v53 = vld [vmem:[#allocation4 + $0x5b4] sm:$0xf0] }
 0x41e   :  { %4717 = vmatpush.bf16.msra.mxu2 %v7441_v12  ;;  %4730 = vmatpush.bf16.msra.mxu3 %v7697_v34  ;;  %v6702_v27 = vld [vmem:[#allocation4 + $0x30] sm:$0xf0]  ;;  %v7281_v34 = vor.u32 %v8396_v61, %v7278_v62  ;;  %v7537_v6 = vor.u32 %v8460_v63, %v7534_v1  ;;  %v6836_v59 = vld [vmem:[#allocation4 + $0x118] sm:$0xf]  ;;  %v7413_v62 = vor.u32 %v8433_v53, %v7412_v47 }
 0x41f   :  { %v8316_v12 = vld [vmem:[#allocation4 + $0x214] sm:$0xf]  ;;  %v8289_v60 = vld [vmem:[#allocation4 + $0x134] sm:$0xf0] }
 0x420   :  { %4693 = vmatpush.bf16.msra.mxu0 %v6865_v0  ;;  %4706 = vmatpush.bf16.msra.mxu1 %v7121_v7  ;;  %v6958_v8 = vld [vmem:[#allocation4 + $0x230] sm:$0xf0]  ;;  %v7092_v1 = vld [vmem:[#allocation4 + $0x318] sm:$0xf] }
 0x421   :  { %v8388_v0 = vld [vmem:[#allocation4 + $0x454] sm:$0xf]  ;;  %v6804_v41 = vld [vmem:[#allocation4 + $0xd8] sm:$0xf] }
 0x422   :  { %4718 = vmatpush.bf16.msra.mxu2 %v7409_v26  ;;  %4731 = vmatpush.bf16.msra.mxu3 %v7665_v46  ;;  %v7246_v7 = vld [vmem:[#allocation4 + $0x470] sm:$0xf0]  ;;  %v6705_v26 = vor.u32 %v8252_v5, %v6702_v27  ;;  %v6961_v46 = vor.u32 %v8316_v12, %v6958_v8  ;;  %v8425_v5 = vld [vmem:[#allocation4 + $0x574] sm:$0xf0] }
 0x423   :  { %v8452_v11 = vld [vmem:[#allocation4 + $0x654] sm:$0xf]  ;;  %v7636_v27 = vld [vmem:[#allocation4 + $0x758] sm:$0xf] }
 0x424   :  { %4694 = vmatpush.bf16.msra.mxu0 %v6833_v14  ;;  %4707 = vmatpush.bf16.msra.mxu1 %v7089_v52  ;;  %v7502_v13 = vld [vmem:[#allocation4 + $0x670] sm:$0xf0]  ;;  %v7249_v14 = vor.u32 %v8388_v0, %v7246_v7  ;;  %v8489_v12 = vld [vmem:[#allocation4 + $0x774] sm:$0xf0] }
 0x425   :  { %v7505_v52 = vor.u32 %v8452_v11, %v7502_v13  ;;  %v8380_v21 = vld [vmem:[#allocation4 + $0x414] sm:$0xf]  ;;  %v8281_v9 = vld [vmem:[#allocation4 + $0xf4] sm:$0xf0]  ;;  %v7637_v10 = vor.u32 %v8489_v12, %v7636_v27 }
 0x426   :  { %4719 = vmatpush.bf16.msra.mxu2 %v7377_v24  ;;  %4732 = vmatpush.bf16.msra.mxu3 %v7633_v29  ;;  %v7214_v23 = vld [vmem:[#allocation4 + $0x430] sm:$0xf0]  ;;  %v7060_v0 = vld [vmem:[#allocation4 + $0x2d8] sm:$0xf]  ;;  %v6805_v16 = vor.u32 %v8281_v9, %v6804_v41 }
 0x427   :  { %v8444_v24 = vld [vmem:[#allocation4 + $0x614] sm:$0xf]  ;;  %v8345_v7 = vld [vmem:[#allocation4 + $0x2f4] sm:$0xf0] }
 0x428   :  { %4695 = vmatpush.bf16.msra.mxu0 %v6801_v38  ;;  %4708 = vmatpush.bf16.msra.mxu1 %v7057_v57  ;;  %v7470_v29 = vld [vmem:[#allocation4 + $0x630] sm:$0xf0]  ;;  %v7157_v38 = vor.u32 %v8369_v20, %v7156_v4  ;;  %v7217_v57 = vor.u32 %v8380_v21, %v7214_v23  ;;  %v7348_v11 = vld [vmem:[#allocation4 + $0x518] sm:$0xf] }
 0x429   :  { %v7473_v15 = vor.u32 %v8444_v24, %v7470_v29  ;;  %v8417_v13 = vld [vmem:[#allocation4 + $0x534] sm:$0xf0] }
 0x42a   :  { %4720 = vmatpush.bf16.msra.mxu2 %v7345_v39  ;;  %4733 = vmatpush.bf16.msra.mxu3 %v7601_v40  ;;  %v8297_v39 = vld [vmem:[#allocation4 + $0x174] sm:$0xf0] }
 0x42b   :  { %v7124_v40 = vld [vmem:[#allocation4 + $0x358] sm:$0xf]  ;;  %v6869_v50 = vor.u32 %v8297_v39, %v6868_v30 }
 0x42c   :  { %4696 = vmatpush.bf16.msra.mxu0 %v6769_v49  ;;  %4709 = vmatpush.bf16.msra.mxu1 %v7025_v48  ;;  %v7668_v49 = vld [vmem:[#allocation4 + $0x798] sm:$0xf]  ;;  %v7125_v55 = vor.u32 %v8361_v45, %v7124_v40 }
 0x42d   :  { %v8497_v48 = vld [vmem:[#allocation4 + $0x7b4] sm:$0xf0] }
 0x42e   :  { %4721 = vmatpush.bf16.msra.mxu2 %v7313_v56  ;;  %4734 = vmatpush.bf16.msra.mxu3 %v7569_v54  ;;  %v7669_v63 = vor.u32 %v8497_v48, %v7668_v49  ;;  %v6772_v4 = vld [vmem:[#allocation4 + $0x98] sm:$0xf] }
 0x42f   :  { %v8273_v20 = vld [vmem:[#allocation4 + $0xb4] sm:$0xf0] }
 0x430   :  { %4697 = vmatpush.bf16.msra.mxu0 %v6737_v2  ;;  %4710 = vmatpush.bf16.msra.mxu1 %v6993_v28  ;;  %v8353_v2 = vld [vmem:[#allocation4 + $0x334] sm:$0xf0]  ;;  %v6773_v33 = vor.u32 %v8273_v20, %v6772_v4  ;;  %v8437_v20 = vld [vmem:[#allocation4 + $0x5dc] sm:$0xf] }
 0x431   :  { %v7380_v28 = vld [vmem:[#allocation4 + $0x558] sm:$0xf]  ;;  %v7093_v8 = vor.u32 %v8353_v2, %v7092_v1  ;;  %v8309_v1 = vld [vmem:[#allocation4 + $0x1dc] sm:$0xf] }
 0x432   :  { %4722 = vmatpush.bf16.msra.mxu2 %v7281_v34  ;;  %4735 = vmatpush.bf16.msra.mxu3 %v7537_v6  ;;  %v6837_v6 = vor.u32 %v8289_v60, %v6836_v59  ;;  %v7381_v17 = vor.u32 %v8425_v5, %v7380_v28  ;;  %v7028_v21 = vld [vmem:[#allocation4 + $0x298] sm:$0xf]  ;;  %v6934_v2 = vld [vmem:[#allocation4 + $0x1f8] sm:$0xf0] }
 0x433   :  { %v4440_v56 = vpop.f32.mrf.mxu0  ;;  %v4453_v54 = vpop.f32.mrf.mxu1  ;;  %v8337_v23 = vld [vmem:[#allocation4 + $0x2b4] sm:$0xf0]  ;;  %v8373_v28 = vld [vmem:[#allocation4 + $0x3dc] sm:$0xf] }
 0x434   :  { %4698 = vmatpush.bf16.msra.mxu0 %v6705_v26  ;;  %4711 = vmatpush.bf16.msra.mxu1 %v6961_v46  ;;  %v4441_v61 = vadd.f32 %v4440_v56, %v3135_v42  ;;  %v7604_v26 = vld [vmem:[#allocation4 + $0x718] sm:$0xf]  ;;  %v7029_v35 = vor.u32 %v8337_v23, %v7028_v21  ;;  %v7190_v5 = vld [vmem:[#allocation4 + $0x3f8] sm:$0xf0] }
 0x435   :  { %v8481_v46 = vld [vmem:[#allocation4 + $0x734] sm:$0xf0]  ;;  %v7702_v21 = vld [vmem:[#allocation4 + $0x7f8] sm:$0xf0] }
 0x436   :  { %4723 = vmatpush.bf16.msra.mxu2 %v7249_v14  ;;  %4736 = vmatpush.bf16.msra.mxu3 %v7505_v52  ;;  %v4454_v34 = vadd.f32 %v4453_v54, %v4441_v61  ;;  %v7349_v14 = vor.u32 %v8417_v13, %v7348_v11  ;;  %v7605_v52 = vor.u32 %v8481_v46, %v7604_v26  ;;  %v7316_v24 = vld [vmem:[#allocation4 + $0x4d8] sm:$0xf]  ;;  %v6902_v11 = vld [vmem:[#allocation4 + $0x1b8] sm:$0xf0] }
 0x437   :  { %4699 = vmatmul.bf16.vlgmr.msra.gmra.mxu0 %v9071_v58  ;;  %4712 = vmatmul.bf16.vlgmr.msra.gmra.mxu1 %v9073_v22  ;;  %v8409_v29 = vld [vmem:[#allocation4 + $0x4f4] sm:$0xf0]  ;;  %v8365_v13 = vld [vmem:[#allocation4 + $0x39c] sm:$0xf] }
 0x438   :  { %4743 = vmatpush.bf16.msrb.mxu0 %v6933_v3  ;;  %4756 = vmatpush.bf16.msrb.mxu1 %v7189_v18  ;;  %v7061_v3 = vor.u32 %v8345_v7, %v7060_v0  ;;  %v7572_v32 = vld [vmem:[#allocation4 + $0x6d8] sm:$0xf]  ;;  %v7317_v30 = vor.u32 %v8409_v29, %v7316_v24  ;;  %v7193_v0 = vor.u32 %v8373_v28, %v7190_v5  ;;  %v8301_v7 = vld [vmem:[#allocation4 + $0x19c] sm:$0xf] }
 0x439   :  { %v8473_v31 = vld [vmem:[#allocation4 + $0x6f4] sm:$0xf0]  ;;  %v6905_v29 = vor.u32 %v8301_v7, %v6902_v11  ;;  %v8477_v7 = vld [vmem:[#allocation4 + $0x71c] sm:$0xf] }
 0x43a   :  { %4724 = vmatpush.bf16.msra.mxu2 %v7217_v57  ;;  %4737 = vmatpush.bf16.msra.mxu3 %v7473_v15  ;;  %v7573_v39 = vor.u32 %v8473_v31, %v7572_v32  ;;  %v6996_v40 = vld [vmem:[#allocation4 + $0x258] sm:$0xf]  ;;  %v7606_v11 = vld [vmem:[#allocation4 + $0x738] sm:$0xf0] }
 0x43b   :  { %v4442_v18 = vpop.f32.mrf.mxu0  ;;  %v4455_v19 = vpop.f32.mrf.mxu1  ;;  %v8401_v42 = vld [vmem:[#allocation4 + $0x4b4] sm:$0xf0] }
 0x43c   :  { %4744 = vmatpush.bf16.msrb.mxu0 %v6901_v37  ;;  %4757 = vmatpush.bf16.msrb.mxu1 %v7157_v38  ;;  %v6740_v37 = vld [vmem:[#allocation4 + $0x58] sm:$0xf] }
 0x43d   :  { %4725 = vmatmul.bf16.vlgmr.msra.gmra.mxu2 %v9077_v51  ;;  %4738 = vmatmul.bf16.vlgmr.msra.gmra.mxu3 %v9079_v25  ;;  %v8265_v38 = vld [vmem:[#allocation4 + $0x74] sm:$0xf0] }
 0x43e   :  { %4769 = vmatpush.bf16.msrb.mxu2 %v7445_v44  ;;  %4782 = vmatpush.bf16.msrb.mxu3 %v7701_v43  ;;  %v8329_v44 = vld [vmem:[#allocation4 + $0x274] sm:$0xf0]  ;;  %v6741_v48 = vor.u32 %v8265_v38, %v6740_v37  ;;  %v6870_v37 = vld [vmem:[#allocation4 + $0x178] sm:$0xf0] }
 0x43f   :  { %v7284_v43 = vld [vmem:[#allocation4 + $0x498] sm:$0xf] }
 0x440   :  { %4745 = vmatpush.bf16.msrb.mxu0 %v6869_v50  ;;  %4758 = vmatpush.bf16.msrb.mxu1 %v7125_v55  ;;  %v4466_v57 = vpop.f32.mrf.mxu2  ;;  %v4479_v15 = vpop.f32.mrf.mxu3  ;;  %v7540_v47 = vld [vmem:[#allocation4 + $0x698] sm:$0xf]  ;;  %v6997_v50 = vor.u32 %v8329_v44, %v6996_v40  ;;  %v7285_v61 = vor.u32 %v8401_v42, %v7284_v43  ;;  %v7414_v40 = vld [vmem:[#allocation4 + $0x5b8] sm:$0xf0] }
 0x441   :  { %v4467_v45 = vadd.f32 %v4466_v57, %v4454_v34  ;;  %v8465_v53 = vld [vmem:[#allocation4 + $0x6b4] sm:$0xf0]  ;;  %v8493_v44 = vld [vmem:[#allocation4 + $0x79c] sm:$0xf] }
 0x442   :  { %4770 = vmatpush.bf16.msrb.mxu2 %v7413_v62  ;;  %4783 = vmatpush.bf16.msrb.mxu3 %v7669_v63  ;;  %v6708_v55 = vld [vmem:[#allocation4 + $0x18] sm:$0xf]  ;;  %v7541_v62 = vor.u32 %v8465_v53, %v7540_v47  ;;  %v7670_v43 = vld [vmem:[#allocation4 + $0x7b8] sm:$0xf0] }
 0x443   :  { %v9109_v49 = vadd.f32 %v4479_v15, %v4467_v45  ;;  %v8257_v56 = vld [vmem:[#allocation4 + $0x34] sm:$0xf0]  ;;  %v8357_v15 = vld [vmem:[#allocation4 + $0x35c] sm:$0xf] }
 0x444   :  { %4746 = vmatpush.bf16.msrb.mxu0 %v6837_v6  ;;  %4759 = vmatpush.bf16.msrb.mxu1 %v7093_v8  ;;  %v6964_v54 = vld [vmem:[#allocation4 + $0x218] sm:$0xf]  ;;  %v9111_v59 = vpop.f32.mrf.mxu0  ;;  %v9113_v60 = vpop.f32.mrf.mxu1  ;;  %v6709_v8 = vor.u32 %v8257_v56, %v6708_v55  ;;  %v7673_v56 = vor.u32 %v8493_v44, %v7670_v43  ;;  %v8461_v44 = vld [vmem:[#allocation4 + $0x69c] sm:$0xf] }
 0x445   :  { %v8321_v63 = vld [vmem:[#allocation4 + $0x234] sm:$0xf0]  ;;  %v7542_v43 = vld [vmem:[#allocation4 + $0x6b8] sm:$0xf0] }
 0x446   :  { %4771 = vmatpush.bf16.msrb.mxu2 %v7381_v17  ;;  %4784 = vmatpush.bf16.msrb.mxu3 %v7637_v10  ;;  %v7252_v27 = vld [vmem:[#allocation4 + $0x458] sm:$0xf]  ;;  %v6965_v41 = vor.u32 %v8321_v63, %v6964_v54  ;;  %v6937_v10 = vor.u32 %v8309_v1, %v6934_v2  ;;  %v8349_v54 = vld [vmem:[#allocation4 + $0x31c] sm:$0xf] }
 0x447   :  { %v8393_v12 = vld [vmem:[#allocation4 + $0x474] sm:$0xf0]  ;;  %v7382_v63 = vld [vmem:[#allocation4 + $0x578] sm:$0xf0] }
 0x448   :  { %4747 = vmatpush.bf16.msrb.mxu0 %v6805_v16  ;;  %4760 = vmatpush.bf16.msrb.mxu1 %v7061_v3  ;;  %v7508_v34 = vld [vmem:[#allocation4 + $0x658] sm:$0xf]  ;;  %v4468_v9 = vpop.f32.mrf.mxu2  ;;  %v4481_v17 = vpop.f32.mrf.mxu3  ;;  %v7253_v26 = vor.u32 %v8393_v12, %v7252_v27  ;;  %v7158_v16 = vld [vmem:[#allocation4 + $0x3b8] sm:$0xf0] }
 0x449   :  { %v8457_v6 = vld [vmem:[#allocation4 + $0x674] sm:$0xf0]  ;;  %v7161_v32 = vor.u32 %v8365_v13, %v7158_v16  ;;  %v8485_v1 = vld [vmem:[#allocation4 + $0x75c] sm:$0xf] }
 0x44a   :  { %4772 = vmatpush.bf16.msrb.mxu2 %v7349_v14  ;;  %4785 = vmatpush.bf16.msrb.mxu3 %v7605_v52  ;;  %v7509_v46 = vor.u32 %v8457_v6, %v7508_v34  ;;  %v7220_v3 = vld [vmem:[#allocation4 + $0x418] sm:$0xf]  ;;  %v7446_v14 = vld [vmem:[#allocation4 + $0x5f8] sm:$0xf0] }
 0x44b   :  { %v8385_v18 = vld [vmem:[#allocation4 + $0x434] sm:$0xf0]  ;;  %v8501_v52 = vld [vmem:[#allocation4 + $0x7dc] sm:$0xf]  ;;  %v7449_v38 = vor.u32 %v8437_v20, %v7446_v14 }
 0x44c   :  { %4748 = vmatpush.bf16.msrb.mxu0 %v6773_v33  ;;  %4761 = vmatpush.bf16.msrb.mxu1 %v7029_v35  ;;  %v7476_v19 = vld [vmem:[#allocation4 + $0x618] sm:$0xf]  ;;  %v4494_v23 = vpop.f32.mrf.mxu0  ;;  %v4507_v24 = vpop.f32.mrf.mxu1  ;;  %v7221_v31 = vor.u32 %v8385_v18, %v7220_v3  ;;  %v8293_v35 = vld [vmem:[#allocation4 + $0x15c] sm:$0xf]  ;;  %v7705_v57 = vor.u32 %v8501_v52, %v7702_v21 }
 0x44d   :  { %v8449_v4 = vld [vmem:[#allocation4 + $0x634] sm:$0xf0]  ;;  %v6873_v47 = vor.u32 %v8293_v35, %v6870_v37  ;;  %v7638_v2 = vld [vmem:[#allocation4 + $0x778] sm:$0xf0] }
 0x44e   :  { %4773 = vmatpush.bf16.msrb.mxu2 %v7317_v30  ;;  %4786 = vmatpush.bf16.msrb.mxu3 %v7573_v39  ;;  %v7477_v33 = vor.u32 %v8449_v4, %v7476_v19  ;;  %v7126_v30 = vld [vmem:[#allocation4 + $0x378] sm:$0xf0]  ;;  %v7609_v4 = vor.u32 %v8477_v7, %v7606_v11 }
 0x44f   :  { %v8429_v39 = vld [vmem:[#allocation4 + $0x59c] sm:$0xf]  ;;  %v7129_v53 = vor.u32 %v8357_v15, %v7126_v30 }
 0x450   :  { %4749 = vmatpush.bf16.msrb.mxu0 %v6741_v48  ;;  %4762 = vmatpush.bf16.msrb.mxu1 %v6997_v50  ;;  %v9117_v45 = vpop.f32.mrf.mxu2  ;;  %v9119_v42 = vpop.f32.mrf.mxu3  ;;  %v8285_v48 = vld [vmem:[#allocation4 + $0x11c] sm:$0xf]  ;;  %v7417_v55 = vor.u32 %v8429_v39, %v7414_v40 }
 0x451   :  { %v6838_v50 = vld [vmem:[#allocation4 + $0x138] sm:$0xf0] }
 0x452   :  { %4774 = vmatpush.bf16.msrb.mxu2 %v7285_v61  ;;  %4787 = vmatpush.bf16.msrb.mxu3 %v7541_v62  ;;  %v7094_v61 = vld [vmem:[#allocation4 + $0x338] sm:$0xf0]  ;;  %v6841_v27 = vor.u32 %v8285_v48, %v6838_v50 }
 0x453   :  { %v8421_v62 = vld [vmem:[#allocation4 + $0x55c] sm:$0xf]  ;;  %v7097_v12 = vor.u32 %v8349_v54, %v7094_v61  ;;  %v7545_v54 = vor.u32 %v8461_v44, %v7542_v43  ;;  %v8508_v44 = vld [vmem:[%s9365_s15 + $0x10] sm:$0xff] }
 0x454   :  { %4750 = vmatpush.bf16.msrb.mxu0 %v6709_v8  ;;  %4763 = vmatpush.bf16.msrb.mxu1 %v6965_v41  ;;  %v9123_v28 = vpop.f32.mrf.mxu0  ;;  %v9125_v5 = vpop.f32.mrf.mxu1  ;;  %v8277_v34 = vld [vmem:[#allocation4 + $0xdc] sm:$0xf]  ;;  %v7385_v8 = vor.u32 %v8421_v62, %v7382_v63  ;;  %v7641_v41 = vor.u32 %v8485_v1, %v7638_v2  ;;  %v8516_v43 = vld [vmem:[%s9365_s15 + $0x50] sm:$0xff] }
 0x455   :  { %v6806_v6 = vld [vmem:[#allocation4 + $0xf8] sm:$0xf0] }
 0x456   :  { %4775 = vmatpush.bf16.msrb.mxu2 %v7253_v26  ;;  %4788 = vmatpush.bf16.msrb.mxu3 %v7509_v46  ;;  %v8341_v9 = vld [vmem:[#allocation4 + $0x2dc] sm:$0xf]  ;;  %v6809_v46 = vor.u32 %v8277_v34, %v6806_v6 }
 0x457   :  { %4751 = vmatmul.bf16.vlgmr.msrb.gmra.mxu0 %v9071_v58  ;;  %4764 = vmatmul.bf16.vlgmr.msrb.gmra.mxu1 %v9073_v22  ;;  %v7062_v17 = vld [vmem:[#allocation4 + $0x2f8] sm:$0xf0] }
 0x458   :  { %4795 = vmatpush.bf16.msra.mxu0 %v6937_v10  ;;  %4808 = vmatpush.bf16.msra.mxu1 %v7193_v0  ;;  %v8413_v10 = vld [vmem:[#allocation4 + $0x51c] sm:$0xf]  ;;  %v4520_v13 = vpop.f32.mrf.mxu2  ;;  %v4533_v26 = vpop.f32.mrf.mxu3  ;;  %v7065_v16 = vor.u32 %v8341_v9, %v7062_v17 }
 0x459   :  { %v7350_v0 = vld [vmem:[#allocation4 + $0x538] sm:$0xf0] }
 0x45a   :  { %4776 = vmatpush.bf16.msrb.mxu2 %v7221_v31  ;;  %4789 = vmatpush.bf16.msrb.mxu3 %v7477_v33  ;;  %v8269_v3 = vld [vmem:[#allocation4 + $0x9c] sm:$0xf]  ;;  %v7353_v19 = vor.u32 %v8413_v10, %v7350_v0 }
 0x45b   :  { %v6774_v18 = vld [vmem:[#allocation4 + $0xb8] sm:$0xf0] }
 0x45c   :  { %4796 = vmatpush.bf16.msra.mxu0 %v6905_v29  ;;  %4809 = vmatpush.bf16.msra.mxu1 %v7161_v32  ;;  %v8333_v20 = vld [vmem:[#allocation4 + $0x29c] sm:$0xf]  ;;  %v4546_v29 = vpop.f32.mrf.mxu0  ;;  %v4559_v32 = vpop.f32.mrf.mxu1  ;;  %v6777_v31 = vor.u32 %v8269_v3, %v6774_v18 }
 0x45d   :  { %4777 = vmatmul.bf16.vlgmr.msrb.gmra.mxu2 %v9077_v51  ;;  %4790 = vmatmul.bf16.vlgmr.msrb.gmra.mxu3 %v9079_v25  ;;  %v7030_v14 = vld [vmem:[#allocation4 + $0x2b8] sm:$0xf0]  ;;  %v8527_v32 = vld [vmem:[%s9365_s15 + $0xa8] sm:$0xff] }
 0x45e   :  { %4821 = vmatpush.bf16.msra.mxu2 %v7449_v38  ;;  %4834 = vmatpush.bf16.msra.mxu3 %v7705_v57  ;;  %v8405_v52 = vld [vmem:[#allocation4 + $0x4dc] sm:$0xf]  ;;  %v7033_v33 = vor.u32 %v8333_v20, %v7030_v14  ;;  %v8511_v20 = vld [vmem:[%s9365_s15 + $0x28] sm:$0xff]  ;;  %v8536_v14 = vld [vmem:[%s9365_s15 + $0xf0] sm:$0xff] }
 0x45f   :  { %v7318_v21 = vld [vmem:[#allocation4 + $0x4f8] sm:$0xf0] }
 0x460   :  { %4797 = vmatpush.bf16.msra.mxu0 %v6873_v47  ;;  %4810 = vmatpush.bf16.msra.mxu1 %v7129_v53  ;;  %v8469_v23 = vld [vmem:[#allocation4 + $0x6dc] sm:$0xf]  ;;  %v7321_v38 = vor.u32 %v8405_v52, %v7318_v21  ;;  %v9127_v47 = vpop.f32.mrf.mxu2  ;;  %v9129_v53 = vpop.f32.mrf.mxu3 }
 0x461   :  { %v7574_v24 = vld [vmem:[#allocation4 + $0x6f8] sm:$0xf0] }
 0x462   :  { %4822 = vmatpush.bf16.msra.mxu2 %v7417_v55  ;;  %4835 = vmatpush.bf16.msra.mxu3 %v7673_v56  ;;  %v8261_v35 = vld [vmem:[#allocation4 + $0x5c] sm:$0xf]  ;;  %v7577_v57 = vor.u32 %v8469_v23, %v7574_v24  ;;  %v3136_v23 = vperm.slane %v9102_v36, 1 }
 0x463   :  { %v6742_v37 = vld [vmem:[#allocation4 + $0x78] sm:$0xf0] }
 0x464   :  { %4798 = vmatpush.bf16.msra.mxu0 %v6841_v27  ;;  %4811 = vmatpush.bf16.msra.mxu1 %v7097_v12  ;;  %v8325_v15 = vld [vmem:[#allocation4 + $0x25c] sm:$0xf]  ;;  %v6745_v48 = vor.u32 %v8261_v35, %v6742_v37  ;;  %v8509_v35 = vld [vmem:[%s9365_s15 + $0x18] sm:$0xff] }
 0x465   :  { %v6998_v30 = vld [vmem:[#allocation4 + $0x278] sm:$0xf0]  ;;  %v8517_v37 = vld [vmem:[%s9365_s15 + $0x58] sm:$0xff] }
 0x466   :  { %4823 = vmatpush.bf16.msra.mxu2 %v7385_v8  ;;  %4836 = vmatpush.bf16.msra.mxu3 %v7641_v41  ;;  %v8397_v39 = vld [vmem:[#allocation4 + $0x49c] sm:$0xf]  ;;  %v7001_v50 = vor.u32 %v8325_v15, %v6998_v30  ;;  %v8513_v8 = vld [vmem:[%s9365_s15 + $0x38] sm:$0xff] }
 0x467   :  { %v7286_v40 = vld [vmem:[#allocation4 + $0x4b8] sm:$0xf0]  ;;  %v8521_v41 = vld [vmem:[%s9365_s15 + $0x78] sm:$0xff] }
 0x468   :  { %4799 = vmatpush.bf16.msra.mxu0 %v6809_v46  ;;  %4812 = vmatpush.bf16.msra.mxu1 %v7065_v16  ;;  %v8253_v55 = vld [vmem:[#allocation4 + $0x1c] sm:$0xf]  ;;  %v7289_v56 = vor.u32 %v8397_v39, %v7286_v40  ;;  %v4572_v13 = vpop.f32.mrf.mxu2  ;;  %v4585_v26 = vpop.f32.mrf.mxu3  ;;  %v8512_v46 = vld [vmem:[%s9365_s15 + $0x30] sm:$0xff] }
 0x469   :  { %v6710_v61 = vld [vmem:[#allocation4 + $0x38] sm:$0xf0]  ;;  %v8520_v16 = vld [vmem:[%s9365_s15 + $0x70] sm:$0xff] }
 0x46a   :  { %4824 = vmatpush.bf16.msra.mxu2 %v7353_v19  ;;  %4837 = vmatpush.bf16.msra.mxu3 %v7609_v4  ;;  %v8317_v62 = vld [vmem:[#allocation4 + $0x21c] sm:$0xf]  ;;  %v6713_v34 = vor.u32 %v8253_v55, %v6710_v61  ;;  %v8529_v19 = vld [vmem:[%s9365_s15 + $0xb8] sm:$0xff]  ;;  %v8515_v61 = vld [vmem:[%s9365_s15 + $0x48] sm:$0xff] }
 0x46b   :  { %v6966_v63 = vld [vmem:[#allocation4 + $0x238] sm:$0xf0]  ;;  %v8537_v4 = vld [vmem:[%s9365_s15 + $0xf8] sm:$0xff] }
 0x46c   :  { %4800 = vmatpush.bf16.msra.mxu0 %v6777_v31  ;;  %4813 = vmatpush.bf16.msra.mxu1 %v7033_v33  ;;  %v8389_v1 = vld [vmem:[#allocation4 + $0x45c] sm:$0xf]  ;;  %v6969_v6 = vor.u32 %v8317_v62, %v6966_v63  ;;  %v3137_v31 = vperm.slane %v9102_v36, 2  ;;  %v3138_v33 = vperm.slane %v9102_v36, 3  ;;  %v8524_v63 = vld [vmem:[%s9365_s15 + $0x90] sm:$0xff] }
 0x46d   :  { %v7254_v2 = vld [vmem:[#allocation4 + $0x478] sm:$0xf0] }
 0x46e   :  { %4825 = vmatpush.bf16.msra.mxu2 %v7321_v38  ;;  %4838 = vmatpush.bf16.msra.mxu3 %v7577_v57  ;;  %v8453_v27 = vld [vmem:[#allocation4 + $0x65c] sm:$0xf]  ;;  %v7257_v9 = vor.u32 %v8389_v1, %v7254_v2  ;;  %v4545_v39 = vadd.f32 %v9123_v28, %v3137_v31  ;;  %v8533_v28 = vld [vmem:[%s9365_s15 + $0xd8] sm:$0xff] }
 0x46f   :  { %v7510_v12 = vld [vmem:[#allocation4 + $0x678] sm:$0xf0] }
 0x470   :  { %4801 = vmatpush.bf16.msra.mxu0 %v6745_v48  ;;  %4814 = vmatpush.bf16.msra.mxu1 %v7001_v50  ;;  %v7513_v17 = vor.u32 %v8453_v27, %v7510_v12  ;;  %v8381_v10 = vld [vmem:[#allocation4 + $0x41c] sm:$0xf]  ;;  %v4847_v12 = vmax.f32 %v9109_v49, 0.0 }
 0x471   :  { %v7222_v0 = vld [vmem:[#allocation4 + $0x438] sm:$0xf0] }
 0x472   :  { %4826 = vmatpush.bf16.msra.mxu2 %v7289_v56  ;;  %4839 = vmatpush.bf16.msra.mxu3 %v7545_v54  ;;  %v8445_v7 = vld [vmem:[#allocation4 + $0x61c] sm:$0xf]  ;;  %v7225_v3 = vor.u32 %v8381_v10, %v7222_v0  ;;  %v4558_v56 = vadd.f32 %v9125_v5, %v4545_v39  ;;  %v8532_v5 = vld [vmem:[%s9365_s15 + $0xd0] sm:$0xff]  ;;  %v8553_v10 = vld [vmem:[%s9365_s15 + $0x178] sm:$0xff]  ;;  %v4855_v0 = vpack.c.bf16 %v4847_v12, %v4847_v12 }
 0x473   :  { %v7478_v11 = vld [vmem:[#allocation4 + $0x638] sm:$0xf0] }
 0x474   :  { %4802 = vmatpush.bf16.msra.mxu0 %v6713_v34  ;;  %4815 = vmatpush.bf16.msra.mxu1 %v6969_v6  ;;  %v7481_v18 = vor.u32 %v8445_v7, %v7478_v11  ;;  %v4596_v52 = vpop.f32.mrf.mxu0  ;;  %v4609_v21 = vpop.f32.mrf.mxu1  ;;  %v8510_v24 = vld [vmem:[%s9365_s15 + $0x20] sm:$0xff]  ;;  %v4571_v1 = vadd.f32 %v9127_v47, %v4558_v56  ;;  %v8523_v47 = vld [vmem:[%s9365_s15 + $0x88] sm:$0xff] }
 0x475   :  { %v8518_v29 = vld [vmem:[%s9365_s15 + $0x60] sm:$0xff]  ;;  %v4597_v40 = vadd.f32 %v4596_v52, %v3138_v33  ;;  %v8531_v6 = vld [vmem:[%s9365_s15 + $0xc8] sm:$0xff]  ;;  %v3139_v52 = vperm.slane %v9102_v36, 4 }
 0x476   :  { %4827 = vmatpush.bf16.msra.mxu2 %v7257_v9  ;;  %4840 = vmatpush.bf16.msra.mxu3 %v7513_v17  ;;  %v8534_v38 = vld [vmem:[%s9365_s15 + $0xe0] sm:$0xff]  ;;  %v8545_v9 = vld [vmem:[%s9365_s15 + $0x138] sm:$0xff] }
 0x477   :  { %4803 = vmatmul.bf16.vlgmr.msra.gmra.mxu0 %v9071_v58  ;;  %4816 = vmatmul.bf16.vlgmr.msra.gmra.mxu1 %v9073_v22  ;;  %v8519_v58 = vld [vmem:[%s9365_s15 + $0x68] sm:$0xff]  ;;  %v8528_v22 = vld [vmem:[%s9365_s15 + $0xb0] sm:$0xff]  ;;  %v4610_v54 = vadd.f32 %v4609_v21, %v4597_v40  ;;  %v8506_v27 = vld [vmem:[%s9365_s15] sm:$0xff] }
 0x478   :  { %5379 = vmatpush.bf16.msrb.mxu0 %v8513_v8  ;;  %5392 = vmatpush.bf16.msrb.mxu1 %v8521_v41  ;;  %v4584_v8 = vadd.f32 %v9129_v53, %v4571_v1  ;;  %v8522_v53 = vld [vmem:[%s9365_s15 + $0x80] sm:$0xff]  ;;  %v8541_v21 = vld [vmem:[%s9365_s15 + $0x118] sm:$0xff] }
 0x479   :  { %v8530_v11 = vld [vmem:[%s9365_s15 + $0xc0] sm:$0xff] }
 0x47a   :  { %4828 = vmatpush.bf16.msra.mxu2 %v7225_v3  ;;  %4841 = vmatpush.bf16.msra.mxu3 %v7481_v18  ;;  %v4849_v13 = vmax.f32 %v4584_v8, 0.0  ;;  %v8538_v39 = vld [vmem:[%s9365_s15 + $0x100] sm:$0xff]  ;;  %v8569_v8 = vld [vmem:[%s9365_s15 + $0x1f8] sm:$0xff] }
 0x47b   :  { %v8546_v40 = vld [vmem:[%s9365_s15 + $0x140] sm:$0xff] }
 0x47c   :  { %5380 = vmatpush.bf16.msrb.mxu0 %v8512_v46  ;;  %5393 = vmatpush.bf16.msrb.mxu1 %v8520_v16  ;;  %v4598_v57 = vpop.f32.mrf.mxu0  ;;  %v4611_v15 = vpop.f32.mrf.mxu1  ;;  %v8544_v46 = vld [vmem:[%s9365_s15 + $0x130] sm:$0xff]  ;;  %v4857_v3 = vpack.c.bf16 %v4849_v13, %v4849_v13  ;;  %v8558_v56 = vld [vmem:[%s9365_s15 + $0x1a0] sm:$0xff]  ;;  %v3141_v13 = vperm.slane %v9102_v36, 6 }
 0x47d   :  { %4829 = vmatmul.bf16.vlgmr.msra.gmra.mxu2 %v9077_v51  ;;  %4842 = vmatmul.bf16.vlgmr.msra.gmra.mxu3 %v9079_v25  ;;  %v8535_v51 = vld [vmem:[%s9365_s15 + $0xe8] sm:$0xff]  ;;  %v4493_v25 = vadd.f32 %v9111_v59, %v3136_v23  ;;  %v8526_v59 = vld [vmem:[%s9365_s15 + $0xa0] sm:$0xff]  ;;  %v8552_v16 = vld [vmem:[%s9365_s15 + $0x170] sm:$0xff] }
 0x47e   :  { %5405 = vmatpush.bf16.msrb.mxu2 %v8529_v19  ;;  %5418 = vmatpush.bf16.msrb.mxu3 %v8537_v4  ;;  %v8543_v19 = vld [vmem:[%s9365_s15 + $0x128] sm:$0xff]  ;;  %v8549_v23 = vld [vmem:[%s9365_s15 + $0x158] sm:$0xff] }
 0x47f   :  { %v4506_v30 = vadd.f32 %v9113_v60, %v4493_v25  ;;  %v8525_v60 = vld [vmem:[%s9365_s15 + $0x98] sm:$0xff]  ;;  %v8551_v4 = vld [vmem:[%s9365_s15 + $0x168] sm:$0xff]  ;;  %v8548_v25 = vld [vmem:[%s9365_s15 + $0x150] sm:$0xff] }
 0x480   :  { %5381 = vmatpush.bf16.msrb.mxu0 %v8511_v20  ;;  %5394 = vmatpush.bf16.msrb.mxu1 %v8519_v58  ;;  %v4622_v50 = vpop.f32.mrf.mxu2  ;;  %v4635_v55 = vpop.f32.mrf.mxu3 }
 0x481   :  { %v4519_v48 = vadd.f32 %v9117_v45, %v4506_v30  ;;  %v8507_v45 = vld [vmem:[%s9365_s15 + $0x8] sm:$0xff]  ;;  %v4623_v2 = vadd.f32 %v4622_v50, %v4610_v54  ;;  %v8561_v30 = vld [vmem:[%s9365_s15 + $0x1b8] sm:$0xff] }
 0x482   :  { %5406 = vmatpush.bf16.msrb.mxu2 %v8528_v22  ;;  %5419 = vmatpush.bf16.msrb.mxu3 %v8536_v14  ;;  %v8542_v22 = vld [vmem:[%s9365_s15 + $0x120] sm:$0xff]  ;;  %v8557_v54 = vld [vmem:[%s9365_s15 + $0x198] sm:$0xff] }
 0x483   :  { %v4532_v62 = vadd.f32 %v9119_v42, %v4519_v48  ;;  %v8514_v42 = vld [vmem:[%s9365_s15 + $0x40] sm:$0xff]  ;;  %v4636_v41 = vadd.f32 %v4635_v55, %v4623_v2 }
 0x484   :  { %5382 = vmatpush.bf16.msrb.mxu0 %v8510_v24  ;;  %5395 = vmatpush.bf16.msrb.mxu1 %v8518_v29  ;;  %v8550_v14 = vld [vmem:[%s9365_s15 + $0x160] sm:$0xff] }
 0x485   :  { %v4848_v34 = vmax.f32 %v4532_v62, 0.0  ;;  %v4850_v26 = vmax.f32 %v4636_v41, 0.0 }
 0x486   :  { %5407 = vmatpush.bf16.msrb.mxu2 %v8527_v32  ;;  %5420 = vmatpush.bf16.msrb.mxu3 %v8535_v51  ;;  %v8540_v51 = vld [vmem:[%s9365_s15 + $0x110] sm:$0xff] }
 0x487   :  { %v4856_v7 = vpack.c.bf16 %v4848_v34, %v4848_v34  ;;  %v4858_v18 = vpack.c.bf16 %v4850_v26, %v4850_v26  ;;  %v8564_v26 = vld [vmem:[%s9365_s15 + $0x1d0] sm:$0xff] }
 0x488   :  { %5383 = vmatpush.bf16.msrb.mxu0 %v8509_v35  ;;  %5396 = vmatpush.bf16.msrb.mxu1 %v8517_v37  ;;  %v4624_v17 = vpop.f32.mrf.mxu2  ;;  %v4637_v49 = vpop.f32.mrf.mxu3 }
 0x48a   :  { %5408 = vmatpush.bf16.msrb.mxu2 %v8526_v59  ;;  %5421 = vmatpush.bf16.msrb.mxu3 %v8534_v38  ;;  %v8539_v59 = vld [vmem:[%s9365_s15 + $0x108] sm:$0xff] }
 0x48b   :  { %v8547_v38 = vld [vmem:[%s9365_s15 + $0x148] sm:$0xff] }
 0x48c   :  { %5384 = vmatpush.bf16.msrb.mxu0 %v8508_v44  ;;  %5397 = vmatpush.bf16.msrb.mxu1 %v8516_v43  ;;  %v8560_v44 = vld [vmem:[%s9365_s15 + $0x1b0] sm:$0xff] }
 0x48e   :  { %5409 = vmatpush.bf16.msrb.mxu2 %v8525_v60  ;;  %5422 = vmatpush.bf16.msrb.mxu3 %v8533_v28  ;;  %v8559_v28 = vld [vmem:[%s9365_s15 + $0x1a8] sm:$0xff] }
 0x490   :  { %5385 = vmatpush.bf16.msrb.mxu0 %v8507_v45  ;;  %5398 = vmatpush.bf16.msrb.mxu1 %v8515_v61  ;;  %v3140_v45 = vperm.slane %v9102_v36, 5  ;;  %v8556_v61 = vld [vmem:[%s9365_s15 + $0x190] sm:$0xff] }
 0x492   :  { %5410 = vmatpush.bf16.msrb.mxu2 %v8524_v63  ;;  %5423 = vmatpush.bf16.msrb.mxu3 %v8532_v5 }
 0x494   :  { %5386 = vmatpush.bf16.msrb.mxu0 %v8506_v27  ;;  %5399 = vmatpush.bf16.msrb.mxu1 %v8514_v42  ;;  %v4648_v20 = vpop.f32.mrf.mxu0  ;;  %v4661_v58 = vpop.f32.mrf.mxu1  ;;  %v8555_v42 = vld [vmem:[%s9365_s15 + $0x188] sm:$0xff] }
 0x495   :  { %v4649_v24 = vadd.f32 %v4648_v20, %v3139_v52 }
 0x496   :  { %5411 = vmatpush.bf16.msrb.mxu2 %v8523_v47  ;;  %5424 = vmatpush.bf16.msrb.mxu3 %v8531_v6  ;;  %v8554_v47 = vld [vmem:[%s9365_s15 + $0x180] sm:$0xff] }
 0x497   :  { %5387 = vmatmul.bf16.vlgmr.msrb.gmra.mxu0 %v4855_v0  ;;  %5400 = vmatmul.bf16.vlgmr.msrb.gmra.mxu1 %v4856_v7  ;;  %v4662_v31 = vadd.f32 %v4661_v58, %v4649_v24  ;;  %v8566_v0 = vld [vmem:[%s9365_s15 + $0x1e0] sm:$0xff] }
 0x498   :  { %5431 = vmatpush.bf16.msra.mxu0 %v8545_v9  ;;  %5444 = vmatpush.bf16.msra.mxu1 %v8553_v10  ;;  %v8568_v9 = vld [vmem:[%s9365_s15 + $0x1f0] sm:$0xff]  ;;  %v8567_v10 = vld [vmem:[%s9365_s15 + $0x1e8] sm:$0xff] }
 0x49a   :  { %5412 = vmatpush.bf16.msrb.mxu2 %v8522_v53  ;;  %5425 = vmatpush.bf16.msrb.mxu3 %v8530_v11  ;;  %v8565_v11 = vld [vmem:[%s9365_s15 + $0x1d8] sm:$0xff] }
 0x49c   :  { %5432 = vmatpush.bf16.msra.mxu0 %v8544_v46  ;;  %5445 = vmatpush.bf16.msra.mxu1 %v8552_v16  ;;  %v4650_v29 = vpop.f32.mrf.mxu0  ;;  %v4663_v32 = vpop.f32.mrf.mxu1 }
 0x49d   :  { %5413 = vmatmul.bf16.vlgmr.msrb.gmra.mxu2 %v4857_v3  ;;  %5426 = vmatmul.bf16.vlgmr.msrb.gmra.mxu3 %v4858_v18 }
 0x49e   :  { %5457 = vmatpush.bf16.msra.mxu2 %v8561_v30  ;;  %5470 = vmatpush.bf16.msra.mxu3 %v8569_v8 }
 0x4a0   :  { %5433 = vmatpush.bf16.msra.mxu0 %v8543_v19  ;;  %5446 = vmatpush.bf16.msra.mxu1 %v8551_v4  ;;  %v4674_v33 = vpop.f32.mrf.mxu2  ;;  %v4687_v35 = vpop.f32.mrf.mxu3  ;;  %v8563_v19 = vld [vmem:[%s9365_s15 + $0x1c8] sm:$0xff] }
 0x4a1   :  { %v4675_v37 = vadd.f32 %v4674_v33, %v4662_v31 }
 0x4a2   :  { %5458 = vmatpush.bf16.msra.mxu2 %v8560_v44  ;;  %5471 = vmatpush.bf16.msra.mxu3 %v8568_v9  ;;  %v8580_v44 = vld [vmem:[%s9366_s16] ss:$0 sm:$0xff] }
 0x4a3   :  { %v4688_v57 = vadd.f32 %v4687_v35, %v4675_v37 }
 0x4a4   :  { %5434 = vmatpush.bf16.msra.mxu0 %v8542_v22  ;;  %5447 = vmatpush.bf16.msra.mxu1 %v8550_v14  ;;  %v8562_v14 = vld [vmem:[%s9365_s15 + $0x1c0] sm:$0xff] }
 0x4a5   :  { %v4851_v15 = vmax.f32 %v4688_v57, 0.0 }
 0x4a6   :  { %5459 = vmatpush.bf16.msra.mxu2 %v8559_v28  ;;  %5472 = vmatpush.bf16.msra.mxu3 %v8567_v10 }
 0x4a7   :  { %v4859_v60 = vpack.c.bf16 %v4851_v15, %v4851_v15 }
 0x4a8   :  { %5435 = vmatpush.bf16.msra.mxu0 %v8541_v21  ;;  %5448 = vmatpush.bf16.msra.mxu1 %v8549_v23  ;;  %v4676_v43 = vpop.f32.mrf.mxu2  ;;  %v4689_v48 = vpop.f32.mrf.mxu3 }
 0x4aa   :  { %5460 = vmatpush.bf16.msra.mxu2 %v8558_v56  ;;  %5473 = vmatpush.bf16.msra.mxu3 %v8566_v0 }
 0x4ac   :  { %5436 = vmatpush.bf16.msra.mxu0 %v8540_v51  ;;  %5449 = vmatpush.bf16.msra.mxu1 %v8548_v25  ;;  %v3142_v51 = vperm.slane %v9102_v36, 7 }
 0x4ae   :  { %5461 = vmatpush.bf16.msra.mxu2 %v8557_v54  ;;  %5474 = vmatpush.bf16.msra.mxu3 %v8565_v11 }
 0x4b0   :  { %5437 = vmatpush.bf16.msra.mxu0 %v8539_v59  ;;  %5450 = vmatpush.bf16.msra.mxu1 %v8547_v38 }
 0x4b2   :  { %5462 = vmatpush.bf16.msra.mxu2 %v8556_v61  ;;  %5475 = vmatpush.bf16.msra.mxu3 %v8564_v26 }
 0x4b4   :  { %5438 = vmatpush.bf16.msra.mxu0 %v8538_v39  ;;  %5451 = vmatpush.bf16.msra.mxu1 %v8546_v40  ;;  %v4700_v50 = vpop.f32.mrf.mxu0  ;;  %v4713_v55 = vpop.f32.mrf.mxu1 }
 0x4b5   :  { %v4701_v62 = vadd.f32 %v4700_v50, %v3140_v45 }
 0x4b6   :  { %5463 = vmatpush.bf16.msra.mxu2 %v8555_v42  ;;  %5476 = vmatpush.bf16.msra.mxu3 %v8563_v19 }
 0x4b7   :  { %5439 = vmatmul.bf16.vlgmr.msra.gmra.mxu0 %v4859_v60  ;;  %v4714_v1 = vadd.f32 %v4713_v55, %v4701_v62 }
 0x4ba   :  { %5464 = vmatpush.bf16.msra.mxu2 %v8554_v47  ;;  %5477 = vmatpush.bf16.msra.mxu3 %v8562_v14 }
 0x4bc   :  { %v4702_v63 = vpop.f32.mrf.mxu0  ;;  %v4715_v5 = vpop.f32.mrf.mxu1 }
 0x4c0   :  { %v4726_v2 = vpop.f32.mrf.mxu2  ;;  %v4739_v27 = vpop.f32.mrf.mxu3 }
 0x4c1   :  { %v4727_v12 = vadd.f32 %v4726_v2, %v4714_v1 }
 0x4c3   :  { %v4740_v34 = vadd.f32 %v4739_v27, %v4727_v12 }
 0x4c5   :  { %v4852_v6 = vmax.f32 %v4740_v34, 0.0 }
 0x4c7   :  { %v4860_v41 = vpack.c.bf16 %v4852_v6, %v4852_v6 }
 0x4c8   :  { %v4728_v17 = vpop.f32.mrf.mxu2  ;;  %v4741_v49 = vpop.f32.mrf.mxu3 }
 0x4c9   :  { %5452 = vmatmul.bf16.vlgmr.msra.gmra.mxu1 %v4860_v41 }
 0x4d4   :  { %v4752_v7 = vpop.f32.mrf.mxu0  ;;  %v4765_v53 = vpop.f32.mrf.mxu1 }
 0x4d5   :  { %v4753_v46 = vadd.f32 %v4752_v7, %v3141_v13 }
 0x4d7   :  { %v4766_v18 = vadd.f32 %v4765_v53, %v4753_v46 }
 0x4dc   :  { %v4754_v16 = vpop.f32.mrf.mxu0  ;;  %v4767_v3 = vpop.f32.mrf.mxu1 }
 0x4e0   :  { %v4778_v4 = vpop.f32.mrf.mxu2  ;;  %v4791_v20 = vpop.f32.mrf.mxu3 }
 0x4e1   :  { %v4779_v58 = vadd.f32 %v4778_v4, %v4766_v18 }
 0x4e3   :  { %v4792_v22 = vadd.f32 %v4791_v20, %v4779_v58 }
 0x4e5   :  { %v4853_v52 = vmax.f32 %v4792_v22, 0.0 }
 0x4e7   :  { %v4861_v21 = vpack.c.bf16 %v4853_v52, %v4853_v52 }
 0x4e8   :  { %v4780_v23 = vpop.f32.mrf.mxu2  ;;  %v4793_v24 = vpop.f32.mrf.mxu3 }
 0x4e9   :  { %5465 = vmatmul.bf16.vlgmr.msra.gmra.mxu2 %v4861_v21 }
 0x4f4   :  { %v4804_v29 = vpop.f32.mrf.mxu0  ;;  %v4817_v32 = vpop.f32.mrf.mxu1 }
 0x4f5   :  { %v4805_v25 = vadd.f32 %v4804_v29, %v3142_v51 }
 0x4f7   :  { %v4818_v35 = vadd.f32 %v4817_v32, %v4805_v25 }
 0x4fc   :  { %v4806_v31 = vpop.f32.mrf.mxu0  ;;  %v4819_v33 = vpop.f32.mrf.mxu1 }
 0x500   :  { %v4830_v37 = vpop.f32.mrf.mxu2  ;;  %v4843_v59 = vpop.f32.mrf.mxu3 }
 0x501   :  { %v4831_v38 = vadd.f32 %v4830_v37, %v4818_v35 }
 0x503   :  { %v4844_v57 = vadd.f32 %v4843_v59, %v4831_v38 }
 0x505   :  { %v4854_v15 = vmax.f32 %v4844_v57, 0.0 }
 0x507   :  { %v4862_v30 = vpack.c.bf16 %v4854_v15, %v4854_v15 }
 0x508   :  { %v4832_v39 = vpop.f32.mrf.mxu2  ;;  %v4845_v40 = vpop.f32.mrf.mxu3 }
 0x509   :  { %5478 = vmatmul.bf16.vlgmr.msra.gmra.mxu3 %v4862_v30 }
 0x514   :  { %v5388_v43 = vpop.f32.mrf.mxu0  ;;  %v5401_v48 = vpop.f32.mrf.mxu1 }
 0x515   :  { %v5389_v36 = vadd.f32 %v8580_v44, %v5388_v43 }
 0x517   :  { %v5402_v60 = vadd.f32 %v5401_v48, %v5389_v36 }
 0x51c   :  { %v5390_v28 = vpop.f32.mrf.mxu0  ;;  %v5403_v50 = vpop.f32.mrf.mxu1 }
 0x520   :  { %v5414_v55 = vpop.f32.mrf.mxu2  ;;  %v5427_v56 = vpop.f32.mrf.mxu3 }
 0x521   :  { %v5415_v54 = vadd.f32 %v5414_v55, %v5402_v60 }
 0x523   :  { %v5428_v45 = vadd.f32 %v5427_v56, %v5415_v54 }
 0x528   :  { %v5416_v61 = vpop.f32.mrf.mxu2  ;;  %v5429_v62 = vpop.f32.mrf.mxu3 }
 0x534   :  { %v5440_v63 = vpop.f32.mrf.mxu0 }
 0x535   :  { %v5441_v5 = vadd.f32 %v5440_v63, %v5428_v45 }
 0x53c   :  { %v5442_v1 = vpop.f32.mrf.mxu0 }
 0x546   :  { %v5453_v2 = vpop.f32.mrf.mxu1 }
 0x547   :  { %v5454_v34 = vadd.f32 %v5453_v2, %v5441_v5 }
 0x54e   :  { %v5455_v27 = vpop.f32.mrf.mxu1 }
 0x56c   :  { %v5466_v42 = vpop.f32.mrf.mxu2 }
 0x56d   :  { %v5467_v47 = vadd.f32 %v5466_v42, %v5454_v34 }
 0x574   :  { %v5468_v12 = vpop.f32.mrf.mxu2 }
 0x58c   :  { %v5479_v6 = vpop.f32.mrf.mxu3 }
 0x58d   :  { %v5480_v8 = vadd.f32 %v5479_v6, %v5467_v47 }
 0x58f   :  { %8583 = vtanh.f32 %v5480_v8 }
 0x594   :  { %v5481_v41 = vpop.f32.mrf.mxu3 }
 0x595   :  { %v8584_v9 = vpop.eup %8583 }
 0x596   :  { %5484 = vst.msk [vmem:[%s9367_s17] sm:$0xff] %vm113_vm1, %v8584_v9 }
 0x597   :  { %5503 = vsyncpa [#allocation3], 1 }
 0x598   :  { %5504 = vsyncpa [#allocation5], 1 }

</bundles_post_ra>
